<compile_context>
chip_gen: v7x
topology: tpu7x:2x2x1
jax: 0.10.0
libtpu: 0.0.40
codegen_flags: <defaults>
</compile_context>

<pallas_src>
import math

import jax
import jax.numpy as jnp
from jax import lax
from jax.experimental import pallas as pl
from jax.experimental.pallas import tpu as pltpu

EPS = 1e-5  # RMSNorm eps (cs336 default)


# ----------------------- kernel A: ln1 + QKV + RoPE ------------------------ #
def qkv_rope_kernel(x_ref,                      # (1, Tq, D) f32
                    g1_ref,                     # (1, D)     f32
                    wqkv_ref,                   # (D, 3D)    bf16
                    cos_ref, sina_ref, sinb_ref,  # (Tq, D)   f32
                    q_ref, k_ref, v_ref):       # (1, H, Tq, hd) bf16
    f32, bf16 = jnp.float32, jnp.bfloat16
    D = x_ref.shape[2]
    H, hd = q_ref.shape[1], q_ref.shape[3]

    x = x_ref[0].astype(f32)                                  # (Tq, D)
    ms = jnp.mean(x * x, axis=-1, keepdims=True)
    xn = (x * lax.rsqrt(ms + EPS) * g1_ref[...]).astype(bf16)

    # fused QKV projection: full MXU output width (3D columns)
    qkv = jnp.dot(xn, wqkv_ref[...], preferred_element_type=f32)   # (Tq, 3D)
    q = qkv[:, :D]
    k = qkv[:, D:2 * D]
    v = qkv[:, 2 * D:]

    cos, sina, sinb = cos_ref[...], sina_ref[...], sinb_ref[...]

    def rope(t):
        # interleaved-pair rotation across the full D lanes; the lane-roll
        # wraparound (global and at head boundaries) is harmless because the
        # sina / sinb tables are exactly zero at those lanes.
        left = pltpu.roll(t, shift=D - 1, axis=1)    # t[j+1]
        right = pltpu.roll(t, shift=1, axis=1)       # t[j-1]
        return t * cos + left * sina + right * sinb

    q = rope(q).astype(bf16)
    k = rope(k).astype(bf16)
    v = v.astype(bf16)

    # head-major outputs: static, head-aligned lane slices done once per token
    for h in range(H):
        sl = slice(h * hd, (h + 1) * hd)
        q_ref[0, h] = q[:, sl]
        k_ref[0, h] = k[:, sl]
        v_ref[0, h] = v[:, sl]


# --------- kernel B: flash attention + Wo + residual + ln2 + SwiGLU --------- #
def attn_ffn_kernel(x_ref,                      # (1, Tq, D)    f32 (residual)
                    q_ref,                      # (1, H, Tq, hd) bf16
                    k_ref, v_ref,               # (1, H, S,  hd) bf16
                    wo_ref,                     # (D, D)        bf16
                    g2_ref,                     # (1, D)        f32
                    w1_ref, w3_ref,             # (D, Tf)       bf16
                    w2_ref,                     # (Tf, D)       bf16
                    o_ref,                      # (1, Tq, D)
                    yn_ref):                    # scratch (Tq, D) bf16: ln2(y)
    f32, bf16 = jnp.float32, jnp.bfloat16
    H, hd = q_ref.shape[1], q_ref.shape[3]
    Tq, D = o_ref.shape[1], o_ref.shape[2]
    Tk = Tq
    qt = pl.program_id(1)
    f = pl.program_id(2)
    nf = pl.num_programs(2)
    scale = 1.0 / math.sqrt(hd)
    NEG = -1e30

    # ---- attention + residual + ln2: only on the first FFN chunk ----
    @pl.when(f == 0)
    def _attention():
        q_row0 = pl.multiple_of(qt * Tq, Tq)

        def kv_step(h, k_row0, m_i, l_i, acc, masked):
            k_h = k_ref[0, h, pl.ds(k_row0, Tk), :]             # (Tk, hd) bf16
            v_h = v_ref[0, h, pl.ds(k_row0, Tk), :]
            s = lax.dot_general(q_ref[0, h], k_h, (((1,), (1,)), ((), ())),
                                preferred_element_type=f32) * scale  # (Tq, Tk)
            if masked:  # causal mask only on the diagonal key tile
                row_i = lax.broadcasted_iota(jnp.int32, (Tq, Tk), 0)
                col_j = lax.broadcasted_iota(jnp.int32, (Tq, Tk), 1)
                s = s + jnp.where(row_i >= col_j, 0.0, NEG)
            m_new = jnp.maximum(m_i, jnp.max(s, axis=-1, keepdims=True))
            alpha = jnp.exp(m_i - m_new)
            p = jnp.exp(s - m_new)
            l_new = alpha * l_i + jnp.sum(p, axis=-1, keepdims=True)
            acc_new = alpha * acc + jnp.dot(p.astype(bf16), v_h,
                                            preferred_element_type=f32)
            return m_new, l_new, acc_new

        head_outs = []
        for h in range(H):                       # static -> fully unrolled
            def body(kb, carry, h=h):
                m_i, l_i, acc = carry
                k_row0 = pl.multiple_of(kb * Tk, Tk)
                return kv_step(h, k_row0, m_i, l_i, acc, masked=False)

            m0 = jnp.full((Tq, 1), NEG, f32)
            l0 = jnp.zeros((Tq, 1), f32)
            a0 = jnp.zeros((Tq, hd), f32)
            # off-diagonal (fully visible) key tiles: 0 .. qt-1
            m_i, l_i, acc = lax.fori_loop(0, qt, body, (m0, l0, a0))
            # diagonal key tile with causal mask
            m_i, l_i, acc = kv_step(h, q_row0, m_i, l_i, acc, masked=True)
            o_h = acc * pl.reciprocal(l_i, approx=True)          # (Tq, hd)
            head_outs.append(o_h.astype(bf16))

        attn_cat = (head_outs[0] if H == 1
                    else jnp.concatenate(head_outs, axis=-1))    # (Tq, D) bf16
        attn = jnp.dot(attn_cat, wo_ref[...], preferred_element_type=f32)
        y = x_ref[0].astype(f32) + attn
        o_ref[0] = y.astype(o_ref.dtype)                         # residual #1
        ms = jnp.mean(y * y, axis=-1, keepdims=True)
        yn_ref[...] = (y * lax.rsqrt(ms + EPS) * g2_ref[...]).astype(bf16)

    # ---- SwiGLU FFN, streamed over F in chunks of Tf ----
    yn = yn_ref[...]                                             # (Tq, D) bf16
    a = jnp.dot(yn, w1_ref[...], preferred_element_type=f32)     # (Tq, Tf)
    b = jnp.dot(yn, w3_ref[...], preferred_element_type=f32)     # (Tq, Tf)
    gated = (a * jax.nn.sigmoid(a)) * b                          # SiLU(a) * b
    ffn = jnp.dot(gated.astype(bf16), w2_ref[...], preferred_element_type=f32)
    o_ref[0] = (o_ref[0].astype(f32) + ffn).astype(o_ref.dtype)  # residual #2


# ------------------------------ wrapper ------------------------------------ #
def _vmem_cap_bytes():
    try:
        info = pltpu.get_tpu_info()
        for attr in ("vmem_capacity_bytes", "vmem_size_bytes"):
            cap = getattr(info, attr, None)
            if cap:
                return int(cap)
    except Exception:
        pass
    return 128 * 1024 * 1024  # v5e/v6e default; v7x detected via get_tpu_info


def _vmem_limit(est_bytes):
    cap = _vmem_cap_bytes()
    return int(min(max(2 * est_bytes, 32 * 1024 * 1024), int(0.85 * cap)))


def transformer_block(x, params, num_heads, q_tile=128, f_tile=None):
    B, S, D = x.shape
    H = num_heads
    hd = D // H
    F = params["w1"].shape[1]
    Tq = min(q_tile, S)
    assert S % Tq == 0, "seq_len must be a multiple of the query tile"
    NQ = S // Tq
    Tf = f_tile if f_tile is not None else min(F, 512)
    assert F % Tf == 0, "d_ff must be a multiple of the FFN chunk"
    NF = F // Tf
    bf16, f32 = jnp.bfloat16, jnp.float32

    wqkv = jnp.concatenate([params["wq"], params["wk"], params["wv"]],
                           axis=1).astype(bf16)                  # (D, 3D)
    wo = params["wo"].astype(bf16)
    w1 = params["w1"].astype(bf16)
    w3 = params["w3"].astype(bf16)
    w2 = params["w2"].astype(bf16)
    g1 = params["g1"].astype(f32)
    g2 = params["g2"].astype(f32)
    cos_f = params["cos_full"].astype(f32)                       # (S, D)
    sina_f = params["sina_full"].astype(f32)
    sinb_f = params["sinb_full"].astype(f32)

    # -------------------- kernel A: ln1 + QKV + RoPE --------------------
    bytes_a = (2 * (Tq * D * 4)            # x blocks (double-buffered)
               + 2 * 3 * (Tq * D * 4)      # rope tables
               + 2 * (D * 3 * D * 2)       # wqkv
               + 2 * (D * 4)               # g1
               + 2 * 3 * (Tq * hd * H * 2))  # q/k/v out blocks
    qkv_call = pl.pallas_call(
        qkv_rope_kernel,
        grid_spec=pltpu.PrefetchScalarGridSpec(
            num_scalar_prefetch=0,
            grid=(B, NQ),
            in_specs=[
                pl.BlockSpec((1, Tq, D), lambda b, i: (b, i, 0)),
                pl.BlockSpec((1, D), lambda b, i: (0, 0)),
                pl.BlockSpec((D, 3 * D), lambda b, i: (0, 0)),
                pl.BlockSpec((Tq, D), lambda b, i: (i, 0)),
                pl.BlockSpec((Tq, D), lambda b, i: (i, 0)),
                pl.BlockSpec((Tq, D), lambda b, i: (i, 0)),
            ],
            out_specs=[
                pl.BlockSpec((1, H, Tq, hd), lambda b, i: (b, 0, i, 0)),
                pl.BlockSpec((1, H, Tq, hd), lambda b, i: (b, 0, i, 0)),
                pl.BlockSpec((1, H, Tq, hd), lambda b, i: (b, 0, i, 0)),
            ],
        ),
        out_shape=(jax.ShapeDtypeStruct((B, H, S, hd), bf16),
                   jax.ShapeDtypeStruct((B, H, S, hd), bf16),
                   jax.ShapeDtypeStruct((B, H, S, hd), bf16)),
        compiler_params=pltpu.CompilerParams(
            dimension_semantics=("parallel", "parallel"),
            vmem_limit_bytes=_vmem_limit(bytes_a)),
    )
    q, k, v = qkv_call(x, g1, wqkv, cos_f, sina_f, sinb_f)

    # ------- kernel B: flash attention + Wo + residual + ln2 + FFN -------
    bytes_b = (2 * (Tq * D * 4)            # x
               + 2 * (Tq * D * 2)          # q tile
               + 2 * 2 * (S * D * 2)       # k, v full rows (bf16)
               + 2 * (D * D * 2)           # wo
               + 2 * (D * 4)               # g2
               + 2 * 2 * (D * Tf * 2)      # w1, w3 chunks
               + 2 * (Tf * D * 2)          # w2 chunk
               + 2 * (Tq * D * 4)          # out
               + (Tq * D * 2))             # yn scratch
    attn_call = pl.pallas_call(
        attn_ffn_kernel,
        grid_spec=pltpu.PrefetchScalarGridSpec(
            num_scalar_prefetch=0,
            grid=(B, NQ, NF),
            in_specs=[
                pl.BlockSpec((1, Tq, D), lambda b, i, f: (b, i, 0)),
                pl.BlockSpec((1, H, Tq, hd), lambda b, i, f: (b, 0, i, 0)),
                pl.BlockSpec((1, H, S, hd), lambda b, i, f: (b, 0, 0, 0)),
                pl.BlockSpec((1, H, S, hd), lambda b, i, f: (b, 0, 0, 0)),
                pl.BlockSpec((D, D), lambda b, i, f: (0, 0)),
                pl.BlockSpec((1, D), lambda b, i, f: (0, 0)),
                pl.BlockSpec((D, Tf), lambda b, i, f: (0, f)),
                pl.BlockSpec((D, Tf), lambda b, i, f: (0, f)),
                pl.BlockSpec((Tf, D), lambda b, i, f: (f, 0)),
            ],
            out_specs=pl.BlockSpec((1, Tq, D), lambda b, i, f: (b, i, 0)),
            scratch_shapes=[pltpu.VMEM((Tq, D), bf16)],
        ),
        out_shape=jax.ShapeDtypeStruct((B, S, D), x.dtype),
        compiler_params=pltpu.CompilerParams(
            dimension_semantics=("parallel", "parallel", "arbitrary"),
            vmem_limit_bytes=_vmem_limit(bytes_b)),
    )
    # TODO(synk): for very large D also stream the attention weights per head
    # (extra head grid axis) instead of keeping wqkv / wo fully resident.
    return attn_call(x, q, k, v, wo, g2, w1, w3, w2)


# ------------------------- params / RoPE tables ----------------------------- #
def make_rope_tables(S, head_dim, num_heads, theta=10000.0):
    half = head_dim // 2
    inv_freq = 1.0 / (theta ** (jnp.arange(half, dtype=jnp.float32) * 2.0 / head_dim))
    ang = jnp.arange(S, dtype=jnp.float32)[:, None] * inv_freq[None, :]   # (S, half)
    cos, sin = jnp.cos(ang), jnp.sin(ang)

    cos_h = jnp.repeat(cos, 2, axis=-1)                                   # (S, hd)
    sin_h = jnp.repeat(sin, 2, axis=-1)
    even = (jnp.arange(head_dim) % 2 == 0)[None, :]
    sina_h = jnp.where(even, -sin_h, 0.0)   # coefficient of t[j+1]; zero at odd lanes
    sinb_h = jnp.where(even, 0.0, sin_h)    # coefficient of t[j-1]; zero at even lanes
    # full-width (S, D) tables (tiled across heads): RoPE is applied to the
    # whole projection output at once in kernel A.
    cos_full = jnp.tile(cos_h, (1, num_heads))
    sina_full = jnp.tile(sina_h, (1, num_heads))
    sinb_full = jnp.tile(sinb_h, (1, num_heads))
    return cos_full, sina_full, sinb_full, cos, sin


def make_params(key, D, F, S, num_heads):
    ks = jax.random.split(key, 9)
    std = 0.02
    bf16 = jnp.bfloat16

    def w(k, shape):
        return (jax.random.normal(k, shape, jnp.float32) * std).astype(bf16)

    p = {
        "wq": w(ks[0], (D, D)), "wk": w(ks[1], (D, D)),
        "wv": w(ks[2], (D, D)), "wo": w(ks[3], (D, D)),
        "w1": w(ks[4], (D, F)), "w3": w(ks[5], (D, F)), "w2": w(ks[6], (F, D)),
        "g1": 1.0 + 0.1 * jax.random.normal(ks[7], (1, D), jnp.float32),
        "g2": 1.0 + 0.1 * jax.random.normal(ks[8], (1, D), jnp.float32),
    }
    hd = D // num_heads
    cos_f, sina_f, sinb_f, cos, sin = make_rope_tables(S, hd, num_heads)
    p.update({"cos_full": cos_f, "sina_full": sina_f, "sinb_full": sinb_f,
              "cos_half": cos, "sin_half": sin})
    return p


# -------------------------- pure-JAX reference ------------------------------ #
def reference(x, params, num_heads):
    B, S, D = x.shape
    hd = D // num_heads
    cos, sin = params["cos_half"], params["sin_half"]
    f32 = jnp.float32

    wq = params["wq"].astype(f32); wk = params["wk"].astype(f32)
    wv = params["wv"].astype(f32); wo = params["wo"].astype(f32)
    w1 = params["w1"].astype(f32); w3 = params["w3"].astype(f32)
    w2 = params["w2"].astype(f32)

    def rms(v, g):
        return v * lax.rsqrt(jnp.mean(v * v, -1, keepdims=True) + EPS) * g

    def rope(t):  # (B, S, H, hd), interleaved-pair rotation
        tr = t.reshape(B, S, num_heads, hd // 2, 2)
        x1, x2 = tr[..., 0], tr[..., 1]
        c = cos[None, :, None, :]
        s = sin[None, :, None, :]
        return jnp.stack([x1 * c - x2 * s, x1 * s + x2 * c], -1).reshape(
            B, S, num_heads, hd)

    xn = rms(x, params["g1"][0])
    q = (xn @ wq).reshape(B, S, num_heads, hd)
    k = (xn @ wk).reshape(B, S, num_heads, hd)
    v = (xn @ wv).reshape(B, S, num_heads, hd)
    q, k = rope(q), rope(k)
    s = jnp.einsum("bqhd,bkhd->bhqk", q, k) / math.sqrt(hd)
    mask = jnp.tril(jnp.ones((S, S), bool))
    s = jnp.where(mask, s, -jnp.inf)
    p = jax.nn.softmax(s, axis=-1)
    attn = jnp.einsum("bhqk,bkhd->bqhd", p, v).reshape(B, S, D) @ wo
    y = x + attn
    yn = rms(y, params["g2"][0])
    ffn = (jax.nn.silu(yn @ w1) * (yn @ w3)) @ w2
    return y + ffn


# --------------------------------- main ------------------------------------- #
if __name__ == "__main__":
    # small but structure-exercising shapes: 2 query tiles, 2 heads (hd=128,
    # lane-dense head-major q/k/v), 2 FFN chunks.
    B, S, D, H, F = 2, 256, 256, 2, 512
    Tq, Tf = 128, 256

    key = jax.random.PRNGKey(0)
    kx, kp = jax.random.split(key)
    x = jax.random.normal(kx, (B, S, D), jnp.float32)
    params = make_params(kp, D, F, S, H)

    out = transformer_block(x, params, H, q_tile=Tq, f_tile=Tf)
    out = jax.block_until_ready(out)

    ref = reference(x, params, H)
    assert out.shape == (B, S, D)
    assert bool(jnp.all(jnp.isfinite(out)))
    max_err = float(jnp.max(jnp.abs(out - ref)))
    assert bool(jnp.allclose(out, ref, rtol=2e-2, atol=2e-2)), (
        f"mismatch vs reference, max abs err {max_err}")

    print("KERNEL_OK")
</pallas_src>

<mosaic_0001>
module attributes {stable_mosaic.version = 11 : i64} {
  func.func @qkv_rope_kernel(%arg0: i32, %arg1: i32, %arg2: memref<1x128x256xf32, #tpu.memory_space<vmem>>, %arg3: memref<1x256xf32, #tpu.memory_space<vmem>>, %arg4: memref<256x768xbf16, #tpu.memory_space<vmem>>, %arg5: memref<128x256xf32, #tpu.memory_space<vmem>>, %arg6: memref<128x256xf32, #tpu.memory_space<vmem>>, %arg7: memref<128x256xf32, #tpu.memory_space<vmem>>, %arg8: memref<1x2x128x128xbf16, #tpu.memory_space<vmem>>, %arg9: memref<1x2x128x128xbf16, #tpu.memory_space<vmem>>, %arg10: memref<1x2x128x128xbf16, #tpu.memory_space<vmem>>) attributes {dimension_semantics = [#tpu.dimension_semantics<parallel>, #tpu.dimension_semantics<parallel>], iteration_bounds = array<i64: 2, 2>, scalar_prefetch = 0 : i64, scratch_operands = 0 : i64, tpu.core_type = #tpu.core_type<tc>, window_params = [{transform_indices = @transform_0, window_bounds = array<i64: 1, 128, 256>}, {pipeline_mode = #tpu.pipeline_mode<synchronous>, transform_indices = @transform_1, window_bounds = array<i64: 1, 256>}, {pipeline_mode = #tpu.pipeline_mode<synchronous>, transform_indices = @transform_2, window_bounds = array<i64: 256, 768>}, {transform_indices = @transform_3, window_bounds = array<i64: 128, 256>}, {transform_indices = @transform_4, window_bounds = array<i64: 128, 256>}, {transform_indices = @transform_5, window_bounds = array<i64: 128, 256>}, {transform_indices = @transform_6, window_bounds = array<i64: 1, 2, 128, 128>}, {transform_indices = @transform_7, window_bounds = array<i64: 1, 2, 128, 128>}, {transform_indices = @transform_8, window_bounds = array<i64: 1, 2, 128, 128>}]} {
    %c0 = arith.constant 0 : index
    %c0_0 = arith.constant 0 : index
    %c0_1 = arith.constant 0 : index
    %0 = vector.load %arg2[%c0, %c0_0, %c0_1] : memref<1x128x256xf32, #tpu.memory_space<vmem>>, vector<1x128x256xf32>
    %1 = vector.shape_cast %0 : vector<1x128x256xf32> to vector<128x256xf32>
    %2 = arith.mulf %1, %1 : vector<128x256xf32>
    %cst = arith.constant dense<0.000000e+00> : vector<128xf32>
    %3 = vector.multi_reduction <add>, %2, %cst [1] : vector<128x256xf32> to vector<128xf32>
    %4 = vector.shape_cast %3 : vector<128xf32> to vector<128x1xf32>
    %cst_2 = arith.constant 2.560000e+02 : f32
    %5 = vector.broadcast %cst_2 : f32 to vector<128x1xf32>
    %6 = arith.divf %4, %5 : vector<128x1xf32>
    %cst_3 = arith.constant 9.99999974E-6 : f32
    %7 = vector.broadcast %cst_3 : f32 to vector<128x1xf32>
    %8 = arith.addf %6, %7 : vector<128x1xf32>
    %9 = math.rsqrt %8 : vector<128x1xf32>
    %10 = vector.broadcast %9 : vector<128x1xf32> to vector<128x256xf32>
    %11 = arith.mulf %1, %10 : vector<128x256xf32>
    %c0_4 = arith.constant 0 : index
    %c0_5 = arith.constant 0 : index
    %12 = vector.load %arg3[%c0_4, %c0_5] : memref<1x256xf32, #tpu.memory_space<vmem>>, vector<1x256xf32>
    %13 = vector.broadcast %12 : vector<1x256xf32> to vector<128x256xf32>
    %14 = arith.mulf %11, %13 : vector<128x256xf32>
    %15 = arith.truncf %14 : vector<128x256xf32> to vector<128x256xbf16>
    %c0_6 = arith.constant 0 : index
    %c0_7 = arith.constant 0 : index
    %16 = vector.load %arg4[%c0_6, %c0_7] : memref<256x768xbf16, #tpu.memory_space<vmem>>, vector<256x768xbf16>
    %cst_8 = arith.constant dense<0.000000e+00> : vector<128x768xf32>
    %17 = tpu.matmul %15, %16, %cst_8 {dimension_numbers = #tpu.dot_dimension_numbers<[1], [0], [0], [1], [0, 0, 1, 1], [], []>} : vector<128x256xbf16>, vector<256x768xbf16>, vector<128x768xf32> -> vector<128x768xf32>
    %18 = vector.extract_strided_slice %17 {offsets = [0, 0], sizes = [128, 256], strides = [1, 1]} : vector<128x768xf32> to vector<128x256xf32>
    %19 = vector.extract_strided_slice %17 {offsets = [0, 256], sizes = [128, 256], strides = [1, 1]} : vector<128x768xf32> to vector<128x256xf32>
    %20 = vector.extract_strided_slice %17 {offsets = [0, 512], sizes = [128, 256], strides = [1, 1]} : vector<128x768xf32> to vector<128x256xf32>
    %c0_9 = arith.constant 0 : index
    %c0_10 = arith.constant 0 : index
    %21 = vector.load %arg5[%c0_9, %c0_10] : memref<128x256xf32, #tpu.memory_space<vmem>>, vector<128x256xf32>
    %c0_11 = arith.constant 0 : index
    %c0_12 = arith.constant 0 : index
    %22 = vector.load %arg6[%c0_11, %c0_12] : memref<128x256xf32, #tpu.memory_space<vmem>>, vector<128x256xf32>
    %c0_13 = arith.constant 0 : index
    %c0_14 = arith.constant 0 : index
    %23 = vector.load %arg7[%c0_13, %c0_14] : memref<128x256xf32, #tpu.memory_space<vmem>>, vector<128x256xf32>
    %c255_i32 = arith.constant 255 : i32
    %24 = tpu.dynamic_rotate %18 by %c255_i32 dim 1 : vector<128x256xf32>, i32 -> vector<128x256xf32>
    %c1_i32 = arith.constant 1 : i32
    %25 = tpu.dynamic_rotate %18 by %c1_i32 dim 1 : vector<128x256xf32>, i32 -> vector<128x256xf32>
    %26 = arith.mulf %18, %21 : vector<128x256xf32>
    %27 = arith.mulf %24, %22 : vector<128x256xf32>
    %28 = arith.addf %26, %27 : vector<128x256xf32>
    %29 = arith.mulf %25, %23 : vector<128x256xf32>
    %30 = arith.addf %28, %29 : vector<128x256xf32>
    %31 = arith.truncf %30 : vector<128x256xf32> to vector<128x256xbf16>
    %c255_i32_15 = arith.constant 255 : i32
    %32 = tpu.dynamic_rotate %19 by %c255_i32_15 dim 1 : vector<128x256xf32>, i32 -> vector<128x256xf32>
    %c1_i32_16 = arith.constant 1 : i32
    %33 = tpu.dynamic_rotate %19 by %c1_i32_16 dim 1 : vector<128x256xf32>, i32 -> vector<128x256xf32>
    %34 = arith.mulf %19, %21 : vector<128x256xf32>
    %35 = arith.mulf %32, %22 : vector<128x256xf32>
    %36 = arith.addf %34, %35 : vector<128x256xf32>
    %37 = arith.mulf %33, %23 : vector<128x256xf32>
    %38 = arith.addf %36, %37 : vector<128x256xf32>
    %39 = arith.truncf %38 : vector<128x256xf32> to vector<128x256xbf16>
    %40 = arith.truncf %20 : vector<128x256xf32> to vector<128x256xbf16>
    %41 = vector.extract_strided_slice %31 {offsets = [0, 0], sizes = [128, 128], strides = [1, 1]} : vector<128x256xbf16> to vector<128x128xbf16>
    %c0_17 = arith.constant 0 : index
    %c0_18 = arith.constant 0 : index
    %c0_19 = arith.constant 0 : index
    %c0_20 = arith.constant 0 : index
    %42 = vector.load %arg8[%c0_17, %c0_18, %c0_19, %c0_20] : memref<1x2x128x128xbf16, #tpu.memory_space<vmem>>, vector<1x1x128x128xbf16>
    %43 = vector.shape_cast %42 : vector<1x1x128x128xbf16> to vector<128x128xbf16>
    %44 = vector.shape_cast %41 : vector<128x128xbf16> to vector<1x1x128x128xbf16>
    tpu.vector_store %arg8[%c0_17, %c0_18, %c0_19, %c0_20], %44 {strides = array<i32>} : memref<1x2x128x128xbf16, #tpu.memory_space<vmem>>, vector<1x1x128x128xbf16>,
    %45 = vector.extract_strided_slice %39 {offsets = [0, 0], sizes = [128, 128], strides = [1, 1]} : vector<128x256xbf16> to vector<128x128xbf16>
    %c0_21 = arith.constant 0 : index
    %c0_22 = arith.constant 0 : index
    %c0_23 = arith.constant 0 : index
    %c0_24 = arith.constant 0 : index
    %46 = vector.load %arg9[%c0_21, %c0_22, %c0_23, %c0_24] : memref<1x2x128x128xbf16, #tpu.memory_space<vmem>>, vector<1x1x128x128xbf16>
    %47 = vector.shape_cast %46 : vector<1x1x128x128xbf16> to vector<128x128xbf16>
    %48 = vector.shape_cast %45 : vector<128x128xbf16> to vector<1x1x128x128xbf16>
    tpu.vector_store %arg9[%c0_21, %c0_22, %c0_23, %c0_24], %48 {strides = array<i32>} : memref<1x2x128x128xbf16, #tpu.memory_space<vmem>>, vector<1x1x128x128xbf16>,
    %49 = vector.extract_strided_slice %40 {offsets = [0, 0], sizes = [128, 128], strides = [1, 1]} : vector<128x256xbf16> to vector<128x128xbf16>
    %c0_25 = arith.constant 0 : index
    %c0_26 = arith.constant 0 : index
    %c0_27 = arith.constant 0 : index
    %c0_28 = arith.constant 0 : index
    %50 = vector.load %arg10[%c0_25, %c0_26, %c0_27, %c0_28] : memref<1x2x128x128xbf16, #tpu.memory_space<vmem>>, vector<1x1x128x128xbf16>
    %51 = vector.shape_cast %50 : vector<1x1x128x128xbf16> to vector<128x128xbf16>
    %52 = vector.shape_cast %49 : vector<128x128xbf16> to vector<1x1x128x128xbf16>
    tpu.vector_store %arg10[%c0_25, %c0_26, %c0_27, %c0_28], %52 {strides = array<i32>} : memref<1x2x128x128xbf16, #tpu.memory_space<vmem>>, vector<1x1x128x128xbf16>,
    %53 = vector.extract_strided_slice %31 {offsets = [0, 128], sizes = [128, 128], strides = [1, 1]} : vector<128x256xbf16> to vector<128x128xbf16>
    %c0_29 = arith.constant 0 : index
    %c1 = arith.constant 1 : index
    %c0_30 = arith.constant 0 : index
    %c0_31 = arith.constant 0 : index
    %54 = vector.load %arg8[%c0_29, %c1, %c0_30, %c0_31] : memref<1x2x128x128xbf16, #tpu.memory_space<vmem>>, vector<1x1x128x128xbf16>
    %55 = vector.shape_cast %54 : vector<1x1x128x128xbf16> to vector<128x128xbf16>
    %56 = vector.shape_cast %53 : vector<128x128xbf16> to vector<1x1x128x128xbf16>
    tpu.vector_store %arg8[%c0_29, %c1, %c0_30, %c0_31], %56 {strides = array<i32>} : memref<1x2x128x128xbf16, #tpu.memory_space<vmem>>, vector<1x1x128x128xbf16>,
    %57 = vector.extract_strided_slice %39 {offsets = [0, 128], sizes = [128, 128], strides = [1, 1]} : vector<128x256xbf16> to vector<128x128xbf16>
    %c0_32 = arith.constant 0 : index
    %c1_33 = arith.constant 1 : index
    %c0_34 = arith.constant 0 : index
    %c0_35 = arith.constant 0 : index
    %58 = vector.load %arg9[%c0_32, %c1_33, %c0_34, %c0_35] : memref<1x2x128x128xbf16, #tpu.memory_space<vmem>>, vector<1x1x128x128xbf16>
    %59 = vector.shape_cast %58 : vector<1x1x128x128xbf16> to vector<128x128xbf16>
    %60 = vector.shape_cast %57 : vector<128x128xbf16> to vector<1x1x128x128xbf16>
    tpu.vector_store %arg9[%c0_32, %c1_33, %c0_34, %c0_35], %60 {strides = array<i32>} : memref<1x2x128x128xbf16, #tpu.memory_space<vmem>>, vector<1x1x128x128xbf16>,
    %61 = vector.extract_strided_slice %40 {offsets = [0, 128], sizes = [128, 128], strides = [1, 1]} : vector<128x256xbf16> to vector<128x128xbf16>
    %c0_36 = arith.constant 0 : index
    %c1_37 = arith.constant 1 : index
    %c0_38 = arith.constant 0 : index
    %c0_39 = arith.constant 0 : index
    %62 = vector.load %arg10[%c0_36, %c1_37, %c0_38, %c0_39] : memref<1x2x128x128xbf16, #tpu.memory_space<vmem>>, vector<1x1x128x128xbf16>
    %63 = vector.shape_cast %62 : vector<1x1x128x128xbf16> to vector<128x128xbf16>
    %64 = vector.shape_cast %61 : vector<128x128xbf16> to vector<1x1x128x128xbf16>
    tpu.vector_store %arg10[%c0_36, %c1_37, %c0_38, %c0_39], %64 {strides = array<i32>} : memref<1x2x128x128xbf16, #tpu.memory_space<vmem>>, vector<1x1x128x128xbf16>,
    return
  }
  func.func @transform_0(%arg0: i32, %arg1: i32) -> (i32, i32, i32) {
    %c0_i32 = arith.constant 0 : i32
    %c0_i32_0 = arith.constant 0 : i32
    return %arg0, %arg1, %c0_i32 : i32, i32, i32
  }
  func.func @transform_1(%arg0: i32, %arg1: i32) -> (i32, i32) {
    %c0_i32 = arith.constant 0 : i32
    %c0_i32_0 = arith.constant 0 : i32
    %c0_i32_1 = arith.constant 0 : i32
    return %c0_i32, %c0_i32_0 : i32, i32
  }
  func.func @transform_2(%arg0: i32, %arg1: i32) -> (i32, i32) {
    %c0_i32 = arith.constant 0 : i32
    %c0_i32_0 = arith.constant 0 : i32
    %c0_i32_1 = arith.constant 0 : i32
    return %c0_i32, %c0_i32_0 : i32, i32
  }
  func.func @transform_3(%arg0: i32, %arg1: i32) -> (i32, i32) {
    %c0_i32 = arith.constant 0 : i32
    %c0_i32_0 = arith.constant 0 : i32
    return %arg1, %c0_i32 : i32, i32
  }
  func.func @transform_4(%arg0: i32, %arg1: i32) -> (i32, i32) {
    %c0_i32 = arith.constant 0 : i32
    %c0_i32_0 = arith.constant 0 : i32
    return %arg1, %c0_i32 : i32, i32
  }
  func.func @transform_5(%arg0: i32, %arg1: i32) -> (i32, i32) {
    %c0_i32 = arith.constant 0 : i32
    %c0_i32_0 = arith.constant 0 : i32
    return %arg1, %c0_i32 : i32, i32
  }
  func.func @transform_6(%arg0: i32, %arg1: i32) -> (i32, i32, i32, i32) {
    %c0_i32 = arith.constant 0 : i32
    %c0_i32_0 = arith.constant 0 : i32
    %c0_i32_1 = arith.constant 0 : i32
    return %arg0, %c0_i32, %arg1, %c0_i32_0 : i32, i32, i32, i32
  }
  func.func @transform_7(%arg0: i32, %arg1: i32) -> (i32, i32, i32, i32) {
    %c0_i32 = arith.constant 0 : i32
    %c0_i32_0 = arith.constant 0 : i32
    %c0_i32_1 = arith.constant 0 : i32
    return %arg0, %c0_i32, %arg1, %c0_i32_0 : i32, i32, i32, i32
  }
  func.func @transform_8(%arg0: i32, %arg1: i32) -> (i32, i32, i32, i32) {
    %c0_i32 = arith.constant 0 : i32
    %c0_i32_0 = arith.constant 0 : i32
    %c0_i32_1 = arith.constant 0 : i32
    return %arg0, %c0_i32, %arg1, %c0_i32_0 : i32, i32, i32, i32
  }
}

</mosaic_0001>

<bundles_post_ra>
// kernel: tpu_custom_call.1
= control target key start
LH: loop header
LB: loop body
LE: loop exit
PB: predicated region body
PF: predicated region fallthrough
CT: control target
= control target key end

     0   :  { %s6452_s0 = inlined_call_operand.hbm [shape: f32[2,256,256], index: 0, kind: input, shape index: {}]   ;;  %s6453_s1 = inlined_call_operand.vmem [shape: f32[1,256], index: 1, kind: input, shape index: {}]   ;;  %s6454_s2 = inlined_call_operand.hbm [shape: bf16[256,768], index: 2, kind: input, shape index: {}]   ;;  %s6455_s3 = inlined_call_operand.hbm [shape: f32[256,256], index: 3, kind: input, shape index: {}]   ;;  %s6456_s4 = inlined_call_operand.hbm [shape: f32[256,256], index: 4, kind: input, shape index: {}]   ;;  %s6457_s5 = inlined_call_operand.hbm [shape: f32[256,256], index: 5, kind: input, shape index: {}]   ;;  %s6458_s6 = inlined_call_operand.hbm [shape: bf16[2,2,256,128], index: 6, kind: output, shape index: {0}]   ;;  %s6459_s7 = inlined_call_operand.hbm [shape: bf16[2,2,256,128], index: 7, kind: output, shape index: {1}]   ;;  %s6460_s8 = inlined_call_operand.hbm [shape: bf16[2,2,256,128], index: 8, kind: output, shape index: {2}]  }
   0x1   :  { %6528 = sst [smem:[#allocation71_spill]] %s6452_s0 }
   0x2   :  { %6529 = sst [smem:[#allocation72_spill]] %s6453_s1 }
   0x3   :  { %6530 = sst [smem:[#allocation73_spill]] %s6454_s2 }
   0x4   :  { %6531 = sst [smem:[#allocation74_spill]] %s6455_s3 }
   0x5   :  { %6532 = sst [smem:[#allocation75_spill]] %s6456_s4 }
   0x6   :  { %6533 = sst [smem:[#allocation76_spill]] %s6457_s5 }
   0x7   :  { %6534 = sst [smem:[#allocation77_spill]] %s6458_s6 }
   0x8   :  { %6535 = sst [smem:[#allocation78_spill]] %s6459_s7 }
   0x9   :  { %6536 = sst [smem:[#allocation79_spill]] %s6460_s8 }
   0xa   :  { %14 = vsyncpa [#allocation3], 0 }
   0xb   :  { %16 = vsyncpa [#allocation3 + $0x1], 0 }
   0xc   :  { %17 = vsyncpa [#allocation6], 0 }
   0xd   :  { %18 = vsyncpa [#allocation4], 0 }
   0xe   :  { %20 = vsyncpa [#allocation4 + $0x1], 0 }
   0xf   :  { %21 = vsyncpa [#allocation12], 0 }
  0x10   :  { %23 = vsyncpa [#allocation12 + $0x1], 0  ;;  %s4729_s27 = smov 0   ;;  %s4731_s28 = smov 0  }
  0x11   :  { %s4733_s29 = smov 0   ;;  %s4735_s30 = smov 0  }
  0x12   :  { %s4737_s9 = smov 0   ;;  %s4739_s10 = smov 0  }
  0x13   :  { %s4741_s11 = smov 0   ;;  %s4743_s12 = smov 0  }
  0x14   :  { %s4745_s13 = smov 0   ;;  %s4747_s14 = smov 0  }
  0x15   :  { %s4749_s15 = smov 0  }
  0x16 LB: > { %6537 = sst [smem:[#allocation25_spill]] %s4630_s10  ;;  %s38_s16 = sadd.s32 1, %s4642_s13  ;;  %s4650_s15 = sphi %s4749_s15, %s29_s15   ;;  %s4646_s14 = sphi %s4747_s14, %s6678_s14   ;;  %s4642_s13 = sphi %s4745_s13, %s6671_s13   ;;  %s4638_s12 = sphi %s4743_s12, %s6670_s12   ;;  %s4634_s11 = sphi %s4741_s11, %s6669_s11   ;;  %s4630_s10 = sphi %s4739_s10, %s6668_s10   ;;  %s4626_s9 = sphi %s4737_s9, %s6677_s9   ;;  %s4622_s30 = sphi %s4735_s30, %s6676_s30   ;;  %s4618_s29 = sphi %s4733_s29, %s6675_s29   ;;  %s4614_s28 = sphi %s4731_s28, %s6674_s28   ;;  %s4610_s27 = sphi %s4729_s27, %s6673_s27  }
  0x17   : > { %6538 = sst [smem:[#allocation26_spill]] %s4634_s11  ;;  %s41_s17 = sadd.s32 1, %s4646_s14 }
  0x18   : > { %6539 = sst [smem:[#allocation27_spill]] %s4638_s12  ;;  %p39_p0 = scmp.ge.s32.totalorder %s38_s16, 2 }
  0x19   : > { %6540 = sst [smem:[#allocation28_spill]] %s4642_s13  ;;  %s50_s18 = sadd.s32 1, %s4630_s10 }
  0x1a   : > { %6541 = sst [smem:[#allocation29_spill]] %s4646_s14  ;;  %p6464_p1 = scmp.ne.s32.totalorder %s4630_s10, %s4626_s9 }
  0x1b   : > { %p6466_p2 = scmp.eq.s32.totalorder %s4650_s15, 0  ;;  %s6680_s16 = smov (%p39_p0, %s38_s16), 0 }
  0x1c   : > { %6542 = sst [smem:[#allocation30_spill]] %s6680_s16  ;;  %s6682_s17 = smov (!%p39_p0, %s41_s17), %s4646_s14 }
  0x1d   : > { %s4795_s19 = ssub.s32 %s4642_s13, %s6680_s16  ;;  %p4802_p3 = por %p6466_p2, %p6464_p1 }
  0x1e   : > { %p43_p4 = scmp.ge.s32.totalorder %s6682_s17, 2  ;;  %p116_p5 = scmp.eq.s32.totalorder %s4795_s19, 0 }
  0x1f   : > { %p6465_p6 = scmp.lt.s32.totalorder %s4650_s15, 4  ;;  %s307_s21 = sand.u32 1, %s4650_s15  }
  0x20   : > { %s6684_s17 = smov (%p43_p4, %s6682_s17), 0  ;;  %s309_s22 = sand.u32 1, %s4630_s10  }
  0x21   : > { %6544 = sst [smem:[#allocation31_spill]] %s6684_s17  ;;  %s45_s23 = ssub.s32 %s4646_s14, %s6684_s17 }
  0x22   : > { %s47_s24 = sor.u32 %s4795_s19, %s45_s23  ;;  %s3337_s25 = sshll.u32 %s309_s22, 8 }
  0x23   : > { %p48_p7 = scmp.eq.s32.totalorder %s47_s24, 0  ;;  %s3617_s26 = sshll.u32 %s4642_s13, 5 }
  0x24   : > { %s3340_s16 = sshll.u32 %s4646_s14, 6  ;;  %s311_s6 = scalar_lea.vmem [#allocation2], %s3337_s25 }
  0x25   : > { %s4818_s8 = scalar_select %p48_p7, %s4630_s10, %s50_s18  }
  0x26   : > { %s318_s7 = sadd.s32 %s3617_s26, %s3340_s16  ;;  %s321_s12 = sshll.u32 %s311_s6, 4  ;;  %s4820_s12 = int_to_ptr.vmem [resolvable:$true] %s321_s12 }
  0x27   : > { %6545 = sst [smem:[#allocation32_spill]] %s4818_s8  ;;  %s3341_s11 = sshll.u32 %s318_s7, 7 }
  0x28   : > { %s6546_s0 = sld [smem:[#allocation71_spill]]  ;;  %p4831_p8 = pnand %p6465_p6, %p4802_p3 }
  0x29   : > { %s4835_s6 = scalar_lea.sflag [#allocation3], %s307_s21 }
  0x2a   : > { %p4398_p10 = pneg %p4831_p8 }
  0x2e   : > { %s4825_s5 = scalar_lea.hbm %s6546_s0, %s3341_s11  ;;  %s4401_s11 = scalar_lea.hbm %s6546_s0, 16384 }
  0x2f   : > { %s4396_s7 = scalar_lea.hbm %s4825_s5, 4096  ;;  %p4402_p13 = scmp.lt.u32.totalorder %s4825_s5, %s6546_s0 }
  0x30   : > { %p4397_p9 = scmp.ne.s32.totalorder %s4825_s5, %s4396_s7  ;;  %p4403_p0 = scmp.lt.u32.totalorder %s4401_s11, %s4396_s7 }
  0x31   : > { %p4405_p4 = scmp.lt.u32.totalorder %s4396_s7, %s4825_s5 }
  0x32   : > { %p4399_p11 = pnand %p4398_p10, %p4397_p9  ;;  %p4404_p3 = por %p4403_p0, %p4402_p13 }
  0x34   : > { %p4400_p12 = pneg %p4399_p11  ;;  %p4406_p7 = por %p4405_p4, %p4404_p3 }
  0x36   : > { %p4407_p1 = pnand %p4406_p7, %p4400_p12 }
  0x38   : > { %4410 = shalt.err (!%p4407_p1)
}
  0x39   : > { %s4411_s21 = scalar_lea.vmem %s4820_s12, 4096  ;;  %s4652_s22 = smov [#allocation2]  }
  0x3a   : > { %p4412_p9 = scmp.ne.s32.totalorder %s4820_s12, %s4411_s21  ;;  %s4416_s23 = sshll.u32 %s4652_s22, 4  ;;  %s4417_s23 = int_to_ptr.vmem [resolvable:$false] %s4416_s23 }
  0x3b   : > { %s4418_s24 = scalar_lea.vmem %s4417_s23, 8192  ;;  %p4419_p2 = scmp.lt.s32.totalorder %s4820_s12, %s4417_s23 }
  0x3c   : > { %p4414_p11 = pnand %p4412_p9, %p4398_p10  ;;  %p4420_p13 = scmp.lt.s32.totalorder %s4418_s24, %s4411_s21 }
  0x3e   : > { %p4415_p6 = pneg %p4414_p11  ;;  %p4421_p0 = por %p4420_p13, %p4419_p2 }
  0x40   : > { %p4422_p3 = pnand %p4421_p0, %p4415_p6 }
  0x42   : > { %4425 = shalt.err (!%p4422_p3)
}
  0x43   : > { %s6469_s25 = smov 256   ;;  %s6470_s26 = smov 16  }
  0x44   : > { %4080 = dma.hbm_to_vmem [thread:$0]  (!%p4831_p8), %s4825_s5, 4096, %s4820_s12, %s4835_s6, %s6469_s25, %s6469_s25, %s6470_s26  }
  0x45   : > { %s4867_s7 = sshll.u32 %s4642_s13, 12  ;;  %s118_s1 = sadd.s32 1, %s4618_s29 }
  0x46   : > { %p125_p1 = scmp.ne.s32.totalorder %s4618_s29, %s4614_s28  ;;  %p6549_p2 = scmp.eq.s32.totalorder %s4650_s15, 0 }
  0x47   : > { %s4875_s2 = scalar_select %p116_p5, %s4618_s29, %s118_s1  }
  0x48   : > { %p127_p6 = por %p125_p1, %p6549_p2  ;;  %s333_s11 = sand.u32 1, %s4618_s29  }
  0x49   : > { %6548 = sst [smem:[#allocation33_spill]] %s4875_s2  ;;  %s4880_s16 = sshll.u32 %s333_s11, 8 }
  0x4a   : > { %s6550_s3 = sld [smem:[#allocation74_spill]]  ;;  %p6551_p8 = scmp.lt.s32.totalorder %s4650_s15, 4 }
  0x4b   : > { %s335_s12 = scalar_lea.vmem [#allocation7], %s4880_s16 }
  0x4c   : > { %p4890_p10 = pnand %p6551_p8, %p127_p6  ;;  %s343_s19 = sshll.u32 %s335_s12, 4  ;;  %s4895_s19 = int_to_ptr.vmem [resolvable:$true] %s343_s19 }
  0x4e   : > { %s6552_s5 = scalar_select %p4890_p10, 1, 0 }
  0x4f   : > { %p4901_p12 = pneg %p4890_p10 }
  0x50   : > { %s4886_s18 = scalar_lea.hbm %s6550_s3, %s4867_s7  ;;  %s4431_s11 = scalar_lea.hbm %s6550_s3, 8192 }
  0x51   : > { %s4426_s22 = scalar_lea.hbm %s4886_s18, 4096  ;;  %p4432_p9 = scmp.lt.u32.totalorder %s4886_s18, %s6550_s3 }
  0x52   : > { %p4427_p5 = scmp.ne.s32.totalorder %s4886_s18, %s4426_s22  ;;  %p4433_p11 = scmp.lt.u32.totalorder %s4431_s11, %s4426_s22 }
  0x53   : > { %s6553_s23 = scalar_select %p4901_p12, 1, 0 }
  0x54   : > { %p4429_p4 = pnand %p4901_p12, %p4427_p5  ;;  %p4434_p13 = por %p4433_p11, %p4432_p9 }
  0x55   : > { %p4435_p0 = scmp.lt.u32.totalorder %s4426_s22, %s4886_s18 }
  0x56   : > { %p4430_p7 = pneg %p4429_p4 }
  0x57   : > { %p4436_p3 = por %p4435_p0, %p4434_p13 }
  0x59   : > { %p4437_p1 = pnand %p4436_p3, %p4430_p7 }
  0x5b   : > { %4440 = shalt.err (!%p4437_p1)
}
  0x5c   : > { %s4441_s12 = scalar_lea.vmem %s4895_s19, 4096  ;;  %s4655_s24 = smov [#allocation7]  }
  0x5d   : > { %p4442_p2 = scmp.ne.s32.totalorder %s4895_s19, %s4441_s12  ;;  %s4446_s1 = sshll.u32 %s4655_s24, 4  ;;  %s4447_s1 = int_to_ptr.vmem [resolvable:$false] %s4446_s1 }
  0x5e   : > { %s4448_s20 = scalar_lea.vmem %s4447_s1, 8192  ;;  %p4449_p5 = scmp.lt.s32.totalorder %s4895_s19, %s4447_s1 }
  0x5f   : > { %p4444_p6 = pnand %p4442_p2, %p4901_p12  ;;  %p4450_p4 = scmp.lt.s32.totalorder %s4448_s20, %s4441_s12 }
  0x61   : > { %p4445_p8 = pneg %p4444_p6  ;;  %p4451_p9 = por %p4450_p4, %p4449_p5 }
  0x63   : > { %p4452_p11 = pnand %p4451_p9, %p4445_p8 }
  0x65   : > { %4455 = shalt.err (!%p4452_p11)
}
  0x66   : > { %4083 = dma.hbm_to_vmem [thread:$0]  (!%p4890_p10), %s4886_s18, 4096, %s4895_s19, %s4835_s6, %s6469_s25, %s6469_s25, %s6470_s26  }
  0x67   : > { %s6554_s4 = sld [smem:[#allocation75_spill]]  ;;  %s357_s12 = scalar_lea.vmem [#allocation8], %s4880_s16 }
  0x68   : > { %s365_s24 = sshll.u32 %s357_s12, 4  ;;  %s4935_s24 = int_to_ptr.vmem [resolvable:$true] %s365_s24 }
  0x6d   : > { %s4932_s21 = scalar_lea.hbm %s6554_s4, %s4867_s7  ;;  %s4461_s19 = scalar_lea.hbm %s6554_s4, 8192 }
  0x6e   : > { %s4456_s1 = scalar_lea.hbm %s4932_s21, 4096  ;;  %p4462_p3 = scmp.lt.u32.totalorder %s4932_s21, %s6554_s4 }
  0x6f   : > { %p4457_p7 = scmp.ne.s32.totalorder %s4932_s21, %s4456_s1  ;;  %p4463_p1 = scmp.lt.u32.totalorder %s4461_s19, %s4456_s1 }
  0x70   : > { %p4465_p6 = scmp.lt.u32.totalorder %s4456_s1, %s4932_s21 }
  0x71   : > { %p4459_p13 = pnand %p4457_p7, %p4901_p12  ;;  %p4464_p2 = por %p4463_p1, %p4462_p3 }
  0x73   : > { %p4460_p0 = pneg %p4459_p13  ;;  %p4466_p8 = por %p4465_p6, %p4464_p2 }
  0x75   : > { %p4467_p5 = pnand %p4466_p8, %p4460_p0 }
  0x77   : > { %4470 = shalt.err (!%p4467_p5)
}
  0x78   : > { %s4471_s12 = scalar_lea.vmem %s4935_s24, 4096  ;;  %s4656_s20 = smov [#allocation8]  }
  0x79   : > { %p4472_p4 = scmp.ne.s32.totalorder %s4935_s24, %s4471_s12  ;;  %s4476_s18 = sshll.u32 %s4656_s20, 4  ;;  %s4477_s18 = int_to_ptr.vmem [resolvable:$false] %s4476_s18 }
  0x7a   : > { %s4478_s22 = scalar_lea.vmem %s4477_s18, 8192  ;;  %p4479_p7 = scmp.lt.s32.totalorder %s4935_s24, %s4477_s18 }
  0x7b   : > { %p4474_p9 = pnand %p4472_p4, %p4901_p12  ;;  %p4480_p13 = scmp.lt.s32.totalorder %s4478_s22, %s4471_s12 }
  0x7d   : > { %p4475_p11 = pneg %p4474_p9  ;;  %p4481_p3 = por %p4480_p13, %p4479_p7 }
  0x7f   : > { %p4482_p1 = pnand %p4481_p3, %p4475_p11 }
  0x81   : > { %4485 = shalt.err (!%p4482_p1)
}
  0x82   : > { %4086 = dma.hbm_to_vmem [thread:$0]  (!%p4890_p10), %s4932_s21, 4096, %s4935_s24, %s4835_s6, %s6469_s25, %s6469_s25, %s6470_s26  }
  0x83   : > { %s4963_s1 = sadd.s32 4294967295, %s4650_s15   ;;  %s6468_s19 = sadd.s32 4294967294, %s4650_s15  }
  0x84   : > { %p63_p0 = scmp.ne.s32.totalorder %s4626_s9, %s4622_s30  ;;  %p6475_p2 = scmp.eq.s32.totalorder %s4963_s1, 0 }
  0x85   : > { %p131_p6 = scmp.ne.s32.totalorder %s4614_s28, %s4610_s27  ;;  %p209_p8 = scmp.eq.s32.totalorder %s4963_s1, 3 }
  0x86   : > { %p215_p5 = scmp.eq.s32.totalorder %s6468_s19, 3  ;;  %p4976_p4 = por %p6475_p2, %p63_p0 }
  0x87   : > { %p4982_p9 = por %p131_p6, %p6475_p2  ;;  %p6557_p11 = scmp.ne.s32.totalorder %s4630_s10, %s4626_s9 }
  0x88   : > { %s6555_s11 = scalar_select %p4976_p4, 1, 0 }
  0x89   : > { %s6556_s21 = scalar_select %p4982_p9, 1, 0 }
  0x8a   : > { %p4989_p7 = por %p209_p8, %p6557_p11  ;;  %p4993_p13 = por %p215_p5, %p63_p0 }
  0x8b   : > { %p3334_p3 = scmp.ge.s32.totalorder %s4650_s15, 1  ;;  %p278_p1 = scmp.lt.s32.totalorder %s4650_s15, 5 }
  0x8c   : > { %s6558_s24 = scalar_select %p4989_p7, 1, 0 }
  0x8d   : > { %s6559_s27 = scalar_select %p4993_p13, 1, 0 }
  0x8e   : > { %p4999_p10 = pnand %p3334_p3, %p278_p1  ;;  %s4657_s20 = smov [#allocation5]  }
  0x8f   : > { %s293_s18 = sshll.u32 %s4657_s20, 4  ;;  %s379_s19 = scalar_lea.vmem [#allocation9], %s4880_s16  ;;  %s5003_s18 = int_to_ptr.vmem [resolvable:$true] %s293_s18 }
  0x90   : > { %s6560_s12 = scalar_select %p4999_p10, 1, 0 }
  0x91   : > { %p4073_p6 = pneg %p4999_p10  ;;  %s387_s25 = sshll.u32 %s379_s19, 4  ;;  %s5020_s25 = int_to_ptr.vmem [resolvable:$true] %s387_s25 }
  0x92   : > { %s6562_s3 = sld [smem:[#allocation76_spill]]  ;;  %s6563_s14 = sld [smem:[#allocation73_spill]] }
  0x93   : > { %p5009_p8 = pnand %p4073_p6, %p6475_p2 }
  0x95   : > { %p4488_p5 = pneg %p5009_p8 }
  0x98   : > { %s5018_s4 = scalar_lea.hbm %s6562_s3, %s4867_s7  ;;  %s6564_s8 = smov %s6563_s14 }
  0x99   : > { %s4486_s13 = scalar_lea.hbm %s6563_s14, 12288 }
  0x9a   : > { %p4487_p0 = scmp.ne.s32.totalorder %s6564_s8, %s4486_s13  ;;  %p4493_p1 = scmp.lt.u32.totalorder %s4486_s13, %s6564_s8 }
  0x9c   : > { %p4489_p11 = pnand %p4488_p5, %p4487_p0 }
  0x9e   : > { %p4490_p3 = pneg %p4489_p11 }
  0xa0   : > { %p4495_p6 = pnand %p4493_p1, %p4490_p3 }
  0xa2   : > { %4498 = shalt.err (!%p4495_p6)
}
  0xa3   : > { %s4499_s0 = scalar_lea.vmem %s5003_s18, 12288  ;;  %p4507_p9 = scmp.lt.s32.totalorder %s5003_s18, %s5003_s18 }
  0xa4   : > { %p4500_p2 = scmp.ne.s32.totalorder %s5003_s18, %s4499_s0  ;;  %p4508_p4 = scmp.lt.s32.totalorder %s4499_s0, %s4499_s0 }
  0xa6   : > { %p4502_p13 = pnand %p4500_p2, %p4488_p5  ;;  %p4509_p10 = por %p4508_p4, %p4507_p9 }
  0xa8   : > { %p4503_p7 = pneg %p4502_p13 }
  0xaa   : > { %p4510_p12 = pnand %p4509_p10, %p4503_p7 }
  0xac   : > { %4513 = shalt.err (!%p4510_p12)
}
  0xad   : > { %s4658_s10 = smov 384   ;;  %s4659_s13 = smov 24  }
  0xae   : > { %4076 = dma.hbm_to_vmem [thread:$0]  (!%p5009_p8), %s6564_s8, 12288, %s5003_s18, [#allocation6], %s4658_s10, %s4658_s10, %s4659_s13  }
  0xaf   : > { %s4514_s26 = scalar_lea.hbm %s5018_s4, 4096  ;;  %p6565_p13 = scmp.ne.s32.totalorder %s6553_s23, 0 }
  0xb0   : > { %p4515_p2 = scmp.ne.s32.totalorder %s5018_s4, %s4514_s26  ;;  %s4519_s20 = scalar_lea.hbm %s6562_s3, 8192 }
  0xb1   : > { %p4520_p12 = scmp.lt.u32.totalorder %s5018_s4, %s6562_s3  ;;  %p4521_p9 = scmp.lt.u32.totalorder %s4519_s20, %s4514_s26 }
  0xb2   : > { %p4517_p4 = pnand %p4515_p2, %p6565_p13  ;;  %p4523_p0 = scmp.lt.u32.totalorder %s4514_s26, %s5018_s4 }
  0xb3   : > { %p4522_p7 = por %p4521_p9, %p4520_p12 }
  0xb4   : > { %p4518_p10 = pneg %p4517_p4 }
  0xb5   : > { %p4524_p5 = por %p4523_p0, %p4522_p7 }
  0xb7   : > { %p4525_p11 = pnand %p4524_p5, %p4518_p10 }
  0xb9   : > { %4528 = shalt.err (!%p4525_p11)
}
  0xba   : > { %s4529_s18 = scalar_lea.vmem %s5020_s25, 4096  ;;  %s4660_s22 = smov [#allocation9]  }
  0xbb   : > { %p4530_p8 = scmp.ne.s32.totalorder %s5020_s25, %s4529_s18  ;;  %s4534_s0 = sshll.u32 %s4660_s22, 4  ;;  %s4535_s0 = int_to_ptr.vmem [resolvable:$false] %s4534_s0 }
  0xbc   : > { %s4536_s10 = scalar_lea.vmem %s4535_s0, 8192  ;;  %p4537_p6 = scmp.lt.s32.totalorder %s5020_s25, %s4535_s0 }
  0xbd   : > { %p4532_p3 = pnand %p4530_p8, %p6565_p13  ;;  %p4538_p2 = scmp.lt.s32.totalorder %s4536_s10, %s4529_s18 }
  0xbf   : > { %p4533_p1 = pneg %p4532_p3  ;;  %p4539_p4 = por %p4538_p2, %p4537_p6 }
  0xc1   : > { %p4540_p12 = pnand %p4539_p4, %p4533_p1 }
  0xc3   : > { %4543 = shalt.err (!%p4540_p12)
}
  0xc4   : > { %p6566_p10 = scmp.ne.s32.totalorder %s6552_s5, 0  ;;  %s6567_s13 = smov 16  }
  0xc5   : > { %s6568_s14 = smov 256   ;;  %p6569_p13 = scmp.ne.s32.totalorder %s6560_s12, 0 }
  0xc6   : > { %4089 = dma.hbm_to_vmem [thread:$0]  (!%p6566_p10), %s5018_s4, 4096, %s5020_s25, %s4835_s6, %s6568_s14, %s6568_s14, %s6567_s13  }
  0xc7   : > { %399 = sbr.rel (%p6569_p13) target bundleno = 1015 (0x3f7), region = 44 }
  0xce   : > { %s401_s23 = sand.u32 1, %s4963_s1   ;;  %s5072_s17 = sand.u32 1, %s4626_s9  }
  0xcf   : > { %s3355_s26 = sshll.u32 %s5072_s17, 8  ;;  %s402_s5 = scalar_lea.sflag [#allocation3], %s401_s23 }
  0xd0   : > { %s5077_s7 = scalar_lea.vmem [#allocation2], %s3355_s26  ;;  %p6570_p9 = scmp.ne.s32.totalorder %s6555_s11, 0 }
  0xd2   : > { %4589 = dma.done.wait (%p6570_p9), %s402_s5, 4096  }
  0xd3   : > { %4591 = vsyncadd (%p6570_p9), %s402_s5, 4294963200  ;;  %p6571_p7 = scmp.eq.s32.totalorder %s4963_s1, 0 }
  0xd5   : > { %4593 = dma.done.wait (%p6571_p7), [#allocation6], 12288   ;;  %p6572_p0 = pmov %p6571_p7 }
  0xd6   : > { %s416_s4 = sand.u32 1, %s4614_s28   ;;  %p6573_p5 = scmp.ne.s32.totalorder %s6556_s21, 0 }
  0xd7   : > { %4595 = vsyncadd (%p6572_p0), [#allocation6], 4294955008  ;;  %s5088_s6 = sshll.u32 %s416_s4, 8 }
  0xd8   : > { %s5091_s25 = scalar_lea.vmem [#allocation7], %s5088_s6 }
  0xd9   : > { %4597 = dma.done.wait (%p6573_p5), %s402_s5, 12288  }
  0xda   : > { %4599 = vsyncadd (%p6573_p5), %s402_s5, 4294955008  ;;  %v5098_v0 = vld [vmem:[%s5077_s7] sm:$0xff]  ;;  %v5101_v1 = vld [vmem:[%s5077_s7 + $0x8] sm:$0xff]  ;;  %s6574_s12 = sld [smem:[#allocation72_spill]]  ;;  %s4661_s2 = smov 127  }
  0xdb   : > { %v5104_v2 = vld [vmem:[%s5077_s7 + $0x10] sm:$0xff]  ;;  %v533_v3 = vmul.f32 %v5098_v0, %v5098_v0  ;;  %v534_v4 = vmul.f32 %v5101_v1, %v5101_v1  ;;  %v5111_v5 = vld [vmem:[%s5077_s7 + $0x18] sm:$0xff]  ;;  %v5116_v7 = vld [vmem:[%s5077_s7 + $0x20] sm:$0xff]  ;;  %s4662_s20 = smov 1   ;;  %s5587_s16 = sshll.u32 %s5072_s17, 7 }
  0xdc   : > { %v535_v6 = vmul.f32 %v5104_v2, %v5104_v2  ;;  %v5119_v8 = vld [vmem:[%s5077_s7 + $0x28] sm:$0xff]  ;;  %v536_v9 = vmul.f32 %v5111_v5, %v5111_v5  ;;  %v537_v10 = vmul.f32 %v5116_v7, %v5116_v7  ;;  %v5128_v12 = vld [vmem:[%s5077_s7 + $0x30] sm:$0xff]  ;;  %v5131_v13 = vld [vmem:[%s5077_s7 + $0x38] sm:$0xff]  ;;  %s5594_s19 = scalar_lea.vmem [#allocation13], %s5587_s16  ;;  %s5687_s18 = scalar_lea.vmem [#allocation8], %s5088_s6 }
  0xdd   : > { %v538_v11 = vmul.f32 %v5119_v8, %v5119_v8  ;;  %v5134_v14 = vld [vmem:[%s5077_s7 + $0x50] sm:$0xff]  ;;  %v565_v15 = vadd.f32 %v534_v4, %v533_v3  ;;  %v539_v16 = vmul.f32 %v5128_v12, %v5128_v12  ;;  %v540_v17 = vmul.f32 %v5131_v13, %v5131_v13  ;;  %v5141_v18 = vld [vmem:[%s5077_s7 + $0x58] sm:$0xff]  ;;  %v5144_v19 = vld [vmem:[%s5077_s7 + $0x40] sm:$0xff]  ;;  %s5709_s22 = scalar_lea.vmem [#allocation9], %s5088_s6  ;;  %s5758_s0 = scalar_lea.vmem [#allocation10], %s5587_s16 }
  0xde   : > { %v5147_v20 = vld [vmem:[%s5077_s7 + $0x48] sm:$0xff]  ;;  %v568_v22 = vadd.f32 %v536_v9, %v535_v6  ;;  %v541_v23 = vmul.f32 %v5144_v19, %v5144_v19  ;;  %v543_v26 = vmul.f32 %v5134_v14, %v5134_v14  ;;  %v544_v27 = vmul.f32 %v5141_v18, %v5141_v18  ;;  %v5158_v28 = vld [vmem:[%s5077_s7 + $0x60] sm:$0xff]  ;;  %v5164_v30 = vld [vmem:[%s5077_s7 + $0x70] sm:$0xff]  ;;  %s5777_s10 = scalar_lea.vmem [#allocation11], %s5587_s16  ;;  %s2957_s13 = scalar_lea.sflag [#allocation4], %s5072_s17 }
  0xdf   : > { %v571_v21 = vadd.f32 %v538_v11, %v537_v10  ;;  %566 = vadd.xlane.f32.xlu0 %v565_v15  ;;  %v542_v24 = vmul.f32 %v5147_v20, %v5147_v20  ;;  %v574_v25 = vadd.f32 %v540_v17, %v539_v16  ;;  %v5161_v29 = vld [vmem:[%s5077_s7 + $0x68] sm:$0xff]  ;;  %v5167_v31 = vld [vmem:[%s5077_s7 + $0x78] sm:$0xff]  ;;  %v545_v33 = vmul.f32 %v5158_v28, %v5158_v28  ;;  %v5174_v35 = vld [vmem:[%s5077_s7 + $0x90] sm:$0xff]  ;;  %s6348_s14 = scalar_lea.sflag [#allocation12], %s401_s23 }
  0xe0   : > { %v546_v34 = vmul.f32 %v5161_v29, %v5161_v29  ;;  %v5177_v36 = vld [vmem:[%s5077_s7 + $0x98] sm:$0xff]  ;;  %v580_v37 = vadd.f32 %v544_v27, %v543_v26  ;;  %v547_v38 = vmul.f32 %v5164_v30, %v5164_v30  ;;  %v548_v39 = vmul.f32 %v5167_v31, %v5167_v31  ;;  %v5184_v40 = vld [vmem:[%s5077_s7 + $0x80] sm:$0xff]  ;;  %v5187_v41 = vld [vmem:[%s5077_s7 + $0x88] sm:$0xff] }
  0xe1   : > { %572 = vadd.xlane.f32.xlu1 %v571_v21  ;;  %v577_v32 = vadd.f32 %v542_v24, %v541_v23  ;;  %v4220_v42 = vld [vmem:[#allocation5 + $0x4] ss:$24 sps:$4 sm:$0xff]   ;;  %v5193_v44 = vld [vmem:[%s5077_s7 + $0xa8] sm:$0xff]  ;;  %v4224_v46 = vld [vmem:[#allocation5] ss:$24 sps:$4 sm:$0xff]   ;;  %v549_v48 = vmul.f32 %v5184_v40, %v5184_v40  ;;  %v550_v49 = vmul.f32 %v5187_v41, %v5187_v41  ;;  %v551_v54 = vmul.f32 %v5174_v35, %v5174_v35 }
  0xe2   : > { %v5190_v43 = vld [vmem:[%s5077_s7 + $0xa0] sm:$0xff]  ;;  %v583_v47 = vadd.f32 %v546_v34, %v545_v33  ;;  %v5200_v50 = vld [vmem:[%s5077_s7 + $0xb0] sm:$0xff]  ;;  %v5203_v51 = vld [vmem:[%s5077_s7 + $0xb8] sm:$0xff]  ;;  %1330 = vmatprep.subr.bf16.mxu0 %v4220_v42  ;;  %v586_v53 = vadd.f32 %v548_v39, %v547_v38  ;;  %v552_v55 = vmul.f32 %v5177_v36, %v5177_v36  ;;  %v554_v3 = vmul.f32 %v5193_v44, %v5193_v44 }
  0xe3   : > { %569 = vadd.xlane.f32.xlu0 %v568_v22  ;;  %v4222_v45 = vld [vmem:[#allocation5 + $0xc] ss:$24 sps:$4 sm:$0xff]   ;;  %v4225_v52 = vld [vmem:[#allocation5 + $0x8] ss:$24 sps:$4 sm:$0xff]   ;;  %1331 = vmatpush1.bf16.msra.mxu0 %v4224_v46  ;;  %v4228_v57 = vld [vmem:[#allocation5 + $0x3c] ss:$24 sps:$4 sm:$0xff]   ;;  %v589_v62 = vadd.f32 %v550_v49, %v549_v48  ;;  %v553_v63 = vmul.f32 %v5190_v43, %v5190_v43  ;;  %v555_v11 = vmul.f32 %v5200_v50, %v5200_v50 }
  0xe4   : > { %1443 = vmatprep.subr.bf16.mxu1 %v4222_v45  ;;  %v4226_v56 = vld [vmem:[#allocation5 + $0x34] ss:$24 sps:$4 sm:$0xff]   ;;  %v4230_v58 = vld [vmem:[#allocation5 + $0x30] ss:$24 sps:$4 sm:$0xff]   ;;  %v5210_v60 = vld [vmem:[%s5077_s7 + $0xc0] sm:$0xff]  ;;  %v592_v10 = vadd.f32 %v552_v55, %v551_v54  ;;  %v556_v15 = vmul.f32 %v5203_v51, %v5203_v51 }
  0xe5   : > { %575 = vadd.xlane.f32.xlu1 %v574_v25  ;;  %1444 = vmatpush1.bf16.msra.mxu1 %v4225_v52  ;;  %v4231_v59 = vld [vmem:[#allocation5 + $0x38] ss:$24 sps:$4 sm:$0xff]   ;;  %v4232_v61 = vld [vmem:[#allocation5 + $0x64] ss:$24 sps:$4 sm:$0xff]   ;;  %v5227_v16 = vld [vmem:[%s5077_s7 + $0xc8] sm:$0xff]  ;;  %v595_v24 = vadd.f32 %v554_v3, %v553_v63  ;;  %v557_v25 = vmul.f32 %v5210_v60, %v5210_v60 }
  0xe6   : > { %1332 = vmatprep.subr.bf16.mxu0 %v4226_v56  ;;  %v5217_v4 = vld [vmem:[%s5077_s7 + $0xd0] sm:$0xff]  ;;  %v5220_v6 = vld [vmem:[%s5077_s7 + $0xd8] sm:$0xff]  ;;  %1445 = vmatprep.subr.bf16.mxu1 %v4228_v57  ;;  %v4234_v9 = vld [vmem:[#allocation5 + $0x6c] ss:$24 sps:$4 sm:$0xff]   ;;  %v558_v26 = vmul.f32 %v5227_v16, %v5227_v16  ;;  %v598_v34 = vadd.f32 %v556_v15, %v555_v11 }
  0xe7   : > { %578 = vadd.xlane.f32.xlu0 %v577_v32  ;;  %v4236_v17 = vld [vmem:[#allocation5 + $0x60] ss:$24 sps:$4 sm:$0xff]   ;;  %1333 = vmatpush1.bf16.msra.mxu0 %v4230_v58  ;;  %v4238_v22 = vld [vmem:[#allocation5 + $0x94] ss:$24 sps:$4 sm:$0xff]   ;;  %v560_v38 = vmul.f32 %v5220_v6, %v5220_v6  ;;  %v4242_v42 = vld [vmem:[#allocation5 + $0x90] ss:$24 sps:$4 sm:$0xff]  }
  0xe8   : > { %v4237_v21 = vld [vmem:[#allocation5 + $0x68] ss:$24 sps:$4 sm:$0xff]   ;;  %1334 = vmatprep.subr.bf16.mxu0 %v4232_v61  ;;  %v4240_v23 = vld [vmem:[#allocation5 + $0x9c] ss:$24 sps:$4 sm:$0xff]   ;;  %v4243_v45 = vld [vmem:[#allocation5 + $0x98] ss:$24 sps:$4 sm:$0xff]   ;;  %v601_v48 = vadd.f32 %v558_v26, %v557_v25 }
  0xe9   : > { %581 = vadd.xlane.f32.xlu1 %v580_v37  ;;  %1446 = vmatpush1.bf16.msra.mxu1 %v4231_v59  ;;  %v5234_v27 = vld [vmem:[%s5077_s7 + $0xf0] sm:$0xff]  ;;  %v5237_v32 = vld [vmem:[%s5077_s7 + $0xf8] sm:$0xff]  ;;  %v5240_v33 = vld [vmem:[%s5077_s7 + $0xe0] sm:$0xff]  ;;  %v559_v37 = vmul.f32 %v5217_v4, %v5217_v4 }
  0xea   : > { %1447 = vmatprep.subr.bf16.mxu1 %v4234_v9  ;;  %v5247_v39 = vld [vmem:[%s5077_s7 + $0xe8] sm:$0xff]  ;;  %v4244_v46 = vld [vmem:[#allocation5 + $0xc4] ss:$24 sps:$4 sm:$0xff]   ;;  %v561_v49 = vmul.f32 %v5240_v33, %v5240_v33  ;;  %v563_v54 = vmul.f32 %v5234_v27, %v5234_v27  ;;  %v564_v55 = vmul.f32 %v5237_v32, %v5237_v32  ;;  %v4248_v56 = vld [vmem:[#allocation5 + $0xc0] ss:$24 sps:$4 sm:$0xff]  }
  0xeb   : > { %584 = vadd.xlane.f32.xlu0 %v583_v47  ;;  %1335 = vmatpush1.bf16.msra.mxu0 %v4236_v17  ;;  %v4246_v47 = vld [vmem:[#allocation5 + $0xcc] ss:$24 sps:$4 sm:$0xff]   ;;  %v562_v52 = vmul.f32 %v5247_v39, %v5247_v39  ;;  %v4249_v57 = vld [vmem:[#allocation5 + $0xc8] ss:$24 sps:$4 sm:$0xff]   ;;  %v4252_v59 = vld [vmem:[#allocation5 + $0xfc] ss:$24 sps:$4 sm:$0xff]  }
  0xec   : > { %1336 = vmatprep.subr.bf16.mxu0 %v4238_v22  ;;  %v4250_v58 = vld [vmem:[#allocation5 + $0xf4] ss:$24 sps:$4 sm:$0xff]   ;;  %v4254_v63 = vld [vmem:[#allocation5 + $0xf0] ss:$24 sps:$4 sm:$0xff]   ;;  %v4256_v9 = vld [vmem:[#allocation5 + $0x124] ss:$24 sps:$4 sm:$0xff]  }
  0xed   : > { %587 = vadd.xlane.f32.xlu1 %v586_v53  ;;  %1448 = vmatpush1.bf16.msra.mxu1 %v4237_v21  ;;  %v604_v53 = vadd.f32 %v560_v38, %v559_v37  ;;  %v607_v61 = vadd.f32 %v562_v52, %v561_v49  ;;  %v4255_v3 = vld [vmem:[#allocation5 + $0xf8] ss:$24 sps:$4 sm:$0xff]   ;;  %v4261_v15 = vld [vmem:[#allocation5 + $0x128] ss:$24 sps:$4 sm:$0xff]   ;;  %v4262_v17 = vld [vmem:[#allocation5 + $0x154] ss:$24 sps:$4 sm:$0xff]  }
  0xee   : > { %1449 = vmatprep.subr.bf16.mxu1 %v4240_v23  ;;  %v4260_v11 = vld [vmem:[#allocation5 + $0x120] ss:$24 sps:$4 sm:$0xff]   ;;  %v4264_v21 = vld [vmem:[#allocation5 + $0x15c] ss:$24 sps:$4 sm:$0xff]   ;;  %v4266_v22 = vld [vmem:[#allocation5 + $0x150] ss:$24 sps:$4 sm:$0xff]  }
  0xef   : > { %590 = vadd.xlane.f32.xlu0 %v589_v62  ;;  %1337 = vmatpush1.bf16.msra.mxu0 %v4242_v42  ;;  %v610_v62 = vadd.f32 %v564_v55, %v563_v54  ;;  %v4267_v23 = vld [vmem:[#allocation5 + $0x158] ss:$24 sps:$4 sm:$0xff]   ;;  %v4270_v25 = vld [vmem:[#allocation5 + $0x18c] ss:$24 sps:$4 sm:$0xff]   ;;  %v4276_v38 = vld [vmem:[#allocation5 + $0x1bc] ss:$24 sps:$4 sm:$0xff]  }
  0xf0   : > { %1338 = vmatprep.subr.bf16.mxu0 %v4244_v46  ;;  %v4272_v26 = vld [vmem:[#allocation5 + $0x180] ss:$24 sps:$4 sm:$0xff]   ;;  %v4274_v37 = vld [vmem:[#allocation5 + $0x1b4] ss:$24 sps:$4 sm:$0xff]   ;;  %v4278_v42 = vld [vmem:[#allocation5 + $0x1b0] ss:$24 sps:$4 sm:$0xff]  }
  0xf1   : > { %593 = vadd.xlane.f32.xlu1 %v592_v10  ;;  %1450 = vmatpush1.bf16.msra.mxu1 %v4243_v45  ;;  %v4258_v10 = vld [vmem:[#allocation5 + $0x12c] ss:$24 sps:$4 sm:$0xff]   ;;  %v4279_v45 = vld [vmem:[#allocation5 + $0x1b8] ss:$24 sps:$4 sm:$0xff]   ;;  %v4285_v49 = vld [vmem:[#allocation5 + $0x1e8] ss:$24 sps:$4 sm:$0xff]  }
  0xf2   : > { %1451 = vmatprep.subr.bf16.mxu1 %v4246_v47  ;;  %v4280_v46 = vld [vmem:[#allocation5 + $0x1e4] ss:$24 sps:$4 sm:$0xff]   ;;  %v4286_v52 = vld [vmem:[#allocation5 + $0x214] ss:$24 sps:$4 sm:$0xff]   ;;  %v4290_v54 = vld [vmem:[#allocation5 + $0x210] ss:$24 sps:$4 sm:$0xff]  }
  0xf3   : > { %596 = vadd.xlane.f32.xlu0 %v595_v24  ;;  %1339 = vmatpush1.bf16.msra.mxu0 %v4248_v56  ;;  %v4268_v24 = vld [vmem:[#allocation5 + $0x184] ss:$24 sps:$4 sm:$0xff]   ;;  %v4291_v55 = vld [vmem:[#allocation5 + $0x218] ss:$24 sps:$4 sm:$0xff]  }
  0xf4   : > { %1340 = vmatprep.subr.bf16.mxu0 %v4250_v58  ;;  %v4282_v47 = vld [vmem:[#allocation5 + $0x1ec] ss:$24 sps:$4 sm:$0xff]   ;;  %v4296_v58 = vld [vmem:[#allocation5 + $0x240] ss:$24 sps:$4 sm:$0xff]  }
  0xf5   : > { %599 = vadd.xlane.f32.xlu1 %v598_v34  ;;  %1452 = vmatpush1.bf16.msra.mxu1 %v4249_v57  ;;  %v4273_v34 = vld [vmem:[#allocation5 + $0x188] ss:$24 sps:$4 sm:$0xff]   ;;  %v4292_v56 = vld [vmem:[#allocation5 + $0x244] ss:$24 sps:$4 sm:$0xff]  }
  0xf6   : > { %1453 = vmatprep.subr.bf16.mxu1 %v4252_v59  ;;  %v4294_v57 = vld [vmem:[#allocation5 + $0x24c] ss:$24 sps:$4 sm:$0xff]   ;;  %v4297_v59 = vld [vmem:[#allocation5 + $0x248] ss:$24 sps:$4 sm:$0xff]  }
  0xf7   : > { %602 = vadd.xlane.f32.xlu0 %v601_v48  ;;  %1341 = vmatpush1.bf16.msra.mxu0 %v4254_v63  ;;  %v4284_v48 = vld [vmem:[#allocation5 + $0x1e0] ss:$24 sps:$4 sm:$0xff]   ;;  %v4302_v63 = vld [vmem:[#allocation5 + $0x270] ss:$24 sps:$4 sm:$0xff]  }
  0xf8   : > { %1342 = vmatprep.subr.bf16.mxu0 %v4256_v9  ;;  %v4304_v9 = vld [vmem:[#allocation5 + $0x2a4] ss:$24 sps:$4 sm:$0xff]  }
  0xf9   : > { %605 = vadd.xlane.f32.xlu1 %v604_v53  ;;  %1454 = vmatpush1.bf16.msra.mxu1 %v4255_v3  ;;  %v4288_v53 = vld [vmem:[#allocation5 + $0x21c] ss:$24 sps:$4 sm:$0xff]   ;;  %v4303_v3 = vld [vmem:[#allocation5 + $0x278] ss:$24 sps:$4 sm:$0xff]  }
  0xfa   : > { %1455 = vmatprep.subr.bf16.mxu1 %v4258_v10  ;;  %v4306_v10 = vld [vmem:[#allocation5 + $0x2ac] ss:$24 sps:$4 sm:$0xff]  }
  0xfb   : > { %608 = vadd.xlane.f32.xlu0 %v607_v61  ;;  %1343 = vmatpush1.bf16.msra.mxu0 %v4260_v11  ;;  %v4298_v61 = vld [vmem:[#allocation5 + $0x274] ss:$24 sps:$4 sm:$0xff]   ;;  %v4308_v11 = vld [vmem:[#allocation5 + $0x2a0] ss:$24 sps:$4 sm:$0xff]  }
  0xfc   : > { %1344 = vmatprep.subr.bf16.mxu0 %v4262_v17  ;;  %v4310_v17 = vld [vmem:[#allocation5 + $0x2d4] ss:$24 sps:$4 sm:$0xff]  }
  0xfd   : > { %611 = vadd.xlane.f32.xlu1 %v610_v62  ;;  %1456 = vmatpush1.bf16.msra.mxu1 %v4261_v15  ;;  %v4300_v62 = vld [vmem:[#allocation5 + $0x27c] ss:$24 sps:$4 sm:$0xff]   ;;  %v4309_v15 = vld [vmem:[#allocation5 + $0x2a8] ss:$24 sps:$4 sm:$0xff]  }
  0xfe   : > { %1457 = vmatprep.subr.bf16.mxu1 %v4264_v21  ;;  %v4312_v21 = vld [vmem:[#allocation5 + $0x2dc] ss:$24 sps:$4 sm:$0xff]  }
  0xff   : > { %1345 = vmatpush1.bf16.msra.mxu0 %v4266_v22  ;;  %v4314_v22 = vld [vmem:[#allocation5 + $0x2d0] ss:$24 sps:$4 sm:$0xff]  }
 0x100   : > { %1346 = vmatprep.subr.bf16.mxu0 %v4268_v24  ;;  %v4318_v24 = vld [vmem:[#allocation5 + $0x14] ss:$24 sps:$4 sm:$0xff]  }
 0x101   : > { %1458 = vmatpush1.bf16.msra.mxu1 %v4267_v23  ;;  %v4315_v23 = vld [vmem:[#allocation5 + $0x2d8] ss:$24 sps:$4 sm:$0xff]  }
 0x102   : > { %1459 = vmatprep.subr.bf16.mxu1 %v4270_v25 }
 0x103   : > { %1347 = vmatpush1.bf16.msra.mxu0 %v4272_v26 }
 0x104   : > { %1348 = vmatprep.subr.bf16.mxu0 %v4274_v37 }
 0x105   : > { %1460 = vmatpush1.bf16.msra.mxu1 %v4273_v34 }
 0x106   : > { %1461 = vmatprep.subr.bf16.mxu1 %v4276_v38 }
 0x107   : > { %1349 = vmatpush1.bf16.msra.mxu0 %v4278_v42 }
 0x108   : > { %1350 = vmatprep.subr.bf16.mxu0 %v4280_v46 }
 0x109   : > { %1462 = vmatpush1.bf16.msra.mxu1 %v4279_v45 }
 0x10a   : > { %1463 = vmatprep.subr.bf16.mxu1 %v4282_v47 }
 0x10b   : > { %1351 = vmatpush1.bf16.msra.mxu0 %v4284_v48  ;;  %v6482_v48 = vlaneseq }
 0x10c   : > { %1352 = vmatprep.subr.bf16.mxu0 %v4286_v52 }
 0x10d   : > { %1464 = vmatpush1.bf16.msra.mxu1 %v4285_v49 }
 0x10e   : > { %1465 = vmatprep.subr.bf16.mxu1 %v4288_v53 }
 0x10f   : > { %1353 = vmatpush1.bf16.msra.mxu0 %v4290_v54 }
 0x110   : > { %1354 = vmatprep.subr.bf16.mxu0 %v4292_v56 }
 0x111   : > { %1466 = vmatpush1.bf16.msra.mxu1 %v4291_v55 }
 0x112   : > { %1467 = vmatprep.subr.bf16.mxu1 %v4294_v57  ;;  %v697_v57 = vshrl.u32 %v6482_v48, 7 }
 0x113   : > { %1355 = vmatpush1.bf16.msra.mxu0 %v4296_v58 }
 0x114   : > { %1356 = vmatprep.subr.bf16.mxu0 %v4298_v61 }
 0x115   : > { %1468 = vmatpush1.bf16.msra.mxu1 %v4297_v59 }
 0x116   : > { %1469 = vmatprep.subr.bf16.mxu1 %v4300_v62 }
 0x117   : > { %1357 = vmatpush1.bf16.msra.mxu0 %v4302_v63  ;;  %v702_v63 = vsub.s32 1, %v697_v57 }
 0x118   : > { %1358 = vmatprep.subr.bf16.mxu0 %v4304_v9 }
 0x119   : > { %1470 = vmatpush1.bf16.msra.mxu1 %v4303_v3 }
 0x11a   : > { %1471 = vmatprep.subr.bf16.mxu1 %v4306_v10  ;;  %v694_v10 = vld [vmem:[%s6574_s12] sm:$0x3] }
 0x11b   : > { %1359 = vmatpush1.bf16.msra.mxu0 %v4308_v11  ;;  %v698_v11 = vsub.s32 0, %v697_v57 }
 0x11c   : > { %1360 = vmatprep.subr.bf16.mxu0 %v4310_v17 }
 0x11d   : > { %1472 = vmatpush1.bf16.msra.mxu1 %v4309_v15 }
 0x11e   : > { %1473 = vmatprep.subr.bf16.mxu1 %v4312_v21 }
 0x11f   : > { %1361 = vmatpush1.bf16.msra.mxu0 %v4314_v22 }
 0x120   : > { %1556 = vmatprep.subr.bf16.mxu0 %v4318_v24 }
 0x121   : > { %1474 = vmatpush1.bf16.msra.mxu1 %v4315_v23 }
 0x122   : > { %4005 = vmatprep.subr.bf16.mxu1 %v4318_v24 }
 0x16c   : > { %v567_v25 = vpop.xlane.xlu0 %566 }
 0x16d   : > { %v614_v26 = vmul.f32 0.00390625, %v567_v25 }
 0x16e   : > { %v573_v34 = vpop.xlane.xlu1 %572 }
 0x16f   : > { %v616_v37 = vmul.f32 0.00390625, %v573_v34  ;;  %v630_v38 = vadd.f32 1e-05, %v614_v26  ;;  %v5262_v26 = vrot.slane %v694_v10, %v702_v63 }
 0x170   : > { %v570_v42 = vpop.xlane.xlu0 %569 }
 0x171   : > { %v632_v45 = vadd.f32 1e-05, %v616_v37  ;;  %4364 = vrsqrt.f32 %v630_v38  ;;  %v615_v46 = vmul.f32 0.00390625, %v570_v42  ;;  %v5266_v42 = vrot.slane %v694_v10, %v698_v11 }
 0x172   : > { %v576_v47 = vpop.xlane.xlu1 %575 }
 0x173   : > { %4366 = vrsqrt.f32 %v632_v45  ;;  %v617_v49 = vmul.f32 0.00390625, %v576_v47  ;;  %v631_v52 = vadd.f32 1e-05, %v615_v46 }
 0x174   : > { %v579_v54 = vpop.xlane.xlu0 %578 }
 0x175   : > { %v633_v53 = vadd.f32 1e-05, %v617_v49  ;;  %4368 = vrsqrt.f32 %v631_v52  ;;  %v618_v56 = vmul.f32 0.00390625, %v579_v54 }
 0x176   : > { %v582_v55 = vpop.xlane.xlu1 %581 }
 0x177   : > { %4370 = vrsqrt.f32 %v633_v53  ;;  %v619_v58 = vmul.f32 0.00390625, %v582_v55  ;;  %v634_v59 = vadd.f32 1e-05, %v618_v56 }
 0x178   : > { %v585_v62 = vpop.xlane.xlu0 %584 }
 0x179   : > { %v635_v61 = vadd.f32 1e-05, %v619_v58  ;;  %4372 = vrsqrt.f32 %v634_v59  ;;  %v620_v9 = vmul.f32 0.00390625, %v585_v62 }
 0x17a   : > { %v588_v3 = vpop.xlane.xlu1 %587 }
 0x17b   : > { %4374 = vrsqrt.f32 %v635_v61  ;;  %v621_v15 = vmul.f32 0.00390625, %v588_v3  ;;  %v4365_v17 = vpop.eup %4364  ;;  %v636_v21 = vadd.f32 1e-05, %v620_v9  ;;  %v4316_v9 = vld [vmem:[#allocation5 + $0x10] ss:$24 sps:$4 sm:$0xff]  }
 0x17c   : > { %v591_v24 = vpop.xlane.xlu0 %590  ;;  %v663_v25 = vmul.f32 %v4365_v17, %v5101_v1  ;;  %v662_v38 = vmul.f32 %v4365_v17, %v5098_v0 }
 0x17d   : > { %v4367_v22 = vpop.eup %4366  ;;  %v637_v23 = vadd.f32 1e-05, %v621_v15  ;;  %4376 = vrsqrt.f32 %v636_v21  ;;  %v622_v45 = vmul.f32 0.00390625, %v591_v24  ;;  %v4321_v15 = vld [vmem:[#allocation5 + $0x44] ss:$24 sps:$4 sm:$0xff]  }
 0x17e   : > { %v667_v34 = vmul.f32 %v4367_v22, %v5119_v8  ;;  %v594_v37 = vpop.xlane.xlu1 %593  ;;  %v707_v1 = vmul.f32 %v5262_v26, %v663_v25  ;;  %v706_v55 = vmul.f32 %v5266_v42, %v662_v38  ;;  %v4319_v24 = vld [vmem:[#allocation5 + $0x40] ss:$24 sps:$4 sm:$0xff]  }
 0x17f   : > { %v4369_v46 = vpop.eup %4368  ;;  %4378 = vrsqrt.f32 %v637_v23  ;;  %v623_v47 = vmul.f32 0.00390625, %v594_v37  ;;  %v638_v57 = vadd.f32 1e-05, %v622_v45  ;;  %v4324_v37 = vld [vmem:[#allocation5 + $0x74] ss:$24 sps:$4 sm:$0xff]  }
 0x180   : > { %v665_v52 = vmul.f32 %v4369_v46, %v5111_v5  ;;  %v664_v53 = vmul.f32 %v4369_v46, %v5104_v2  ;;  %v711_v8 = vmul.f32 %v5262_v26, %v667_v34  ;;  %v666_v5 = vmul.f32 %v4367_v22, %v5116_v7  ;;  %v597_v62 = vpop.xlane.xlu0 %596 }
 0x181   : > { %v4371_v49 = vpop.eup %4370  ;;  %v639_v61 = vadd.f32 1e-05, %v623_v47  ;;  %4380 = vrsqrt.f32 %v638_v57  ;;  %v624_v7 = vmul.f32 0.00390625, %v597_v62 }
 0x182   : > { %v669_v54 = vmul.f32 %v4371_v49, %v5131_v13  ;;  %v709_v0 = vmul.f32 %v5262_v26, %v665_v52  ;;  %v708_v56 = vmul.f32 %v5266_v42, %v664_v53  ;;  %v668_v2 = vmul.f32 %v4371_v49, %v5128_v12  ;;  %v600_v11 = vpop.xlane.xlu1 %599  ;;  %v4322_v53 = vld [vmem:[#allocation5 + $0x70] ss:$24 sps:$4 sm:$0xff]  }
 0x183   : > { %v4373_v58 = vpop.eup %4372  ;;  %v710_v12 = vmul.f32 %v5266_v42, %v666_v5  ;;  %4382 = vrsqrt.f32 %v639_v61  ;;  %v625_v22 = vmul.f32 0.00390625, %v600_v11  ;;  %v640_v38 = vadd.f32 1e-05, %v624_v7 }
 0x184   : > { %v713_v59 = vmul.f32 %v5262_v26, %v669_v54  ;;  %v5279_v13 = vpack.c.bf16 %v709_v0, %v707_v1  ;;  %v5281_v3 = vpack.c.bf16 %v708_v56, %v706_v55  ;;  %v671_v10 = vmul.f32 %v4373_v58, %v5147_v20  ;;  %v603_v0 = vpop.xlane.xlu0 %602  ;;  %v4327_v55 = vld [vmem:[#allocation5 + $0xa4] ss:$24 sps:$4 sm:$0xff]  }
 0x185   : > { %v4375_v63 = vpop.eup %4374  ;;  %v712_v20 = vmul.f32 %v5266_v42, %v668_v2  ;;  %v670_v46 = vmul.f32 %v4373_v58, %v5144_v19  ;;  %v641_v49 = vadd.f32 1e-05, %v625_v22  ;;  %4384 = vrsqrt.f32 %v640_v38  ;;  %v4330_v2 = vld [vmem:[#allocation5 + $0xd4] ss:$24 sps:$4 sm:$0xff]   ;;  %v4333_v22 = vld [vmem:[#allocation5 + $0x104] ss:$24 sps:$4 sm:$0xff]  }
 0x186   : > { %v5284_v17 = vpack.c.bf16 %v713_v59, %v711_v8  ;;  %v673_v21 = vmul.f32 %v4375_v63, %v5141_v18  ;;  %1362 = vmatprep.mubr.bf16.mxu0 %v5279_v13  ;;  %1475 = vmatprep.mubr.bf16.mxu1 %v5279_v13  ;;  %v715_v18 = vmul.f32 %v5262_v26, %v671_v10  ;;  %v606_v52 = vpop.xlane.xlu1 %605  ;;  %v626_v57 = vmul.f32 0.00390625, %v603_v0 }
 0x187   : > { %1363 = vmatmul.mubr.bf16.vlgmr.msra.gmra.mrb[0].mxu0 %v5281_v3  ;;  %1476 = vmatmul.mubr.bf16.vlgmr.msra.gmra.mrb[0].mxu1 %v5281_v3  ;;  %v4377_v23 = vpop.eup %4376  ;;  %v5297_v45 = vpack.c.bf16 %v712_v20, %v710_v12  ;;  %v672_v47 = vmul.f32 %v4375_v63, %v5134_v14  ;;  %v627_v56 = vmul.f32 0.00390625, %v606_v52  ;;  %v714_v14 = vmul.f32 %v5266_v42, %v670_v46 }
 0x188   : > { %1557 = vmatpush1.bf16.msra.mxu0 %v4316_v9  ;;  %1372 = vmatprep.mubr.bf16.mxu0 %v5284_v17  ;;  %v717_v25 = vmul.f32 %v5262_v26, %v673_v21  ;;  %v675_v54 = vmul.f32 %v4377_v23, %v5161_v29  ;;  %4386 = vrsqrt.f32 %v641_v49  ;;  %v4325_v29 = vld [vmem:[#allocation5 + $0xa0] ss:$24 sps:$4 sm:$0xff]   ;;  %v674_v63 = vmul.f32 %v4377_v23, %v5158_v28  ;;  %v609_v20 = vpop.xlane.xlu0 %608 }
 0x189   : > { %v4379_v34 = vpop.eup %4378  ;;  %1558 = vmatprep.subr.bf16.mxu0 %v4321_v15  ;;  %1485 = vmatprep.mubr.bf16.mxu1 %v5284_v17  ;;  %v716_v19 = vmul.f32 %v5266_v42, %v672_v47  ;;  %v643_v61 = vadd.f32 1e-05, %v627_v56  ;;  %v642_v10 = vadd.f32 1e-05, %v626_v57  ;;  %v628_v23 = vmul.f32 0.00390625, %v609_v20 }
 0x18a   : > { %4021 = vmatpush1.bf16.msra.mxu1 %v4316_v9  ;;  %v5301_v1 = vpack.c.bf16 %v717_v25, %v715_v18  ;;  %v677_v8 = vmul.f32 %v4379_v34, %v5167_v31  ;;  %v719_v31 = vmul.f32 %v5262_v26, %v675_v54  ;;  %v676_v9 = vmul.f32 %v4379_v34, %v5164_v30  ;;  %v612_v11 = vpop.xlane.xlu1 %611  ;;  %v4331_v25 = vld [vmem:[#allocation5 + $0x100] ss:$24 sps:$4 sm:$0xff]   ;;  %v4342_v57 = vld [vmem:[#allocation5 + $0x194] ss:$24 sps:$4 sm:$0xff]  }
 0x18b   : > { %4006 = vmatprep.subr.bf16.mxu1 %v4321_v15  ;;  %v4381_v58 = vpop.eup %4380  ;;  %v5313_v62 = vpack.c.bf16 %v716_v19, %v714_v14  ;;  %v4328_v15 = vld [vmem:[#allocation5 + $0xd0] ss:$24 sps:$4 sm:$0xff]   ;;  %4388 = vrsqrt.f32 %v643_v61  ;;  %v718_v28 = vmul.f32 %v5266_v42, %v674_v63  ;;  %v644_v52 = vadd.f32 1e-05, %v628_v23  ;;  %v4337_v14 = vld [vmem:[#allocation5 + $0x160] ss:$24 sps:$4 sm:$0xff]  }
 0x18c   : > { %1559 = vmatpush1.bf16.msra.mxu0 %v4319_v24  ;;  %v721_v59 = vmul.f32 %v5262_v26, %v677_v8  ;;  %v679_v7 = vmul.f32 %v4381_v58, %v5187_v41  ;;  %v720_v30 = vmul.f32 %v5266_v42, %v676_v9  ;;  %4390 = vrsqrt.f32 %v642_v10  ;;  %v4345_v63 = vld [vmem:[#allocation5 + $0x1c4] ss:$24 sps:$4 sm:$0xff]   ;;  %v4343_v10 = vld [vmem:[#allocation5 + $0x1c0] ss:$24 sps:$4 sm:$0xff]  }
 0x18d   : > { %1560 = vmatprep.subr.bf16.mxu0 %v4324_v37  ;;  %v4383_v5 = vpop.eup %4382  ;;  %v678_v47 = vmul.f32 %v4381_v58, %v5184_v40  ;;  %v4351_v23 = vld [vmem:[#allocation5 + $0x224] ss:$24 sps:$4 sm:$0xff]  }
 0x18e   : > { %4022 = vmatpush1.bf16.msra.mxu1 %v4319_v24  ;;  %v5317_v21 = vpack.c.bf16 %v721_v59, %v719_v31  ;;  %v681_v12 = vmul.f32 %v4383_v5, %v5177_v36  ;;  %v629_v24 = vmul.f32 0.00390625, %v612_v11  ;;  %v723_v36 = vmul.f32 %v5262_v26, %v679_v7  ;;  %v4340_v59 = vld [vmem:[#allocation5 + $0x190] ss:$24 sps:$4 sm:$0xff]  }
 0x18f   : > { %1373 = vmatmul.mubr.bf16.gmra.mrb[4].mxu0 %v5297_v45  ;;  %1486 = vmatmul.mubr.bf16.gmra.mrb[4].mxu1 %v5297_v45  ;;  %v4385_v18 = vpop.eup %4384  ;;  %v5329_v46 = vpack.c.bf16 %v720_v30, %v718_v28  ;;  %v680_v49 = vmul.f32 %v4383_v5, %v5174_v35  ;;  %v722_v40 = vmul.f32 %v5266_v42, %v678_v47  ;;  %v4357_v47 = vld [vmem:[#allocation5 + $0x284] ss:$24 sps:$4 sm:$0xff]  }
 0x190   : > { %1561 = vmatpush1.bf16.msra.mxu0 %v4322_v53  ;;  %1382 = vmatprep.mubr.bf16.mxu0 %v5301_v1  ;;  %v725_v41 = vmul.f32 %v5262_v26, %v681_v12  ;;  %v645_v38 = vadd.f32 1e-05, %v629_v24  ;;  %v683_v8 = vmul.f32 %v4385_v18, %v5193_v44 }
 0x191   : > { %1562 = vmatprep.subr.bf16.mxu0 %v4327_v55  ;;  %1495 = vmatprep.mubr.bf16.mxu1 %v5301_v1  ;;  %v724_v35 = vmul.f32 %v5266_v42, %v680_v49 }
 0x192   : > { %4007 = vmatprep.subr.bf16.mxu1 %v4324_v37  ;;  %v4387_v34 = vpop.eup %4386  ;;  %v4336_v37 = vld [vmem:[#allocation5 + $0x134] ss:$24 sps:$4 sm:$0xff]   ;;  %v5333_v54 = vpack.c.bf16 %v725_v41, %v723_v36  ;;  %4392 = vrsqrt.f32 %v645_v38  ;;  %v727_v44 = vmul.f32 %v5262_v26, %v683_v8  ;;  %v4363_v8 = vld [vmem:[#allocation5 + $0x2e4] ss:$24 sps:$4 sm:$0xff]  }
 0x193   : > { %4023 = vmatpush1.bf16.msra.mxu1 %v4322_v53  ;;  %v4334_v53 = vld [vmem:[#allocation5 + $0x130] ss:$24 sps:$4 sm:$0xff]   ;;  %v685_v0 = vmul.f32 %v4387_v34, %v5203_v51  ;;  %4394 = vrsqrt.f32 %v644_v52  ;;  %v5345_v58 = vpack.c.bf16 %v724_v35, %v722_v40  ;;  %v684_v31 = vmul.f32 %v4387_v34, %v5200_v50  ;;  %v4355_v52 = vld [vmem:[#allocation5 + $0x280] ss:$24 sps:$4 sm:$0xff]  }
 0x194   : > { %1563 = vmatpush1.bf16.msra.mxu0 %v4325_v29  ;;  %4008 = vmatprep.subr.bf16.mxu1 %v4327_v55  ;;  %v4339_v55 = vld [vmem:[#allocation5 + $0x164] ss:$24 sps:$4 sm:$0xff]  }
 0x195   : > { %1564 = vmatprep.subr.bf16.mxu0 %v4330_v2  ;;  %v4389_v56 = vpop.eup %4388  ;;  %v729_v51 = vmul.f32 %v5262_v26, %v685_v0 }
 0x196   : > { %v4391_v19 = vpop.eup %4390  ;;  %v689_v61 = vmul.f32 %v4389_v56, %v5220_v6  ;;  %v688_v20 = vmul.f32 %v4389_v56, %v5217_v4  ;;  %v4349_v4 = vld [vmem:[#allocation5 + $0x220] ss:$24 sps:$4 sm:$0xff]  }
 0x197   : > { %1383 = vmatmul.mubr.bf16.gmra.mrb[8].mxu0 %v5313_v62  ;;  %1496 = vmatmul.mubr.bf16.gmra.mrb[8].mxu1 %v5313_v62  ;;  %v5349_v5 = vpack.c.bf16 %v729_v51, %v727_v44  ;;  %v686_v12 = vmul.f32 %v4391_v19, %v5210_v60 }
 0x198   : > { %1565 = vmatpush1.bf16.msra.mxu0 %v4328_v15  ;;  %1392 = vmatprep.mubr.bf16.mxu0 %v5317_v21  ;;  %v732_v60 = vmul.f32 %v5266_v42, %v688_v20 }
 0x199   : > { %1566 = vmatprep.subr.bf16.mxu0 %v4333_v22  ;;  %4024 = vmatpush1.bf16.msra.mxu1 %v4325_v29  ;;  %v682_v29 = vmul.f32 %v4385_v18, %v5190_v43  ;;  %v728_v43 = vmul.f32 %v5266_v42, %v684_v31  ;;  %v730_v18 = vmul.f32 %v5266_v42, %v686_v12 }
 0x19a   : > { %1505 = vmatprep.mubr.bf16.mxu1 %v5317_v21  ;;  %4009 = vmatprep.subr.bf16.mxu1 %v4330_v2  ;;  %v687_v2 = vmul.f32 %v4391_v19, %v5227_v16  ;;  %v733_v16 = vmul.f32 %v5262_v26, %v689_v61 }
 0x19b   : > { %v726_v9 = vmul.f32 %v5266_v42, %v682_v29  ;;  %v750_v36 = vpack.c.bf16 %v732_v60, %v730_v18 }
 0x19c   : > { %1567 = vmatpush1.bf16.msra.mxu0 %v4331_v25  ;;  %v4393_v50 = vpop.eup %4392  ;;  %v731_v11 = vmul.f32 %v5262_v26, %v687_v2 }
 0x19d   : > { %1568 = vmatprep.subr.bf16.mxu0 %v4336_v37  ;;  %4025 = vmatpush1.bf16.msra.mxu1 %v4328_v15  ;;  %v4395_v6 = vpop.eup %4394  ;;  %v4348_v15 = vld [vmem:[#allocation5 + $0x1f4] ss:$24 sps:$4 sm:$0xff]   ;;  %v5361_v7 = vpack.c.bf16 %v728_v43, %v726_v9  ;;  %v693_v30 = vmul.f32 %v4393_v50, %v5237_v32  ;;  %v692_v34 = vmul.f32 %v4393_v50, %v5234_v27 }
 0x19e   : > { %4010 = vmatprep.subr.bf16.mxu1 %v4333_v22  ;;  %v4346_v22 = vld [vmem:[#allocation5 + $0x1f0] ss:$24 sps:$4 sm:$0xff]   ;;  %v5365_v24 = vpack.c.bf16 %v733_v16, %v731_v11  ;;  %v691_v28 = vmul.f32 %v4395_v6, %v5247_v39  ;;  %v4354_v32 = vld [vmem:[#allocation5 + $0x254] ss:$24 sps:$4 sm:$0xff]   ;;  %v690_v41 = vmul.f32 %v4395_v6, %v5240_v33 }
 0x19f   : > { %1393 = vmatmul.mubr.bf16.gmra.mrb[12].mxu0 %v5329_v46  ;;  %1506 = vmatmul.mubr.bf16.gmra.mrb[12].mxu1 %v5329_v46  ;;  %v737_v39 = vmul.f32 %v5262_v26, %v693_v30  ;;  %v736_v49 = vmul.f32 %v5266_v42, %v692_v34  ;;  %v4360_v33 = vld [vmem:[#allocation5 + $0x2b4] ss:$24 sps:$4 sm:$0xff]  }
 0x1a0   : > { %1569 = vmatpush1.bf16.msra.mxu0 %v4334_v53  ;;  %1402 = vmatprep.mubr.bf16.mxu0 %v5333_v54 }
 0x1a1   : > { %1570 = vmatprep.subr.bf16.mxu0 %v4339_v55  ;;  %4026 = vmatpush1.bf16.msra.mxu1 %v4331_v25  ;;  %v735_v25 = vmul.f32 %v5262_v26, %v691_v28  ;;  %v734_v26 = vmul.f32 %v5266_v42, %v690_v41  ;;  %v4361_v42 = vld [vmem:[#allocation5 + $0x2e0] ss:$24 sps:$4 sm:$0xff]  }
 0x1a2   : > { %1515 = vmatprep.mubr.bf16.mxu1 %v5333_v54  ;;  %4011 = vmatprep.subr.bf16.mxu1 %v4336_v37  ;;  %v4352_v37 = vld [vmem:[#allocation5 + $0x250] ss:$24 sps:$4 sm:$0xff]  }
 0x1a3   : > { %v753_v38 = vpack.c.bf16 %v737_v39, %v735_v25  ;;  %v752_v27 = vpack.c.bf16 %v736_v49, %v734_v26 }
 0x1a4   : > { %1571 = vmatpush1.bf16.msra.mxu0 %v4337_v14 }
 0x1a5   : > { %1572 = vmatprep.subr.bf16.mxu0 %v4342_v57  ;;  %4027 = vmatpush1.bf16.msra.mxu1 %v4334_v53  ;;  %v4358_v53 = vld [vmem:[#allocation5 + $0x2b0] ss:$24 sps:$4 sm:$0xff]  }
 0x1a6   : > { %4012 = vmatprep.subr.bf16.mxu1 %v4339_v55 }
 0x1a7   : > { %1403 = vmatmul.mubr.bf16.gmra.mrb[16].mxu0 %v5345_v58  ;;  %1516 = vmatmul.mubr.bf16.gmra.mrb[16].mxu1 %v5345_v58 }
 0x1a8   : > { %1573 = vmatpush1.bf16.msra.mxu0 %v4340_v59  ;;  %1412 = vmatprep.mubr.bf16.mxu0 %v5349_v5 }
 0x1a9   : > { %1574 = vmatprep.subr.bf16.mxu0 %v4345_v63  ;;  %4028 = vmatpush1.bf16.msra.mxu1 %v4337_v14 }
 0x1aa   : > { %1525 = vmatprep.mubr.bf16.mxu1 %v5349_v5  ;;  %4013 = vmatprep.subr.bf16.mxu1 %v4342_v57 }
 0x1ac   : > { %1575 = vmatpush1.bf16.msra.mxu0 %v4343_v10 }
 0x1ad   : > { %1576 = vmatprep.subr.bf16.mxu0 %v4348_v15  ;;  %4029 = vmatpush1.bf16.msra.mxu1 %v4340_v59 }
 0x1ae   : > { %4014 = vmatprep.subr.bf16.mxu1 %v4345_v63 }
 0x1af   : > { %1413 = vmatmul.mubr.bf16.gmra.mrb[20].mxu0 %v5361_v7  ;;  %1526 = vmatmul.mubr.bf16.gmra.mrb[20].mxu1 %v5361_v7 }
 0x1b0   : > { %1577 = vmatpush1.bf16.msra.mxu0 %v4346_v22  ;;  %1422 = vmatprep.mubr.bf16.mxu0 %v5365_v24 }
 0x1b1   : > { %1578 = vmatprep.subr.bf16.mxu0 %v4351_v23  ;;  %4030 = vmatpush1.bf16.msra.mxu1 %v4343_v10 }
 0x1b2   : > { %1535 = vmatprep.mubr.bf16.mxu1 %v5365_v24  ;;  %4015 = vmatprep.subr.bf16.mxu1 %v4348_v15 }
 0x1b4   : > { %1579 = vmatpush1.bf16.msra.mxu0 %v4349_v4 }
 0x1b5   : > { %1580 = vmatprep.subr.bf16.mxu0 %v4354_v32  ;;  %4031 = vmatpush1.bf16.msra.mxu1 %v4346_v22 }
 0x1b6   : > { %4016 = vmatprep.subr.bf16.mxu1 %v4351_v23 }
 0x1b7   : > { %1423 = vmatmul.mubr.bf16.gmra.mrb[24].mxu0 %v750_v36  ;;  %1536 = vmatmul.mubr.bf16.gmra.mrb[24].mxu1 %v750_v36 }
 0x1b8   : > { %1581 = vmatpush1.bf16.msra.mxu0 %v4352_v37  ;;  %1432 = vmatprep.mubr.bf16.mxu0 %v753_v38 }
 0x1b9   : > { %1582 = vmatprep.subr.bf16.mxu0 %v4357_v47  ;;  %4032 = vmatpush1.bf16.msra.mxu1 %v4349_v4 }
 0x1ba   : > { %1545 = vmatprep.mubr.bf16.mxu1 %v753_v38  ;;  %4017 = vmatprep.subr.bf16.mxu1 %v4354_v32 }
 0x1bc   : > { %1583 = vmatpush1.bf16.msra.mxu0 %v4355_v52 }
 0x1bd   : > { %1584 = vmatprep.subr.bf16.mxu0 %v4360_v33  ;;  %4033 = vmatpush1.bf16.msra.mxu1 %v4352_v37 }
 0x1be   : > { %4018 = vmatprep.subr.bf16.mxu1 %v4357_v47 }
 0x1bf   : > { %1433 = vmatmul.mubr.bf16.gmra.mrb[28].mxu0 %v752_v27  ;;  %1546 = vmatmul.mubr.bf16.gmra.mrb[28].mxu1 %v752_v27 }
 0x1c0   : > { %1585 = vmatpush1.bf16.msra.mxu0 %v4358_v53  ;;  %1588 = vmatprep.mubr.bf16.mxu0 %v5279_v13 }
 0x1c1   : > { %1586 = vmatprep.subr.bf16.mxu0 %v4363_v8  ;;  %4034 = vmatpush1.bf16.msra.mxu1 %v4355_v52 }
 0x1c2   : > { %1628 = vmatprep.mubr.bf16.mxu1 %v5333_v54  ;;  %4019 = vmatprep.subr.bf16.mxu1 %v4360_v33 }
 0x1c4   : > { %1587 = vmatpush1.bf16.msra.mxu0 %v4361_v42 }
 0x1c5   : > { %4035 = vmatpush1.bf16.msra.mxu1 %v4358_v53 }
 0x1c6   : > { %4020 = vmatprep.subr.bf16.mxu1 %v4363_v8 }
 0x1c7   : > { %1589 = vmatmul.mubr.bf16.vlgmr.msra.gmra.mrb[32].mxu0 %v5281_v3 }
 0x1c8   : > { %1598 = vmatprep.mubr.bf16.mxu0 %v5284_v17 }
 0x1c9   : > { %4036 = vmatpush1.bf16.msra.mxu1 %v4361_v42 }
 0x1cc   : > { %1629 = vmatmul.mubr.bf16.vlgmr.msra.gmra.mrb[32].mxu1 %v5345_v58 }
 0x1cd   : > { %1638 = vmatprep.mubr.bf16.mxu1 %v5349_v5 }
 0x1cf   : > { %1599 = vmatmul.mubr.bf16.gmra.mrb[36].mxu0 %v5297_v45 }
 0x1d0   : > { %1608 = vmatprep.mubr.bf16.mxu0 %v5301_v1 }
 0x1d4   : > { %1639 = vmatmul.mubr.bf16.gmra.mrb[36].mxu1 %v5361_v7 }
 0x1d5   : > { %1648 = vmatprep.mubr.bf16.mxu1 %v5365_v24 }
 0x1d7   : > { %1609 = vmatmul.mubr.bf16.gmra.mrb[40].mxu0 %v5313_v62 }
 0x1d8   : > { %1618 = vmatprep.mubr.bf16.mxu0 %v5317_v21 }
 0x1dc   : > { %1649 = vmatmul.mubr.bf16.gmra.mrb[40].mxu1 %v750_v36 }
 0x1dd   : > { %1658 = vmatprep.mubr.bf16.mxu1 %v753_v38 }
 0x1df   : > { %1619 = vmatmul.mubr.bf16.gmra.mrb[44].mxu0 %v5329_v46 }
 0x1e4   : > { %1659 = vmatmul.mubr.bf16.gmra.mrb[44].mxu1 %v752_v27 }
 0x25a   : > { %v5394_v13 = vpop.f32.mrb[0].mxu0  ;;  %v5396_v3 = vpop.f32.mrb[0].mxu1 }
 0x25b   : > { %v5398_v17 = vpop.f32.mrb[1].mxu1  ;;  %1765 = vrot.lane.b32.xlu0 %v5394_v13, %s4661_s2  ;;  %v5402_v45 = vpop.f32.mrb[1].mxu0 }
 0x25c   : > { %v5404_v1 = vpop.f32.mrb[2].mxu0  ;;  %v5406_v62 = vpop.f32.mrb[2].mxu1 }
 0x25d   : > { %v5408_v21 = vpop.f32.mrb[3].mxu1  ;;  %1767 = vrot.lane.b32.xlu1 %v5404_v1, %s4661_s2  ;;  %v5412_v46 = vpop.f32.mrb[3].mxu0 }
 0x25f   : > { %1864 = vrot.lane.b32.xlu0 %v5394_v13, %s4662_s20 }
 0x261   : > { %1866 = vrot.lane.b32.xlu1 %v5404_v1, %s4662_s20 }
 0x262   : > { %v5418_v54 = vpop.f32.mrb[4].mxu0  ;;  %v5420_v0 = vpop.f32.mrb[4].mxu1 }
 0x263   : > { %2137 = vrot.lane.b32.xlu0 %v5396_v3, %s4661_s2  ;;  %v5424_v55 = vpop.f32.mrb[5].mxu1  ;;  %v5426_v40 = vpop.f32.mrb[5].mxu0 }
 0x264   : > { %v5428_v35 = vpop.f32.mrb[6].mxu0  ;;  %v5430_v56 = vpop.f32.mrb[6].mxu1 }
 0x265   : > { %2139 = vrot.lane.b32.xlu1 %v5406_v62, %s4661_s2  ;;  %v5434_v14 = vpop.f32.mrb[7].mxu1  ;;  %v5436_v44 = vpop.f32.mrb[7].mxu0 }
 0x267   : > { %2233 = vrot.lane.b32.xlu0 %v5396_v3, %s4662_s20 }
 0x269   : > { %2235 = vrot.lane.b32.xlu1 %v5406_v62, %s4662_s20 }
 0x26a   : > { %v5442_v51 = vpop.f32.mrb[8].mxu0  ;;  %v5450_v58 = vpop.f32.mrb[8].mxu1 }
 0x26b   : > { %6575 = vst [vmem:[#allocation34_spill] sm:$0xff] %v5442_v51  ;;  %1797 = vrot.lane.b32.xlu0 %v5402_v45, %s4661_s2  ;;  %v5446_v19 = vpop.f32.mrb[9].mxu0  ;;  %6578 = vst [vmem:[#allocation37_spill] sm:$0xff] %v5450_v58  ;;  %v5456_v31 = vpop.f32.mrb[9].mxu1 }
 0x26c   : > { %6576 = vst [vmem:[#allocation35_spill] sm:$0xff] %v5446_v19  ;;  %v5448_v57 = vpop.f32.mrb[10].mxu0  ;;  %6580 = vst [vmem:[#allocation39_spill] sm:$0xff] %v5456_v31  ;;  %v5458_v59 = vpop.f32.mrb[10].mxu1 }
 0x26d   : > { %6577 = vst [vmem:[#allocation36_spill] sm:$0xff] %v5448_v57  ;;  %1799 = vrot.lane.b32.xlu1 %v5412_v46, %s4661_s2  ;;  %v5454_v29 = vpop.f32.mrb[11].mxu0  ;;  %6581 = vst [vmem:[#allocation40_spill] sm:$0xff] %v5458_v59  ;;  %v5462_v5 = vpop.f32.mrb[11].mxu1 }
 0x26e   : > { %6579 = vst [vmem:[#allocation38_spill] sm:$0xff] %v5454_v29  ;;  %6582 = vst [vmem:[#allocation41_spill] sm:$0xff] %v5462_v5 }
 0x26f   : > { %1896 = vrot.lane.b32.xlu0 %v5402_v45, %s4662_s20 }
 0x271   : > { %1898 = vrot.lane.b32.xlu1 %v5412_v46, %s4662_s20 }
 0x272   : > { %v5466_v2 = vpop.f32.mrb[12].mxu0  ;;  %v5474_v9 = vpop.f32.mrb[12].mxu1 }
 0x273   : > { %6583 = vst [vmem:[#allocation42_spill] sm:$0xff] %v5466_v2  ;;  %2169 = vrot.lane.b32.xlu0 %v5398_v17, %s4661_s2  ;;  %v5470_v61 = vpop.f32.mrb[13].mxu0  ;;  %6586 = vst [vmem:[#allocation45_spill] sm:$0xff] %v5474_v9  ;;  %v5480_v50 = vpop.f32.mrb[13].mxu1 }
 0x274   : > { %6584 = vst [vmem:[#allocation43_spill] sm:$0xff] %v5470_v61  ;;  %v5472_v63 = vpop.f32.mrb[14].mxu0  ;;  %6588 = vst [vmem:[#allocation47_spill] sm:$0xff] %v5480_v50  ;;  %v5482_v10 = vpop.f32.mrb[14].mxu1 }
 0x275   : > { %6585 = vst [vmem:[#allocation44_spill] sm:$0xff] %v5472_v63  ;;  %2171 = vrot.lane.b32.xlu1 %v5408_v21, %s4661_s2  ;;  %v5478_v43 = vpop.f32.mrb[15].mxu0  ;;  %6589 = vst [vmem:[#allocation48_spill] sm:$0xff] %v5482_v10  ;;  %v5486_v11 = vpop.f32.mrb[15].mxu1 }
 0x276   : > { %6587 = vst [vmem:[#allocation46_spill] sm:$0xff] %v5478_v43  ;;  %6590 = vst [vmem:[#allocation49_spill] sm:$0xff] %v5486_v11 }
 0x277   : > { %2265 = vrot.lane.b32.xlu0 %v5398_v17, %s4662_s20 }
 0x279   : > { %2267 = vrot.lane.b32.xlu1 %v5408_v21, %s4662_s20 }
 0x27a   : > { %v5490_v16 = vpop.f32.mrb[16].mxu0  ;;  %v5498_v7 = vpop.f32.mrb[16].mxu1 }
 0x27b   : > { %6591 = vst [vmem:[#allocation50_spill] sm:$0xff] %v5490_v16  ;;  %1868 = vrot.lane.b32.xlu0 %v5418_v54, %s4662_s20  ;;  %v5494_v6 = vpop.f32.mrb[17].mxu0  ;;  %6592 = vst [vmem:[#allocation51_spill] sm:$0xff] %v5498_v7  ;;  %v5504_v20 = vpop.f32.mrb[17].mxu1 }
 0x27c   : > { %v5496_v15 = vpop.f32.mrb[18].mxu0  ;;  %v5506_v22 = vpop.f32.mrb[18].mxu1 }
 0x27d   : > { %1769 = vrot.lane.b32.xlu1 %v5418_v54, %s4661_s2  ;;  %v5502_v12 = vpop.f32.mrb[19].mxu0  ;;  %v5510_v24 = vpop.f32.mrb[19].mxu1 }
 0x27f   : > { %2141 = vrot.lane.b32.xlu0 %v5420_v0, %s4661_s2 }
 0x281   : > { %1771 = vrot.lane.b32.xlu1 %v5428_v35, %s4661_s2 }
 0x282   : > { %v5514_v28 = vpop.f32.mrb[20].mxu0  ;;  %v5522_v18 = vpop.f32.mrb[20].mxu1 }
 0x283   : > { %2237 = vrot.lane.b32.xlu0 %v5420_v0, %s4662_s20  ;;  %v5518_v30 = vpop.f32.mrb[21].mxu0  ;;  %v5528_v4 = vpop.f32.mrb[21].mxu1 }
 0x284   : > { %v5520_v23 = vpop.f32.mrb[22].mxu0  ;;  %6594 = vst [vmem:[#allocation53_spill] sm:$0xff] %v5528_v4  ;;  %v5530_v25 = vpop.f32.mrb[22].mxu1 }
 0x285   : > { %1870 = vrot.lane.b32.xlu1 %v5428_v35, %s4662_s20  ;;  %v5526_v60 = vpop.f32.mrb[23].mxu0  ;;  %v5534_v39 = vpop.f32.mrb[23].mxu1 }
 0x286   : > { %6593 = vst [vmem:[#allocation52_spill] sm:$0xff] %v5526_v60  ;;  %6595 = vst [vmem:[#allocation54_spill] sm:$0xff] %v5534_v39 }
 0x287   : > { %1801 = vrot.lane.b32.xlu0 %v5426_v40, %s4661_s2 }
 0x289   : > { %2143 = vrot.lane.b32.xlu1 %v5430_v56, %s4661_s2 }
 0x28a   : > { %v5538_v32 = vpop.f32.mrb[24].mxu0  ;;  %v5546_v34 = vpop.f32.mrb[24].mxu1 }
 0x28b   : > { %6596 = vst [vmem:[#allocation55_spill] sm:$0xff] %v5538_v32  ;;  %1900 = vrot.lane.b32.xlu0 %v5426_v40, %s4662_s20  ;;  %v5542_v36 = vpop.f32.mrb[25].mxu0  ;;  %6599 = vst [vmem:[#allocation58_spill] sm:$0xff] %v5546_v34  ;;  %v5552_v38 = vpop.f32.mrb[25].mxu1 }
 0x28c   : > { %6597 = vst [vmem:[#allocation56_spill] sm:$0xff] %v5542_v36  ;;  %v5544_v41 = vpop.f32.mrb[26].mxu0  ;;  %6601 = vst [vmem:[#allocation60_spill] sm:$0xff] %v5552_v38  ;;  %v5554_v47 = vpop.f32.mrb[26].mxu1 }
 0x28d   : > { %6598 = vst [vmem:[#allocation57_spill] sm:$0xff] %v5544_v41  ;;  %2239 = vrot.lane.b32.xlu1 %v5430_v56, %s4662_s20  ;;  %v5550_v37 = vpop.f32.mrb[27].mxu0  ;;  %6602 = vst [vmem:[#allocation61_spill] sm:$0xff] %v5554_v47  ;;  %v5558_v26 = vpop.f32.mrb[27].mxu1 }
 0x28e   : > { %6600 = vst [vmem:[#allocation59_spill] sm:$0xff] %v5550_v37  ;;  %6603 = vst [vmem:[#allocation62_spill] sm:$0xff] %v5558_v26 }
 0x28f   : > { %2173 = vrot.lane.b32.xlu0 %v5424_v55, %s4661_s2 }
 0x291   : > { %1803 = vrot.lane.b32.xlu1 %v5436_v44, %s4661_s2 }
 0x292   : > { %v5562_v49 = vpop.f32.mrb[28].mxu0  ;;  %v5570_v27 = vpop.f32.mrb[28].mxu1 }
 0x293   : > { %6604 = vst [vmem:[#allocation63_spill] sm:$0xff] %v5562_v49  ;;  %2269 = vrot.lane.b32.xlu0 %v5424_v55, %s4662_s20  ;;  %v5566_v52 = vpop.f32.mrb[29].mxu0  ;;  %6607 = vst [vmem:[#allocation66_spill] sm:$0xff] %v5570_v27  ;;  %v5576_v8 = vpop.f32.mrb[29].mxu1 }
 0x294   : > { %6605 = vst [vmem:[#allocation64_spill] sm:$0xff] %v5566_v52  ;;  %v5568_v33 = vpop.f32.mrb[30].mxu0  ;;  %6609 = vst [vmem:[#allocation68_spill] sm:$0xff] %v5576_v8  ;;  %v5578_v42 = vpop.f32.mrb[30].mxu1 }
 0x295   : > { %6606 = vst [vmem:[#allocation65_spill] sm:$0xff] %v5568_v33  ;;  %1902 = vrot.lane.b32.xlu1 %v5436_v44, %s4662_s20  ;;  %v5574_v53 = vpop.f32.mrb[31].mxu0  ;;  %6610 = vst [vmem:[#allocation69_spill] sm:$0xff] %v5578_v42  ;;  %v5582_v48 = vpop.f32.mrb[31].mxu1 }
 0x296   : > { %6608 = vst [vmem:[#allocation67_spill] sm:$0xff] %v5574_v53  ;;  %6611 = vst [vmem:[#allocation70_spill] sm:$0xff] %v5582_v48 }
 0x297   : > { %1773 = vrot.lane.b32.xlu0 %v5442_v51, %s4661_s2 }
 0x299   : > { %2175 = vrot.lane.b32.xlu1 %v5434_v14, %s4661_s2 }
 0x29a   : > { %v1590_v52 = vpop.f32.mrb[32].mxu0 }
 0x29b   : > { %1872 = vrot.lane.b32.xlu0 %v5442_v51, %s4662_s20  ;;  %v1592_v53 = vpop.f32.mrb[33].mxu0  ;;  %v1736_v51 = vld [vmem:[%s5709_s22 + $0x18] sm:$0xff] }
 0x29c   : > { %v1594_v33 = vpop.f32.mrb[34].mxu0 }
 0x29d   : > { %v3803_v8 = vpack.c.bf16 %v1594_v33, %v1590_v52  ;;  %2271 = vrot.lane.b32.xlu1 %v5434_v14, %s4662_s20  ;;  %v1596_v42 = vpop.f32.mrb[35].mxu0 }
 0x29e   : > { %v3923_v27 = vpack.c.bf16 %v1596_v42, %v1592_v53 }
 0x29f   : > { %3804 = vst [vmem:[%s5594_s19] sm:$0xff] %v3803_v8   ;;  %2145 = vrot.lane.b32.xlu0 %v5450_v58, %s4661_s2  ;;  %v1630_v48 = vpop.f32.mrb[32].mxu1 }
 0x2a0   : > { %3997 = vst [vmem:[%s5594_s19 + $0x40] sm:$0xff] %v3923_v27   ;;  %v1632_v52 = vpop.f32.mrb[33].mxu1 }
 0x2a1   : > { %1775 = vrot.lane.b32.xlu1 %v5448_v57, %s4661_s2  ;;  %v1634_v53 = vpop.f32.mrb[34].mxu1 }
 0x2a2   : > { %v1600_v33 = vpop.f32.mrb[36].mxu0  ;;  %v3823_v8 = vpack.c.bf16 %v1634_v53, %v1630_v48  ;;  %v1636_v26 = vpop.f32.mrb[35].mxu1 }
 0x2a3   : > { %2241 = vrot.lane.b32.xlu0 %v5450_v58, %s4662_s20  ;;  %v1602_v42 = vpop.f32.mrb[37].mxu0  ;;  %v3943_v37 = vpack.c.bf16 %v1636_v26, %v1632_v52 }
 0x2a4   : > { %v1604_v49 = vpop.f32.mrb[38].mxu0  ;;  %3977 = vst [vmem:[%s5594_s19 + $0x20] sm:$0xff] %v3823_v8  }
 0x2a5   : > { %v3808_v38 = vpack.c.bf16 %v1604_v49, %v1600_v33  ;;  %1874 = vrot.lane.b32.xlu1 %v5448_v57, %s4662_s20  ;;  %v1606_v27 = vpop.f32.mrb[39].mxu0  ;;  %4001 = vst [vmem:[%s5594_s19 + $0x60] sm:$0xff] %v3943_v37  }
 0x2a6   : > { %v3928_v47 = vpack.c.bf16 %v1606_v27, %v1602_v42 }
 0x2a7   : > { %3974 = vst [vmem:[%s5594_s19 + $0x8] sm:$0xff] %v3808_v38   ;;  %1805 = vrot.lane.b32.xlu0 %v5446_v19, %s4661_s2  ;;  %v1640_v58 = vpop.f32.mrb[36].mxu1 }
 0x2a8   : > { %3998 = vst [vmem:[%s5594_s19 + $0x48] sm:$0xff] %v3928_v47   ;;  %v1642_v48 = vpop.f32.mrb[37].mxu1 }
 0x2a9   : > { %2147 = vrot.lane.b32.xlu1 %v5458_v59, %s4661_s2  ;;  %v1644_v49 = vpop.f32.mrb[38].mxu1 }
 0x2aa   : > { %v1610_v26 = vpop.f32.mrb[40].mxu0  ;;  %v3828_v38 = vpack.c.bf16 %v1644_v49, %v1640_v58  ;;  %v1646_v52 = vpop.f32.mrb[39].mxu1 }
 0x2ab   : > { %1904 = vrot.lane.b32.xlu0 %v5446_v19, %s4662_s20  ;;  %v1612_v37 = vpop.f32.mrb[41].mxu0  ;;  %v3948_v53 = vpack.c.bf16 %v1646_v52, %v1642_v48  ;;  %v1735_v19 = vld [vmem:[%s5709_s22 + $0x10] sm:$0xff] }
 0x2ac   : > { %v1614_v33 = vpop.f32.mrb[42].mxu0  ;;  %3978 = vst [vmem:[%s5594_s19 + $0x28] sm:$0xff] %v3828_v38  }
 0x2ad   : > { %v3813_v42 = vpack.c.bf16 %v1614_v33, %v1610_v26  ;;  %2243 = vrot.lane.b32.xlu1 %v5458_v59, %s4662_s20  ;;  %v1616_v47 = vpop.f32.mrb[43].mxu0  ;;  %4002 = vst [vmem:[%s5594_s19 + $0x68] sm:$0xff] %v3948_v53  }
 0x2ae   : > { %v3933_v8 = vpack.c.bf16 %v1616_v47, %v1612_v37 }
 0x2af   : > { %3975 = vst [vmem:[%s5594_s19 + $0x10] sm:$0xff] %v3813_v42   ;;  %2177 = vrot.lane.b32.xlu0 %v5456_v31, %s4661_s2  ;;  %v1650_v27 = vpop.f32.mrb[40].mxu1 }
 0x2b0   : > { %3999 = vst [vmem:[%s5594_s19 + $0x50] sm:$0xff] %v3933_v8   ;;  %v1652_v58 = vpop.f32.mrb[41].mxu1 }
 0x2b1   : > { %1807 = vrot.lane.b32.xlu1 %v5454_v29, %s4661_s2  ;;  %v1654_v26 = vpop.f32.mrb[42].mxu1 }
 0x2b2   : > { %v1620_v48 = vpop.f32.mrb[44].mxu0  ;;  %v3833_v37 = vpack.c.bf16 %v1654_v26, %v1650_v27  ;;  %v1656_v38 = vpop.f32.mrb[43].mxu1 }
 0x2b3   : > { %2273 = vrot.lane.b32.xlu0 %v5456_v31, %s4662_s20  ;;  %v1622_v49 = vpop.f32.mrb[45].mxu0  ;;  %v3953_v33 = vpack.c.bf16 %v1656_v38, %v1652_v58  ;;  %v1734_v31 = vld [vmem:[%s5709_s22 + $0x8] sm:$0xff] }
 0x2b4   : > { %v1624_v52 = vpop.f32.mrb[46].mxu0  ;;  %3979 = vst [vmem:[%s5594_s19 + $0x30] sm:$0xff] %v3833_v37  }
 0x2b5   : > { %1906 = vrot.lane.b32.xlu1 %v5454_v29, %s4662_s20  ;;  %v3818_v53 = vpack.c.bf16 %v1624_v52, %v1620_v48  ;;  %v1626_v42 = vpop.f32.mrb[47].mxu0  ;;  %4003 = vst [vmem:[%s5594_s19 + $0x70] sm:$0xff] %v3953_v33  }
 0x2b6   : > { %v3938_v47 = vpack.c.bf16 %v1626_v42, %v1622_v49  ;;  %v6612_v42 = vlaneseq }
 0x2b7   : > { %1777 = vrot.lane.b32.xlu0 %v5466_v2, %s4661_s2  ;;  %3976 = vst [vmem:[%s5594_s19 + $0x18] sm:$0xff] %v3818_v53   ;;  %v1660_v8 = vpop.f32.mrb[44].mxu1 }
 0x2b8   : > { %4000 = vst [vmem:[%s5594_s19 + $0x58] sm:$0xff] %v3938_v47   ;;  %v1662_v27 = vpop.f32.mrb[45].mxu1  ;;  %v5669_v47 = vand.u32 127, %v6612_v42 }
 0x2b9   : > { %2179 = vrot.lane.b32.xlu1 %v5462_v5, %s4661_s2  ;;  %v1664_v58 = vpop.f32.mrb[46].mxu1 }
 0x2ba   : > { %v3838_v48 = vpack.c.bf16 %v1664_v58, %v1660_v8  ;;  %v1666_v26 = vpop.f32.mrb[47].mxu1  ;;  %vm1831_vm0 = vcmp.lt.s32.totalorder %v5669_v47, 127  ;;  %vm1928_vm1 = vcmp.lt.s32.totalorder %v5669_v47, 1 }
 0x2bb   : > { %1876 = vrot.lane.b32.xlu0 %v5466_v2, %s4662_s20  ;;  %v3958_v49 = vpack.c.bf16 %v1666_v26, %v1662_v27  ;;  %v1702_v26 = vld [vmem:[%s5687_s18 + $0x8] sm:$0xff] }
 0x2bc   : > { %3980 = vst [vmem:[%s5594_s19 + $0x38] sm:$0xff] %v3838_v48   ;;  %v1701_v48 = vld [vmem:[%s5687_s18] sm:$0xff] }
 0x2bd   : > { %2275 = vrot.lane.b32.xlu1 %v5462_v5, %s4662_s20  ;;  %4004 = vst [vmem:[%s5594_s19 + $0x78] sm:$0xff] %v3958_v49  }
 0x2bf   : > { %2149 = vrot.lane.b32.xlu0 %v5474_v9, %s4661_s2 }
 0x2c1   : > { %1779 = vrot.lane.b32.xlu1 %v5472_v63, %s4661_s2 }
 0x2c3   : > { %2245 = vrot.lane.b32.xlu0 %v5474_v9, %s4662_s20  ;;  %v1670_v9 = vld [vmem:[%s5091_s25 + $0x8] sm:$0xff] }
 0x2c4   : > { %v1962_v57 = vmul.f32 %v1670_v9, %v5402_v45 }
 0x2c5   : > { %1878 = vrot.lane.b32.xlu1 %v5472_v63, %s4662_s20 }
 0x2c7   : > { %1809 = vrot.lane.b32.xlu0 %v5470_v61, %s4661_s2 }
 0x2c9   : > { %2151 = vrot.lane.b32.xlu1 %v5482_v10, %s4661_s2 }
 0x2cb   : > { %1908 = vrot.lane.b32.xlu0 %v5470_v61, %s4662_s20  ;;  %v1672_v61 = vld [vmem:[%s5091_s25 + $0x18] sm:$0xff] }
 0x2cd   : > { %2247 = vrot.lane.b32.xlu1 %v5482_v10, %s4662_s20  ;;  %v1766_v37 = vpop.permute.xlu0 %1765  ;;  %v1703_v10 = vld [vmem:[%s5687_s18 + $0x10] sm:$0xff] }
 0x2cf   : > { %v1768_v38 = vpop.permute.xlu1 %1767  ;;  %2181 = vrot.lane.b32.xlu0 %v5480_v50, %s4661_s2 }
 0x2d1   : > { %1811 = vrot.lane.b32.xlu1 %v5478_v43, %s4661_s2  ;;  %v1865_v52 = vpop.permute.xlu0 %1864 }
 0x2d3   : > { %v1867_v33 = vpop.permute.xlu1 %1866  ;;  %2277 = vrot.lane.b32.xlu0 %v5480_v50, %s4662_s20  ;;  %v1704_v50 = vld [vmem:[%s5687_s18 + $0x18] sm:$0xff] }
 0x2d5   : > { %1910 = vrot.lane.b32.xlu1 %v5478_v43, %s4662_s20  ;;  %v2138_v53 = vpop.permute.xlu0 %2137  ;;  %v1671_v43 = vld [vmem:[%s5091_s25 + $0x10] sm:$0xff] }
 0x2d6   : > { %v1963_v41 = vmul.f32 %v1671_v43, %v5404_v1 }
 0x2d7   : > { %v5671_v8 = vpop.permute.xlu1 %2139  ;;  %1781 = vrot.lane.b32.xlu0 %v5490_v16, %s4661_s2 }
 0x2d9   : > { %2183 = vrot.lane.b32.xlu1 %v5486_v11, %s4661_s2  ;;  %v5677_v27 = vpop.permute.xlu0 %2233 }
 0x2db   : > { %v5680_v58 = vpop.permute.xlu1 %2235  ;;  %1880 = vrot.lane.b32.xlu0 %v5490_v16, %s4662_s20 }
 0x2dd   : > { %2279 = vrot.lane.b32.xlu1 %v5486_v11, %s4662_s20  ;;  %v1798_v49 = vpop.permute.xlu0 %1797  ;;  %v1669_v11 = vld [vmem:[%s5091_s25] sm:$0xff] }
 0x2de   : > { %v1832_v42 = vsel %vm1831_vm0, %v1766_v37, %v1798_v49  ;;  %v1848_v16 = vsel %vm1831_vm0, %v1798_v49, %v1766_v37  ;;  %v1733_v49 = vld [vmem:[%s5709_s22] sm:$0xff] }
 0x2df   : > { %v1800_v63 = vpop.permute.xlu1 %1799  ;;  %2153 = vrot.lane.b32.xlu0 %v5498_v7, %s4661_s2  ;;  %v1993_v2 = vmul.f32 %v1832_v42, %v1701_v48  ;;  %v1994_v5 = vmul.f32 %v1848_v16, %v1702_v26  ;;  %v1961_v42 = vmul.f32 %v1669_v11, %v5394_v13 }
 0x2e0   : > { %v1833_v59 = vsel %vm1831_vm0, %v1768_v38, %v1800_v63  ;;  %v1849_v37 = vsel %vm1831_vm0, %v1800_v63, %v1768_v38 }
 0x2e1   : > { %v1995_v36 = vmul.f32 %v1833_v59, %v1703_v10  ;;  %v1996_v29 = vmul.f32 %v1849_v37, %v1704_v50  ;;  %1783 = vrot.lane.b32.xlu1 %v5496_v15, %s4661_s2  ;;  %v1897_v16 = vpop.permute.xlu0 %1896  ;;  %v1964_v59 = vmul.f32 %v1672_v61, %v5412_v46  ;;  %v2025_v13 = vadd.f32 %v1993_v2, %v1961_v42 }
 0x2e2   : > { %v1929_v63 = vsel %vm1928_vm1, %v1865_v52, %v1897_v16  ;;  %v1945_v38 = vsel %vm1928_vm1, %v1897_v16, %v1865_v52  ;;  %v2026_v45 = vadd.f32 %v1994_v5, %v1962_v57 }
 0x2e3   : > { %v2057_v37 = vmul.f32 %v1945_v38, %v1733_v49  ;;  %v2058_v34 = vmul.f32 %v1929_v63, %v1734_v31  ;;  %v1899_v39 = vpop.permute.xlu1 %1898  ;;  %2249 = vrot.lane.b32.xlu0 %v5498_v7, %s4662_s20  ;;  %v2027_v16 = vadd.f32 %v1995_v36, %v1963_v41  ;;  %v2028_v60 = vadd.f32 %v1996_v29, %v1964_v59 }
 0x2e4   : > { %v1930_v32 = vsel %vm1928_vm1, %v1867_v33, %v1899_v39  ;;  %v1946_v52 = vsel %vm1928_vm1, %v1899_v39, %v1867_v33  ;;  %v2329_v41 = vmul.f32 %v1669_v11, %v5396_v3  ;;  %v2331_v3 = vmul.f32 %v1671_v43, %v5406_v62 }
 0x2e5   : > { %v2059_v4 = vmul.f32 %v1946_v52, %v1735_v19  ;;  %v2060_v1 = vmul.f32 %v1930_v32, %v1736_v51  ;;  %1882 = vrot.lane.b32.xlu1 %v5496_v15, %s4662_s20  ;;  %v2170_v46 = vpop.permute.xlu0 %2169  ;;  %v2089_v5 = vadd.f32 %v2057_v37, %v2025_v13  ;;  %v2090_v2 = vadd.f32 %v2058_v34, %v2026_v45 }
 0x2e6   : > { %v2201_v63 = vsel %vm1831_vm0, %v2138_v53, %v2170_v46  ;;  %v2217_v57 = vsel %vm1831_vm0, %v2170_v46, %v2138_v53 }
 0x2e7   : > { %v2091_v42 = vadd.f32 %v2059_v4, %v2027_v16  ;;  %v2092_v38 = vadd.f32 %v2060_v1, %v2028_v60  ;;  %v2172_v7 = vpop.permute.xlu1 %2171  ;;  %1813 = vrot.lane.b32.xlu0 %v5494_v6, %s4661_s2  ;;  %v2361_v29 = vmul.f32 %v2201_v63, %v1701_v48  ;;  %v2362_v39 = vmul.f32 %v2217_v57, %v1702_v26 }
 0x2e8   : > { %v2202_v32 = vsel %vm1831_vm0, %v5671_v8, %v2172_v7  ;;  %v2218_v36 = vsel %vm1831_vm0, %v2172_v7, %v5671_v8  ;;  %v2330_v4 = vmul.f32 %v1670_v9, %v5398_v17  ;;  %v2332_v17 = vmul.f32 %v1672_v61, %v5408_v21 }
 0x2e9   : > { %v3723_v60 = vpack.c.bf16 %v2091_v42, %v2089_v5  ;;  %v3843_v34 = vpack.c.bf16 %v2092_v38, %v2090_v2  ;;  %2155 = vrot.lane.b32.xlu1 %v5506_v22, %s4661_s2  ;;  %v2266_v33 = vpop.permute.xlu0 %2265  ;;  %v2363_v53 = vmul.f32 %v2202_v32, %v1703_v10  ;;  %v2364_v48 = vmul.f32 %v2218_v36, %v1704_v50  ;;  %v1705_v42 = vld [vmem:[%s5687_s18 + $0x20] sm:$0xff]  ;;  %v1706_v38 = vld [vmem:[%s5687_s18 + $0x28] sm:$0xff] }
 0x2ea   : > { %v2297_v26 = vsel %vm1928_vm1, %v5677_v27, %v2266_v33  ;;  %v2313_v7 = vsel %vm1928_vm1, %v2266_v33, %v5677_v27  ;;  %v2393_v11 = vadd.f32 %v2361_v29, %v2329_v41  ;;  %v2394_v8 = vadd.f32 %v2362_v39, %v2330_v4  ;;  %v1673_v32 = vld [vmem:[%s5091_s25 + $0x20] sm:$0xff]  ;;  %v1674_v41 = vld [vmem:[%s5091_s25 + $0x28] sm:$0xff]  ;;  %v1707_v4 = vld [vmem:[%s5687_s18 + $0x30] sm:$0xff] }
 0x2eb   : > { %3724 = vst [vmem:[%s5758_s0] sm:$0xff] %v3723_v60   ;;  %3981 = vst [vmem:[%s5758_s0 + $0x40] sm:$0xff] %v3843_v34   ;;  %v2425_v9 = vmul.f32 %v2313_v7, %v1733_v49  ;;  %v2426_v50 = vmul.f32 %v2297_v26, %v1734_v31  ;;  %v2268_v10 = vpop.permute.xlu1 %2267  ;;  %1912 = vrot.lane.b32.xlu0 %v5494_v6, %s4662_s20  ;;  %v2395_v61 = vadd.f32 %v2363_v53, %v2331_v3  ;;  %v1708_v60 = vld [vmem:[%s5687_s18 + $0x38] sm:$0xff] }
 0x2ec   : > { %v2298_v62 = vsel %vm1928_vm1, %v5680_v58, %v2268_v10  ;;  %v2314_v21 = vsel %vm1928_vm1, %v2268_v10, %v5680_v58  ;;  %v2396_v43 = vadd.f32 %v2364_v48, %v2332_v17  ;;  %v1737_v7 = vld [vmem:[%s5709_s22 + $0x20] sm:$0xff]  ;;  %v1738_v3 = vld [vmem:[%s5709_s22 + $0x28] sm:$0xff]  ;;  %v1675_v17 = vld [vmem:[%s5091_s25 + $0x30] sm:$0xff] }
 0x2ed   : > { %v2427_v27 = vmul.f32 %v2314_v21, %v1735_v19  ;;  %v2428_v49 = vmul.f32 %v2298_v62, %v1736_v51  ;;  %2251 = vrot.lane.b32.xlu1 %v5506_v22, %s4662_s20  ;;  %v1869_v31 = vpop.permute.xlu0 %1868  ;;  %v2457_v59 = vadd.f32 %v2425_v9, %v2393_v11  ;;  %v2458_v37 = vadd.f32 %v2426_v50, %v2394_v8  ;;  %v1676_v9 = vld [vmem:[%s5091_s25 + $0x38] sm:$0xff] }
 0x2ee   : > { %v1965_v11 = vmul.f32 %v1673_v32, %v5418_v54  ;;  %v1966_v8 = vmul.f32 %v1674_v41, %v5426_v40 }
 0x2ef   : > { %v2459_v13 = vadd.f32 %v2427_v27, %v2395_v61  ;;  %v2460_v45 = vadd.f32 %v2428_v49, %v2396_v43  ;;  %v1770_v52 = vpop.permute.xlu1 %1769  ;;  %2185 = vrot.lane.b32.xlu0 %v5504_v20, %s4661_s2  ;;  %v1739_v49 = vld [vmem:[%s5709_s22 + $0x30] sm:$0xff] }
 0x2f1   : > { %v3763_v16 = vpack.c.bf16 %v2459_v13, %v2457_v59  ;;  %v3883_v1 = vpack.c.bf16 %v2460_v45, %v2458_v37  ;;  %1815 = vrot.lane.b32.xlu1 %v5502_v12, %s4661_s2  ;;  %v2142_v58 = vpop.permute.xlu0 %2141  ;;  %v1967_v59 = vmul.f32 %v1675_v17, %v5428_v35  ;;  %v1968_v37 = vmul.f32 %v1676_v9, %v5436_v44 }
 0x2f3   : > { %3764 = vst [vmem:[%s5777_s10] sm:$0xff] %v3763_v16   ;;  %3989 = vst [vmem:[%s5777_s10 + $0x40] sm:$0xff] %v3883_v1   ;;  %v1772_v51 = vpop.permute.xlu1 %1771  ;;  %2281 = vrot.lane.b32.xlu0 %v5504_v20, %s4662_s20 }
 0x2f5   : > { %1914 = vrot.lane.b32.xlu1 %v5502_v12, %s4662_s20  ;;  %v5785_v19 = vpop.permute.xlu0 %2237 }
 0x2f7   : > { %v1871_v46 = vpop.permute.xlu1 %1870  ;;  %1785 = vrot.lane.b32.xlu0 %v5514_v28, %s4661_s2 }
 0x2f9   : > { %2187 = vrot.lane.b32.xlu1 %v5510_v24, %s4661_s2  ;;  %v1802_v63 = vpop.permute.xlu0 %1801 }
 0x2fa   : > { %v1834_v29 = vsel %vm1831_vm0, %v1770_v52, %v1802_v63  ;;  %v1850_v39 = vsel %vm1831_vm0, %v1802_v63, %v1770_v52 }
 0x2fb   : > { %v5791_v57 = vpop.permute.xlu1 %2143  ;;  %1884 = vrot.lane.b32.xlu0 %v5514_v28, %s4662_s20  ;;  %v1997_v34 = vmul.f32 %v1834_v29, %v1705_v42  ;;  %v1998_v33 = vmul.f32 %v1850_v39, %v1706_v38 }
 0x2fd   : > { %2283 = vrot.lane.b32.xlu1 %v5510_v24, %s4662_s20  ;;  %v1901_v5 = vpop.permute.xlu0 %1900  ;;  %v2029_v13 = vadd.f32 %v1997_v34, %v1965_v11  ;;  %v2030_v45 = vadd.f32 %v1998_v33, %v1966_v8 }
 0x2fe   : > { %v1931_v53 = vsel %vm1928_vm1, %v1869_v31, %v1901_v5  ;;  %v1947_v48 = vsel %vm1928_vm1, %v1901_v5, %v1869_v31  ;;  %v1740_v31 = vld [vmem:[%s5709_s22 + $0x38] sm:$0xff] }
 0x2ff   : > { %v5797_v2 = vpop.permute.xlu1 %2239  ;;  %2157 = vrot.lane.b32.xlu0 %v5522_v18, %s4661_s2  ;;  %v2061_v43 = vmul.f32 %v1947_v48, %v1737_v7  ;;  %v2062_v27 = vmul.f32 %v1931_v53, %v1738_v3 }
 0x301   : > { %1787 = vrot.lane.b32.xlu1 %v5520_v23, %s4661_s2  ;;  %v2174_v36 = vpop.permute.xlu0 %2173  ;;  %v2093_v29 = vadd.f32 %v2061_v43, %v2029_v13  ;;  %v2094_v39 = vadd.f32 %v2062_v27, %v2030_v45 }
 0x302   : > { %v2203_v54 = vsel %vm1831_vm0, %v2142_v58, %v2174_v36  ;;  %v2219_v40 = vsel %vm1831_vm0, %v2174_v36, %v2142_v58 }
 0x303   : > { %v1804_v26 = vpop.permute.xlu1 %1803  ;;  %2253 = vrot.lane.b32.xlu0 %v5522_v18, %s4662_s20  ;;  %v2365_v34 = vmul.f32 %v2203_v54, %v1705_v42  ;;  %v2366_v33 = vmul.f32 %v2219_v40, %v1706_v38  ;;  %v6615_v54 = vld [vmem:[#allocation55_spill] sm:$0xff]  ;;  %v6616_v40 = vld [vmem:[#allocation54_spill] sm:$0xff] }
 0x304   : > { %v1835_v50 = vsel %vm1831_vm0, %v1772_v51, %v1804_v26  ;;  %v1851_v10 = vsel %vm1831_vm0, %v1804_v26, %v1772_v51 }
 0x305   : > { %v1999_v62 = vmul.f32 %v1835_v50, %v1707_v4  ;;  %v2000_v21 = vmul.f32 %v1851_v10, %v1708_v60  ;;  %1886 = vrot.lane.b32.xlu1 %v5520_v23, %s4662_s20  ;;  %v2270_v61 = vpop.permute.xlu0 %2269 }
 0x306   : > { %v2315_v48 = vsel %vm1928_vm1, %v2270_v61, %v5785_v19 }
 0x307   : > { %v1903_v52 = vpop.permute.xlu1 %1902  ;;  %1817 = vrot.lane.b32.xlu0 %v5518_v30, %s4661_s2  ;;  %v2031_v1 = vadd.f32 %v1999_v62, %v1967_v59  ;;  %v2032_v44 = vadd.f32 %v2000_v21, %v1968_v37  ;;  %v2334_v62 = vmul.f32 %v1674_v41, %v5424_v55  ;;  %v2335_v21 = vmul.f32 %v1675_v17, %v5430_v56 }
 0x308   : > { %v1932_v16 = vsel %vm1928_vm1, %v1871_v46, %v1903_v52  ;;  %v1948_v35 = vsel %vm1928_vm1, %v1903_v52, %v1871_v46  ;;  %v2299_v46 = vsel %vm1928_vm1, %v5785_v19, %v2270_v61  ;;  %v2333_v19 = vmul.f32 %v1673_v32, %v5420_v0 }
 0x309   : > { %2159 = vrot.lane.b32.xlu1 %v5530_v25, %s4661_s2  ;;  %v5847_v51 = vpop.permute.xlu0 %1773  ;;  %v2063_v63 = vmul.f32 %v1948_v35, %v1739_v49  ;;  %v2064_v5 = vmul.f32 %v1932_v16, %v1740_v31  ;;  %v2336_v61 = vmul.f32 %v1676_v9, %v5434_v14  ;;  %v2429_v43 = vmul.f32 %v2315_v48, %v1737_v7  ;;  %v6614_v7 = vld [vmem:[#allocation52_spill] sm:$0xff]  ;;  %v1712_v48 = vld [vmem:[%s5687_s18 + $0x58] sm:$0xff] }
 0x30a   : > { %v2430_v27 = vmul.f32 %v2299_v46, %v1738_v3  ;;  %v1711_v46 = vld [vmem:[%s5687_s18 + $0x50] sm:$0xff] }
 0x30b   : > { %v2176_v58 = vpop.permute.xlu1 %2175  ;;  %1916 = vrot.lane.b32.xlu0 %v5518_v30, %s4662_s20  ;;  %v2095_v36 = vadd.f32 %v2063_v63, %v2031_v1  ;;  %v2096_v53 = vadd.f32 %v2064_v5, %v2032_v44  ;;  %v6617_v63 = vld [vmem:[#allocation58_spill] sm:$0xff] }
 0x30c   : > { %v2204_v42 = vsel %vm1831_vm0, %v5791_v57, %v2176_v58  ;;  %v2220_v38 = vsel %vm1831_vm0, %v2176_v58, %v5791_v57  ;;  %v6613_v57 = vld [vmem:[#allocation53_spill] sm:$0xff]  ;;  %v1709_v5 = vld [vmem:[%s5687_s18 + $0x40] sm:$0xff] }
 0x30d   : > { %v2367_v26 = vmul.f32 %v2204_v42, %v1707_v4  ;;  %v2368_v50 = vmul.f32 %v2220_v38, %v1708_v60  ;;  %2255 = vrot.lane.b32.xlu1 %v5530_v25, %s4662_s20  ;;  %v1873_v10 = vpop.permute.xlu0 %1872  ;;  %v3728_v11 = vpack.c.bf16 %v2095_v36, %v2093_v29  ;;  %v3848_v8 = vpack.c.bf16 %v2096_v53, %v2094_v39  ;;  %v1710_v29 = vld [vmem:[%s5687_s18 + $0x48] sm:$0xff]  ;;  %v6618_v58 = vld [vmem:[#allocation57_spill] sm:$0xff] }
 0x30e   : > { %v2397_v4 = vadd.f32 %v2365_v34, %v2333_v19  ;;  %v2398_v60 = vadd.f32 %v2366_v33, %v2334_v62  ;;  %v1677_v33 = vld [vmem:[%s5091_s25 + $0x40] sm:$0xff]  ;;  %v1678_v53 = vld [vmem:[%s5091_s25 + $0x48] sm:$0xff]  ;;  %v1679_v19 = vld [vmem:[%s5091_s25 + $0x50] sm:$0xff] }
 0x30f   : > { %v2272_v59 = vpop.permute.xlu1 %2271  ;;  %3960 = vst [vmem:[%s5758_s0 + $0x8] sm:$0xff] %v3728_v11   ;;  %3982 = vst [vmem:[%s5758_s0 + $0x48] sm:$0xff] %v3848_v8   ;;  %2189 = vrot.lane.b32.xlu0 %v6613_v57, %s4661_s2  ;;  %v2399_v56 = vadd.f32 %v2367_v26, %v2335_v21  ;;  %v2400_v14 = vadd.f32 %v2368_v50, %v2336_v61  ;;  %v1741_v26 = vld [vmem:[%s5709_s22 + $0x40] sm:$0xff] }
 0x310   : > { %v2300_v0 = vsel %vm1928_vm1, %v5797_v2, %v2272_v59  ;;  %v2316_v55 = vsel %vm1928_vm1, %v2272_v59, %v5797_v2  ;;  %v2461_v17 = vadd.f32 %v2429_v43, %v2397_v4  ;;  %v2462_v9 = vadd.f32 %v2430_v27, %v2398_v60  ;;  %v1742_v50 = vld [vmem:[%s5709_s22 + $0x48] sm:$0xff]  ;;  %v1680_v62 = vld [vmem:[%s5091_s25 + $0x58] sm:$0xff]  ;;  %v6619_v43 = vld [vmem:[#allocation34_spill] sm:$0xff] }
 0x311   : > { %v2431_v32 = vmul.f32 %v2316_v55, %v1739_v49  ;;  %v2432_v41 = vmul.f32 %v2300_v0, %v1740_v31  ;;  %1819 = vrot.lane.b32.xlu1 %v6614_v7, %s4661_s2  ;;  %v5881_v3 = vpop.permute.xlu0 %2145  ;;  %v1969_v27 = vmul.f32 %v1677_v33, %v6619_v43  ;;  %v6620_v59 = vld [vmem:[#allocation35_spill] sm:$0xff] }
 0x312   : > { %v1970_v4 = vmul.f32 %v1678_v53, %v6620_v59 }
 0x313   : > { %v2463_v37 = vadd.f32 %v2431_v32, %v2399_v56  ;;  %v2464_v13 = vadd.f32 %v2432_v41, %v2400_v14  ;;  %v1776_v45 = vpop.permute.xlu1 %1775  ;;  %2285 = vrot.lane.b32.xlu0 %v6613_v57, %s4662_s20  ;;  %v1743_v14 = vld [vmem:[%s5709_s22 + $0x50] sm:$0xff]  ;;  %v1744_v32 = vld [vmem:[%s5709_s22 + $0x58] sm:$0xff] }
 0x314   : > { %v6621_v41 = vld [vmem:[#allocation36_spill] sm:$0xff] }
 0x315   : > { %v3768_v2 = vpack.c.bf16 %v2463_v37, %v2461_v17  ;;  %v3888_v52 = vpack.c.bf16 %v2464_v13, %v2462_v9  ;;  %1918 = vrot.lane.b32.xlu1 %v6614_v7, %s4662_s20  ;;  %v5887_v49 = vpop.permute.xlu0 %2241  ;;  %v1971_v17 = vmul.f32 %v1679_v19, %v6621_v41  ;;  %v6622_v9 = vld [vmem:[#allocation38_spill] sm:$0xff] }
 0x316   : > { %v1972_v37 = vmul.f32 %v1680_v62, %v6622_v9  ;;  %v6625_v9 = vld [vmem:[#allocation37_spill] sm:$0xff] }
 0x317   : > { %3967 = vst [vmem:[%s5777_s10 + $0x8] sm:$0xff] %v3768_v2   ;;  %3990 = vst [vmem:[%s5777_s10 + $0x48] sm:$0xff] %v3888_v52   ;;  %v1875_v31 = vpop.permute.xlu1 %1874  ;;  %1789 = vrot.lane.b32.xlu0 %v6615_v54, %s4661_s2  ;;  %v6623_v52 = vld [vmem:[#allocation56_spill] sm:$0xff] }
 0x319   : > { %2191 = vrot.lane.b32.xlu1 %v6616_v40, %s4661_s2  ;;  %v1806_v16 = vpop.permute.xlu0 %1805 }
 0x31a   : > { %v1836_v39 = vsel %vm1831_vm0, %v5847_v51, %v1806_v16  ;;  %v1852_v34 = vsel %vm1831_vm0, %v1806_v16, %v5847_v51 }
 0x31b   : > { %v5895_v35 = vpop.permute.xlu1 %2147  ;;  %1888 = vrot.lane.b32.xlu0 %v6615_v54, %s4662_s20  ;;  %v2001_v42 = vmul.f32 %v1836_v39, %v1709_v5  ;;  %v2002_v38 = vmul.f32 %v1852_v34, %v1710_v29 }
 0x31d   : > { %2287 = vrot.lane.b32.xlu1 %v6616_v40, %s4662_s20  ;;  %v1905_v1 = vpop.permute.xlu0 %1904  ;;  %v2033_v13 = vadd.f32 %v2001_v42, %v1969_v27 }
 0x31e   : > { %v1933_v11 = vsel %vm1928_vm1, %v1873_v10, %v1905_v1  ;;  %v1949_v51 = vsel %vm1928_vm1, %v1905_v1, %v1873_v10 }
 0x31f   : > { %v5901_v44 = vpop.permute.xlu1 %2243  ;;  %2161 = vrot.lane.b32.xlu0 %v6617_v63, %s4661_s2  ;;  %v2065_v55 = vmul.f32 %v1949_v51, %v1741_v26  ;;  %v2066_v56 = vmul.f32 %v1933_v11, %v1742_v50 }
 0x321   : > { %1791 = vrot.lane.b32.xlu1 %v6618_v58, %s4661_s2  ;;  %v2178_v36 = vpop.permute.xlu0 %2177 }
 0x322   : > { %v2205_v16 = vsel %vm1831_vm0, %v5881_v3, %v2178_v36  ;;  %v2221_v1 = vsel %vm1831_vm0, %v2178_v36, %v5881_v3 }
 0x323   : > { %v1808_v8 = vpop.permute.xlu1 %1807  ;;  %2257 = vrot.lane.b32.xlu0 %v6617_v63, %s4662_s20  ;;  %v2369_v27 = vmul.f32 %v2205_v16, %v1709_v5  ;;  %v2370_v59 = vmul.f32 %v2221_v1, %v1710_v29 }
 0x324   : > { %v1837_v21 = vsel %vm1831_vm0, %v1776_v45, %v1808_v8  ;;  %v1853_v61 = vsel %vm1831_vm0, %v1808_v8, %v1776_v45  ;;  %v2034_v45 = vadd.f32 %v2002_v38, %v1970_v4  ;;  %v6624_v8 = vld [vmem:[#allocation61_spill] sm:$0xff] }
 0x325   : > { %v2003_v60 = vmul.f32 %v1837_v21, %v1711_v46  ;;  %v2004_v0 = vmul.f32 %v1853_v61, %v1712_v48  ;;  %1890 = vrot.lane.b32.xlu1 %v6618_v58, %s4662_s20  ;;  %v2274_v10 = vpop.permute.xlu0 %2273  ;;  %v2097_v61 = vadd.f32 %v2065_v55, %v2033_v13  ;;  %v6627_v13 = vld [vmem:[#allocation40_spill] sm:$0xff] }
 0x326   : > { %v2098_v43 = vadd.f32 %v2066_v56, %v2034_v45  ;;  %v2339_v45 = vmul.f32 %v1679_v19, %v6627_v13  ;;  %v1715_v13 = vld [vmem:[%s5687_s18 + $0x70] sm:$0xff] }
 0x327   : > { %v1907_v2 = vpop.permute.xlu1 %1906  ;;  %1821 = vrot.lane.b32.xlu0 %v6623_v52, %s4661_s2  ;;  %v2035_v42 = vadd.f32 %v2003_v60, %v1971_v17  ;;  %v2036_v38 = vadd.f32 %v2004_v0, %v1972_v37  ;;  %v2317_v60 = vsel %vm1928_vm1, %v2274_v10, %v5887_v49  ;;  %v2337_v37 = vmul.f32 %v1677_v33, %v6625_v9  ;;  %v1681_v9 = vld [vmem:[%s5091_s25 + $0x60] sm:$0xff] }
 0x328   : > { %v1934_v39 = vsel %vm1928_vm1, %v1875_v31, %v1907_v2  ;;  %v1950_v34 = vsel %vm1928_vm1, %v1907_v2, %v1875_v31  ;;  %v2301_v31 = vsel %vm1928_vm1, %v5887_v49, %v2274_v10  ;;  %v6626_v49 = vld [vmem:[#allocation39_spill] sm:$0xff]  ;;  %v6628_v2 = vld [vmem:[#allocation41_spill] sm:$0xff]  ;;  %v2433_v1 = vmul.f32 %v2317_v60, %v1741_v26 }
 0x329   : > { %v2067_v11 = vmul.f32 %v1950_v34, %v1743_v14  ;;  %v2068_v51 = vmul.f32 %v1934_v39, %v1744_v32  ;;  %2163 = vrot.lane.b32.xlu1 %v6624_v8, %s4661_s2  ;;  %v5955_v21 = vpop.permute.xlu0 %1777  ;;  %v2338_v10 = vmul.f32 %v1678_v53, %v6626_v49  ;;  %v2340_v16 = vmul.f32 %v1680_v62, %v6628_v2 }
 0x32a   : > { %v2434_v39 = vmul.f32 %v2301_v31, %v1742_v50 }
 0x32b   : > { %v2099_v3 = vadd.f32 %v2067_v11, %v2035_v42  ;;  %v2100_v36 = vadd.f32 %v2068_v51, %v2036_v38  ;;  %v2180_v4 = vpop.permute.xlu1 %2179  ;;  %1920 = vrot.lane.b32.xlu0 %v6623_v52, %s4662_s20  ;;  %v2402_v34 = vadd.f32 %v2370_v59, %v2338_v10  ;;  %v6630_v42 = vld [vmem:[#allocation59_spill] sm:$0xff] }
 0x32c   : > { %v2206_v5 = vsel %vm1831_vm0, %v5895_v35, %v2180_v4  ;;  %v2222_v29 = vsel %vm1831_vm0, %v2180_v4, %v5895_v35  ;;  %v1682_v10 = vld [vmem:[%s5091_s25 + $0x68] sm:$0xff] }
 0x32d   : > { %v3733_v0 = vpack.c.bf16 %v2099_v3, %v2097_v61  ;;  %v3853_v55 = vpack.c.bf16 %v2100_v36, %v2098_v43  ;;  %v2371_v56 = vmul.f32 %v2206_v5, %v1711_v46  ;;  %v2372_v41 = vmul.f32 %v2222_v29, %v1712_v48  ;;  %2259 = vrot.lane.b32.xlu1 %v6624_v8, %s4662_s20  ;;  %v1877_v17 = vpop.permute.xlu0 %1876  ;;  %v6629_v46 = vld [vmem:[#allocation60_spill] sm:$0xff]  ;;  %v6631_v3 = vld [vmem:[#allocation63_spill] sm:$0xff]  ;;  %v6632_v36 = vld [vmem:[#allocation62_spill] sm:$0xff] }
 0x32e   : > { %v2401_v48 = vadd.f32 %v2369_v27, %v2337_v37  ;;  %v2466_v51 = vadd.f32 %v2434_v39, %v2402_v34  ;;  %v6633_v29 = vld [vmem:[#allocation66_spill] sm:$0xff]  ;;  %v6634_v37 = vld [vmem:[#allocation65_spill] sm:$0xff]  ;;  %v1746_v39 = vld [vmem:[%s5709_s22 + $0x68] sm:$0xff] }
 0x32f   : > { %3961 = vst [vmem:[%s5758_s0 + $0x10] sm:$0xff] %v3733_v0   ;;  %3983 = vst [vmem:[%s5758_s0 + $0x50] sm:$0xff] %v3853_v55   ;;  %v2276_v35 = vpop.permute.xlu1 %2275  ;;  %2193 = vrot.lane.b32.xlu0 %v6629_v46, %s4661_s2  ;;  %v2403_v19 = vadd.f32 %v2371_v56, %v2339_v45  ;;  %v2404_v26 = vadd.f32 %v2372_v41, %v2340_v16  ;;  %v1713_v0 = vld [vmem:[%s5687_s18 + $0x60] sm:$0xff] }
 0x330   : > { %v2302_v33 = vsel %vm1928_vm1, %v5901_v44, %v2276_v35  ;;  %v2318_v53 = vsel %vm1928_vm1, %v2276_v35, %v5901_v44  ;;  %v2465_v11 = vadd.f32 %v2433_v1, %v2401_v48  ;;  %v1714_v55 = vld [vmem:[%s5687_s18 + $0x68] sm:$0xff]  ;;  %v1716_v45 = vld [vmem:[%s5687_s18 + $0x78] sm:$0xff]  ;;  %v1745_v1 = vld [vmem:[%s5709_s22 + $0x60] sm:$0xff] }
 0x331   : > { %v2435_v50 = vmul.f32 %v2318_v53, %v1743_v14  ;;  %v2436_v62 = vmul.f32 %v2302_v33, %v1744_v32  ;;  %1823 = vrot.lane.b32.xlu1 %v6630_v42, %s4661_s2  ;;  %v5989_v38 = vpop.permute.xlu0 %2149  ;;  %v1683_v34 = vld [vmem:[%s5091_s25 + $0x70] sm:$0xff]  ;;  %v1684_v33 = vld [vmem:[%s5091_s25 + $0x78] sm:$0xff] }
 0x333   : > { %v2467_v61 = vadd.f32 %v2435_v50, %v2403_v19  ;;  %v2468_v43 = vadd.f32 %v2436_v62, %v2404_v26  ;;  %v1780_v27 = vpop.permute.xlu1 %1779  ;;  %2289 = vrot.lane.b32.xlu0 %v6629_v46, %s4662_s20  ;;  %v6635_v26 = vld [vmem:[#allocation42_spill] sm:$0xff]  ;;  %v6636_v62 = vld [vmem:[#allocation43_spill] sm:$0xff] }
 0x334   : > { %v1973_v50 = vmul.f32 %v1681_v9, %v6635_v26  ;;  %v6639_v26 = vld [vmem:[#allocation64_spill] sm:$0xff] }
 0x335   : > { %v3773_v44 = vpack.c.bf16 %v2467_v61, %v2465_v11  ;;  %v3893_v59 = vpack.c.bf16 %v2468_v43, %v2466_v51  ;;  %1922 = vrot.lane.b32.xlu1 %v6630_v42, %s4662_s20  ;;  %v5995_v14 = vpop.permute.xlu0 %2245  ;;  %v1974_v11 = vmul.f32 %v1682_v10, %v6636_v62 }
 0x337   : > { %3968 = vst [vmem:[%s5777_s10 + $0x10] sm:$0xff] %v3773_v44   ;;  %3991 = vst [vmem:[%s5777_s10 + $0x50] sm:$0xff] %v3893_v59   ;;  %v1879_v32 = vpop.permute.xlu1 %1878  ;;  %1793 = vrot.lane.b32.xlu0 %v6631_v3, %s4661_s2  ;;  %v1747_v59 = vld [vmem:[%s5709_s22 + $0x70] sm:$0xff] }
 0x339   : > { %2195 = vrot.lane.b32.xlu1 %v6632_v36, %s4661_s2  ;;  %v1810_v4 = vpop.permute.xlu0 %1809 }
 0x33a   : > { %v1838_v56 = vsel %vm1831_vm0, %v5955_v21, %v1810_v4  ;;  %v1854_v41 = vsel %vm1831_vm0, %v1810_v4, %v5955_v21  ;;  %v1748_v4 = vld [vmem:[%s5709_s22 + $0x78] sm:$0xff] }
 0x33b   : > { %v6003_v31 = vpop.permute.xlu1 %2151  ;;  %1892 = vrot.lane.b32.xlu0 %v6631_v3, %s4662_s20  ;;  %v2005_v2 = vmul.f32 %v1838_v56, %v1713_v0  ;;  %v2006_v16 = vmul.f32 %v1854_v41, %v1714_v55  ;;  %v6638_v41 = vld [vmem:[#allocation46_spill] sm:$0xff] }
 0x33d   : > { %2291 = vrot.lane.b32.xlu1 %v6632_v36, %s4662_s20  ;;  %v1909_v60 = vpop.permute.xlu0 %1908  ;;  %v2037_v3 = vadd.f32 %v2005_v2, %v1973_v50 }
 0x33e   : > { %v1935_v35 = vsel %vm1928_vm1, %v1877_v17, %v1909_v60  ;;  %v1951_v21 = vsel %vm1928_vm1, %v1909_v60, %v1877_v17  ;;  %v6637_v60 = vld [vmem:[#allocation44_spill] sm:$0xff] }
 0x33f   : > { %v6009_v5 = vpop.permute.xlu1 %2247  ;;  %2165 = vrot.lane.b32.xlu0 %v6633_v29, %s4661_s2  ;;  %v2069_v43 = vmul.f32 %v1951_v21, %v1745_v1  ;;  %v2070_v44 = vmul.f32 %v1935_v35, %v1746_v39  ;;  %v1975_v56 = vmul.f32 %v1683_v34, %v6637_v60 }
 0x341   : > { %1795 = vrot.lane.b32.xlu1 %v6634_v37, %s4661_s2  ;;  %v2182_v49 = vpop.permute.xlu0 %2181 }
 0x342   : > { %v2223_v35 = vsel %vm1831_vm0, %v2182_v49, %v5989_v38 }
 0x343   : > { %v1812_v48 = vpop.permute.xlu1 %1811  ;;  %2261 = vrot.lane.b32.xlu0 %v6633_v29, %s4662_s20  ;;  %v1976_v29 = vmul.f32 %v1684_v33, %v6638_v41  ;;  %v2101_v41 = vadd.f32 %v2069_v43, %v2037_v3  ;;  %v2374_v8 = vmul.f32 %v2223_v35, %v1714_v55  ;;  %v6644_v35 = vld [vmem:[#allocation49_spill] sm:$0xff] }
 0x344   : > { %v1839_v53 = vsel %vm1831_vm0, %v1780_v27, %v1812_v48  ;;  %v1855_v19 = vsel %vm1831_vm0, %v1812_v48, %v1780_v27  ;;  %v2038_v27 = vadd.f32 %v2006_v16, %v1974_v11  ;;  %v6640_v11 = vld [vmem:[#allocation69_spill] sm:$0xff] }
 0x345   : > { %v2007_v51 = vmul.f32 %v1839_v53, %v1715_v13  ;;  %v2008_v61 = vmul.f32 %v1855_v19, %v1716_v45  ;;  %1894 = vrot.lane.b32.xlu1 %v6634_v37, %s4662_s20  ;;  %v2278_v17 = vpop.permute.xlu0 %2277  ;;  %v2207_v53 = vsel %vm1831_vm0, %v5989_v38, %v2182_v49 }
 0x346   : > { %v2102_v37 = vadd.f32 %v2070_v44, %v2038_v27  ;;  %v2373_v36 = vmul.f32 %v2207_v53, %v1713_v0 }
 0x347   : > { %v1911_v48 = vpop.permute.xlu1 %1910  ;;  %1825 = vrot.lane.b32.xlu0 %v6639_v26, %s4661_s2  ;;  %v2039_v2 = vadd.f32 %v2007_v51, %v1975_v56  ;;  %v2040_v16 = vadd.f32 %v2008_v61, %v1976_v29  ;;  %v2319_v29 = vsel %vm1928_vm1, %v2278_v17, %v5995_v14  ;;  %v6641_v56 = vld [vmem:[#allocation45_spill] sm:$0xff] }
 0x348   : > { %v1936_v21 = vsel %vm1928_vm1, %v1879_v32, %v1911_v48  ;;  %v1952_v19 = vsel %vm1928_vm1, %v1911_v48, %v1879_v32  ;;  %v2303_v32 = vsel %vm1928_vm1, %v5995_v14, %v2278_v17  ;;  %v2341_v27 = vmul.f32 %v1681_v9, %v6641_v56  ;;  %v6642_v14 = vld [vmem:[#allocation47_spill] sm:$0xff]  ;;  %v6643_v48 = vld [vmem:[#allocation48_spill] sm:$0xff]  ;;  %v1685_v56 = vld [vmem:[%s5091_s25 + $0x80] sm:$0xff] }
 0x349   : > { %v2071_v50 = vmul.f32 %v1952_v19, %v1747_v59  ;;  %v2072_v62 = vmul.f32 %v1936_v21, %v1748_v4  ;;  %2167 = vrot.lane.b32.xlu1 %v6640_v11, %s4661_s2  ;;  %v1782_v60 = vpop.permute.xlu0 %1781  ;;  %v2342_v17 = vmul.f32 %v1682_v10, %v6642_v14  ;;  %v2343_v53 = vmul.f32 %v1683_v34, %v6643_v48  ;;  %v1686_v14 = vld [vmem:[%s5091_s25 + $0x88] sm:$0xff]  ;;  %v1720_v48 = vld [vmem:[%s5687_s18 + $0x98] sm:$0xff] }
 0x34a   : > { %v2344_v21 = vmul.f32 %v1684_v33, %v6644_v35  ;;  %v2437_v19 = vmul.f32 %v2319_v29, %v1745_v1  ;;  %v6646_v33 = vld [vmem:[#allocation67_spill] sm:$0xff] }
 0x34b   : > { %v2103_v46 = vadd.f32 %v2071_v50, %v2039_v2  ;;  %v2104_v38 = vadd.f32 %v2072_v62, %v2040_v16  ;;  %v2184_v49 = vpop.permute.xlu1 %2183  ;;  %1924 = vrot.lane.b32.xlu0 %v6639_v26, %s4662_s20  ;;  %v2438_v2 = vmul.f32 %v2303_v32, %v1746_v39 }
 0x34c   : > { %v2208_v3 = vsel %vm1831_vm0, %v6003_v31, %v2184_v49  ;;  %v2224_v0 = vsel %vm1831_vm0, %v2184_v49, %v6003_v31  ;;  %v6645_v31 = vld [vmem:[#allocation68_spill] sm:$0xff]  ;;  %v6647_v49 = vld [vmem:[#allocation70_spill] sm:$0xff] }
 0x34d   : > { %v3738_v55 = vpack.c.bf16 %v2103_v46, %v2101_v41  ;;  %v3858_v51 = vpack.c.bf16 %v2104_v38, %v2102_v37  ;;  %v2375_v61 = vmul.f32 %v2208_v3, %v1715_v13  ;;  %v2376_v43 = vmul.f32 %v2224_v0, %v1716_v45  ;;  %2263 = vrot.lane.b32.xlu1 %v6640_v11, %s4662_s20  ;;  %v1881_v44 = vpop.permute.xlu0 %1880 }
 0x34e   : > { %v2405_v37 = vadd.f32 %v2373_v36, %v2341_v27  ;;  %v2406_v13 = vadd.f32 %v2374_v8, %v2342_v17  ;;  %v1719_v17 = vld [vmem:[%s5687_s18 + $0x90] sm:$0xff] }
 0x34f   : > { %3962 = vst [vmem:[%s5758_s0 + $0x18] sm:$0xff] %v3738_v55   ;;  %3984 = vst [vmem:[%s5758_s0 + $0x58] sm:$0xff] %v3858_v51   ;;  %v2280_v46 = vpop.permute.xlu1 %2279  ;;  %2197 = vrot.lane.b32.xlu0 %v6645_v31, %s4661_s2  ;;  %v2407_v45 = vadd.f32 %v2375_v61, %v2343_v53  ;;  %v2408_v1 = vadd.f32 %v2376_v43, %v2344_v21  ;;  %v1717_v55 = vld [vmem:[%s5687_s18 + $0x80] sm:$0xff] }
 0x350   : > { %v2304_v9 = vsel %vm1928_vm1, %v6009_v5, %v2280_v46  ;;  %v2320_v10 = vsel %vm1928_vm1, %v2280_v46, %v6009_v5  ;;  %v2469_v36 = vadd.f32 %v2437_v19, %v2405_v37  ;;  %v2470_v8 = vadd.f32 %v2438_v2, %v2406_v13  ;;  %v1718_v51 = vld [vmem:[%s5687_s18 + $0x88] sm:$0xff]  ;;  %v1749_v21 = vld [vmem:[%s5709_s22 + $0x80] sm:$0xff]  ;;  %v1687_v13 = vld [vmem:[%s5091_s25 + $0x90] sm:$0xff] }
 0x351   : > { %v2439_v39 = vmul.f32 %v2320_v10, %v1747_v59  ;;  %v2440_v34 = vmul.f32 %v2304_v9, %v1748_v4  ;;  %1827 = vrot.lane.b32.xlu1 %v6646_v33, %s4661_s2  ;;  %v2154_v16 = vpop.permute.xlu0 %2153  ;;  %v1750_v19 = vld [vmem:[%s5709_s22 + $0x88] sm:$0xff] }
 0x353   : > { %v2471_v50 = vadd.f32 %v2439_v39, %v2407_v45  ;;  %v2472_v62 = vadd.f32 %v2440_v34, %v2408_v1  ;;  %v1784_v41 = vpop.permute.xlu1 %1783  ;;  %2293 = vrot.lane.b32.xlu0 %v6645_v31, %s4662_s20  ;;  %v6648_v45 = vld [vmem:[#allocation50_spill] sm:$0xff]  ;;  %v1978_v39 = vmul.f32 %v1686_v14, %v5494_v6 }
 0x354   : > { %v1977_v1 = vmul.f32 %v1685_v56, %v6648_v45 }
 0x355   : > { %v3778_v5 = vpack.c.bf16 %v2471_v50, %v2469_v36  ;;  %v3898_v38 = vpack.c.bf16 %v2472_v62, %v2470_v8  ;;  %1926 = vrot.lane.b32.xlu1 %v6646_v33, %s4662_s20  ;;  %v2250_v59 = vpop.permute.xlu0 %2249 }
 0x357   : > { %3969 = vst [vmem:[%s5777_s10 + $0x18] sm:$0xff] %v3778_v5   ;;  %3992 = vst [vmem:[%s5777_s10 + $0x58] sm:$0xff] %v3898_v38   ;;  %v1883_v4 = vpop.permute.xlu1 %1882  ;;  %v1751_v5 = vld [vmem:[%s5709_s22 + $0x90] sm:$0xff]  ;;  %v1979_v38 = vmul.f32 %v1687_v13, %v5496_v15 }
 0x359   : > { %2199 = vrot.lane.b32.xlu1 %v6647_v49, %s4661_s2  ;;  %v1814_v32 = vpop.permute.xlu0 %1813 }
 0x35a   : > { %v1840_v61 = vsel %vm1831_vm0, %v1782_v60, %v1814_v32  ;;  %v1856_v43 = vsel %vm1831_vm0, %v1814_v32, %v1782_v60  ;;  %v1688_v60 = vld [vmem:[%s5091_s25 + $0x98] sm:$0xff] }
 0x35b   : > { %v2156_v29 = vpop.permute.xlu1 %2155  ;;  %v2009_v53 = vmul.f32 %v1840_v61, %v1717_v55  ;;  %v2010_v35 = vmul.f32 %v1856_v43, %v1718_v51  ;;  %v1980_v32 = vmul.f32 %v1688_v60, %v5502_v12 }
 0x35d   : > { %2295 = vrot.lane.b32.xlu1 %v6647_v49, %s4662_s20  ;;  %v1913_v3 = vpop.permute.xlu0 %1912  ;;  %v2042_v61 = vadd.f32 %v2010_v35, %v1978_v39 }
 0x35e   : > { %v1937_v2 = vsel %vm1928_vm1, %v1881_v44, %v1913_v3  ;;  %v1953_v46 = vsel %vm1928_vm1, %v1913_v3, %v1881_v44  ;;  %v1752_v44 = vld [vmem:[%s5709_s22 + $0x98] sm:$0xff]  ;;  %v2041_v3 = vadd.f32 %v2009_v53, %v1977_v1 }
 0x35f   : > { %v6105_v0 = vpop.permute.xlu1 %2251  ;;  %v2073_v50 = vmul.f32 %v1953_v46, %v1749_v21  ;;  %v2074_v62 = vmul.f32 %v1937_v2, %v1750_v19 }
 0x361   : > { %v2186_v27 = vpop.permute.xlu0 %2185  ;;  %v2105_v53 = vadd.f32 %v2073_v50, %v2041_v3  ;;  %v2106_v35 = vadd.f32 %v2074_v62, %v2042_v61  ;;  %v2346_v3 = vmul.f32 %v1686_v14, %v5504_v20  ;;  %v2347_v61 = vmul.f32 %v1687_v13, %v5506_v22 }
 0x362   : > { %v2225_v6 = vsel %vm1831_vm0, %v2186_v27, %v2154_v16 }
 0x363   : > { %v1816_v37 = vpop.permute.xlu1 %1815  ;;  %v2378_v1 = vmul.f32 %v2225_v6, %v1718_v51 }
 0x364   : > { %v1841_v9 = vsel %vm1831_vm0, %v1784_v41, %v1816_v37  ;;  %v1857_v10 = vsel %vm1831_vm0, %v1816_v37, %v1784_v41  ;;  %v2209_v41 = vsel %vm1831_vm0, %v2154_v16, %v2186_v27 }
 0x365   : > { %v2011_v34 = vmul.f32 %v1841_v9, %v1719_v17  ;;  %v2012_v36 = vmul.f32 %v1857_v10, %v1720_v48  ;;  %v2282_v8 = vpop.permute.xlu0 %2281  ;;  %v2377_v45 = vmul.f32 %v2209_v41, %v1717_v55 }
 0x366   : > { %v2305_v16 = vsel %vm1928_vm1, %v2250_v59, %v2282_v8 }
 0x367   : > { %v1915_v43 = vpop.permute.xlu1 %1914  ;;  %v2043_v46 = vadd.f32 %v2011_v34, %v1979_v38  ;;  %v2044_v9 = vadd.f32 %v2012_v36, %v1980_v32  ;;  %v6649_v38 = vld [vmem:[#allocation51_spill] sm:$0xff] }
 0x368   : > { %v1938_v37 = vsel %vm1928_vm1, %v1883_v4, %v1915_v43  ;;  %v1954_v2 = vsel %vm1928_vm1, %v1915_v43, %v1883_v4  ;;  %v2321_v4 = vsel %vm1928_vm1, %v2282_v8, %v2250_v59  ;;  %v2345_v32 = vmul.f32 %v1685_v56, %v6649_v38 }
 0x369   : > { %v2075_v15 = vmul.f32 %v1954_v2, %v1751_v5  ;;  %v2076_v10 = vmul.f32 %v1938_v37, %v1752_v44  ;;  %v1786_v12 = vpop.permute.xlu0 %1785  ;;  %v2348_v43 = vmul.f32 %v1688_v60, %v5510_v24  ;;  %v2441_v59 = vmul.f32 %v2321_v4, %v1749_v21  ;;  %v1724_v4 = vld [vmem:[%s5687_s18 + $0xb8] sm:$0xff] }
 0x36a   : > { %v2442_v8 = vmul.f32 %v2305_v16, %v1750_v19  ;;  %v2409_v6 = vadd.f32 %v2377_v45, %v2345_v32  ;;  %v1689_v45 = vld [vmem:[%s5091_s25 + $0xa0] sm:$0xff]  ;;  %v1723_v16 = vld [vmem:[%s5687_s18 + $0xb0] sm:$0xff] }
 0x36b   : > { %v2107_v39 = vadd.f32 %v2075_v15, %v2043_v46  ;;  %v2108_v49 = vadd.f32 %v2076_v10, %v2044_v9  ;;  %v2188_v11 = vpop.permute.xlu1 %2187  ;;  %v1721_v15 = vld [vmem:[%s5687_s18 + $0xa0] sm:$0xff]  ;;  %v1722_v10 = vld [vmem:[%s5687_s18 + $0xa8] sm:$0xff]  ;;  %v1691_v32 = vld [vmem:[%s5091_s25 + $0xb0] sm:$0xff] }
 0x36c   : > { %v2210_v27 = vsel %vm1831_vm0, %v2156_v29, %v2188_v11  ;;  %v2226_v34 = vsel %vm1831_vm0, %v2188_v11, %v2156_v29  ;;  %v2410_v11 = vadd.f32 %v2378_v1, %v2346_v3 }
 0x36d   : > { %v3743_v36 = vpack.c.bf16 %v2107_v39, %v2105_v53  ;;  %v3863_v55 = vpack.c.bf16 %v2108_v49, %v2106_v35  ;;  %v2379_v51 = vmul.f32 %v2210_v27, %v1719_v17  ;;  %v2380_v50 = vmul.f32 %v2226_v34, %v1720_v48  ;;  %v1885_v62 = vpop.permute.xlu0 %1884  ;;  %v1690_v39 = vld [vmem:[%s5091_s25 + $0xa8] sm:$0xff] }
 0x36e   : > { %v2473_v17 = vadd.f32 %v2441_v59, %v2409_v6  ;;  %v2474_v48 = vadd.f32 %v2442_v8, %v2410_v11  ;;  %v1982_v59 = vmul.f32 %v1690_v39, %v5518_v30 }
 0x36f   : > { %3963 = vst [vmem:[%s5758_s0 + $0x20] sm:$0xff] %v3743_v36   ;;  %3985 = vst [vmem:[%s5758_s0 + $0x60] sm:$0xff] %v3863_v55   ;;  %v2284_v41 = vpop.permute.xlu1 %2283  ;;  %v2411_v22 = vadd.f32 %v2379_v51, %v2347_v61  ;;  %v2412_v29 = vadd.f32 %v2380_v50, %v2348_v43  ;;  %v1753_v36 = vld [vmem:[%s5709_s22 + $0xa0] sm:$0xff]  ;;  %v1754_v55 = vld [vmem:[%s5709_s22 + $0xa8] sm:$0xff]  ;;  %v1981_v43 = vmul.f32 %v1689_v45, %v5514_v28 }
 0x370   : > { %v2306_v49 = vsel %vm1928_vm1, %v6105_v0, %v2284_v41  ;;  %v2322_v20 = vsel %vm1928_vm1, %v2284_v41, %v6105_v0 }
 0x371   : > { %v2443_v24 = vmul.f32 %v2322_v20, %v1751_v5  ;;  %v2444_v56 = vmul.f32 %v2306_v49, %v1752_v44  ;;  %v2158_v14 = vpop.permute.xlu0 %2157  ;;  %v1755_v20 = vld [vmem:[%s5709_s22 + $0xb0] sm:$0xff] }
 0x373   : > { %v2475_v21 = vadd.f32 %v2443_v24, %v2411_v22  ;;  %v2476_v19 = vadd.f32 %v2444_v56, %v2412_v29  ;;  %v1788_v13 = vpop.permute.xlu1 %1787  ;;  %v1983_v22 = vmul.f32 %v1691_v32, %v5520_v23 }
 0x375   : > { %v3783_v60 = vpack.c.bf16 %v2475_v21, %v2473_v17  ;;  %v3903_v37 = vpack.c.bf16 %v2476_v19, %v2474_v48  ;;  %v2254_v2 = vpop.permute.xlu0 %2253 }
 0x377   : > { %3970 = vst [vmem:[%s5777_s10 + $0x20] sm:$0xff] %v3783_v60   ;;  %3993 = vst [vmem:[%s5777_s10 + $0x60] sm:$0xff] %v3903_v37   ;;  %v1887_v0 = vpop.permute.xlu1 %1886 }
 0x379   : > { %v1818_v5 = vpop.permute.xlu0 %1817 }
 0x37a   : > { %v1842_v53 = vsel %vm1831_vm0, %v1786_v12, %v1818_v5  ;;  %v1858_v35 = vsel %vm1831_vm0, %v1818_v5, %v1786_v12  ;;  %v1692_v12 = vld [vmem:[%s5091_s25 + $0xb8] sm:$0xff] }
 0x37b   : > { %v2160_v44 = vpop.permute.xlu1 %2159  ;;  %v2013_v27 = vmul.f32 %v1842_v53, %v1721_v15  ;;  %v2014_v34 = vmul.f32 %v1858_v35, %v1722_v10  ;;  %v1984_v29 = vmul.f32 %v1692_v12, %v6614_v7 }
 0x37d   : > { %v1917_v46 = vpop.permute.xlu0 %1916  ;;  %v2045_v24 = vadd.f32 %v2013_v27, %v1981_v43  ;;  %v2046_v56 = vadd.f32 %v2014_v34, %v1982_v59  ;;  %v2350_v43 = vmul.f32 %v1690_v39, %v6613_v57  ;;  %v2351_v59 = vmul.f32 %v1691_v32, %v5530_v25 }
 0x37e   : > { %v1939_v51 = vsel %vm1928_vm1, %v1885_v62, %v1917_v46  ;;  %v1955_v50 = vsel %vm1928_vm1, %v1917_v46, %v1885_v62  ;;  %v1756_v62 = vld [vmem:[%s5709_s22 + $0xb8] sm:$0xff] }
 0x37f   : > { %v6165_v9 = vpop.permute.xlu1 %2255  ;;  %v2077_v11 = vmul.f32 %v1955_v50, %v1753_v36  ;;  %v2078_v49 = vmul.f32 %v1939_v51, %v1754_v55 }
 0x381   : > { %v2190_v1 = vpop.permute.xlu0 %2189  ;;  %v2109_v37 = vadd.f32 %v2077_v11, %v2045_v24  ;;  %v2110_v5 = vadd.f32 %v2078_v49, %v2046_v56 }
 0x382   : > { %v2211_v48 = vsel %vm1831_vm0, %v2158_v14, %v2190_v1  ;;  %v2227_v28 = vsel %vm1831_vm0, %v2190_v1, %v2158_v14 }
 0x383   : > { %v1820_v38 = vpop.permute.xlu1 %1819  ;;  %v2381_v46 = vmul.f32 %v2211_v48, %v1721_v15  ;;  %v2382_v53 = vmul.f32 %v2227_v28, %v1722_v10  ;;  %v1726_v48 = vld [vmem:[%s5687_s18 + $0xc8] sm:$0xff] }
 0x384   : > { %v1843_v3 = vsel %vm1831_vm0, %v1788_v13, %v1820_v38  ;;  %v1859_v61 = vsel %vm1831_vm0, %v1820_v38, %v1788_v13 }
 0x385   : > { %v2015_v8 = vmul.f32 %v1843_v3, %v1723_v16  ;;  %v2016_v41 = vmul.f32 %v1859_v61, %v1724_v4  ;;  %v2286_v6 = vpop.permute.xlu0 %2285  ;;  %v2349_v61 = vmul.f32 %v1689_v45, %v5522_v18 }
 0x386   : > { %v2307_v14 = vsel %vm1928_vm1, %v2254_v2, %v2286_v6 }
 0x387   : > { %v1919_v17 = vpop.permute.xlu1 %1918  ;;  %v2047_v19 = vadd.f32 %v2015_v8, %v1983_v22  ;;  %v2048_v13 = vadd.f32 %v2016_v41, %v1984_v29  ;;  %v2352_v8 = vmul.f32 %v1692_v12, %v6616_v40  ;;  %v2446_v41 = vmul.f32 %v2307_v14, %v1754_v55  ;;  %v1695_v14 = vld [vmem:[%s5091_s25 + $0xd0] sm:$0xff] }
 0x388   : > { %v1940_v30 = vsel %vm1928_vm1, %v1887_v0, %v1919_v17  ;;  %v1956_v21 = vsel %vm1928_vm1, %v1919_v17, %v1887_v0  ;;  %v2323_v0 = vsel %vm1928_vm1, %v2286_v6, %v2254_v2  ;;  %v2413_v11 = vadd.f32 %v2381_v46, %v2349_v61  ;;  %v1725_v17 = vld [vmem:[%s5687_s18 + $0xc0] sm:$0xff] }
 0x389   : > { %v2079_v23 = vmul.f32 %v1956_v21, %v1755_v20  ;;  %v2080_v60 = vmul.f32 %v1940_v30, %v1756_v62  ;;  %v1790_v7 = vpop.permute.xlu0 %1789  ;;  %v2445_v2 = vmul.f32 %v2323_v0, %v1753_v36  ;;  %v1693_v21 = vld [vmem:[%s5091_s25 + $0xc0] sm:$0xff] }
 0x38a   : > { %v1757_v46 = vld [vmem:[%s5709_s22 + $0xc0] sm:$0xff] }
 0x38b   : > { %v2111_v35 = vadd.f32 %v2079_v23, %v2047_v19  ;;  %v2112_v27 = vadd.f32 %v2080_v60, %v2048_v13  ;;  %v2192_v34 = vpop.permute.xlu1 %2191  ;;  %v1694_v13 = vld [vmem:[%s5091_s25 + $0xc8] sm:$0xff]  ;;  %v1727_v23 = vld [vmem:[%s5687_s18 + $0xd0] sm:$0xff]  ;;  %v1728_v60 = vld [vmem:[%s5687_s18 + $0xd8] sm:$0xff] }
 0x38c   : > { %v2212_v1 = vsel %vm1831_vm0, %v2160_v44, %v2192_v34  ;;  %v2228_v51 = vsel %vm1831_vm0, %v2192_v34, %v2160_v44  ;;  %v2414_v44 = vadd.f32 %v2382_v53, %v2350_v43  ;;  %v1758_v53 = vld [vmem:[%s5709_s22 + $0xc8] sm:$0xff] }
 0x38d   : > { %v3748_v50 = vpack.c.bf16 %v2111_v35, %v2109_v37  ;;  %v3868_v15 = vpack.c.bf16 %v2112_v27, %v2110_v5  ;;  %v2383_v10 = vmul.f32 %v2212_v1, %v1723_v16  ;;  %v2384_v38 = vmul.f32 %v2228_v51, %v1724_v4  ;;  %v1889_v3 = vpop.permute.xlu0 %1888 }
 0x38e   : > { %v2477_v4 = vadd.f32 %v2445_v2, %v2413_v11  ;;  %v2478_v36 = vadd.f32 %v2446_v41, %v2414_v44  ;;  %v1985_v51 = vmul.f32 %v1693_v21, %v6615_v54 }
 0x38f   : > { %3964 = vst [vmem:[%s5758_s0 + $0x28] sm:$0xff] %v3748_v50   ;;  %3986 = vst [vmem:[%s5758_s0 + $0x68] sm:$0xff] %v3868_v15   ;;  %v2288_v6 = vpop.permute.xlu1 %2287  ;;  %v2415_v25 = vadd.f32 %v2383_v10, %v2351_v59  ;;  %v2416_v57 = vadd.f32 %v2384_v38, %v2352_v8  ;;  %v1986_v50 = vmul.f32 %v1694_v13, %v6623_v52  ;;  %v1759_v59 = vld [vmem:[%s5709_s22 + $0xd0] sm:$0xff] }
 0x390   : > { %v2308_v16 = vsel %vm1928_vm1, %v6165_v9, %v2288_v6  ;;  %v2324_v18 = vsel %vm1928_vm1, %v2288_v6, %v6165_v9  ;;  %v1987_v8 = vmul.f32 %v1695_v14, %v6618_v58 }
 0x391   : > { %v2447_v40 = vmul.f32 %v2324_v18, %v1755_v20  ;;  %v2448_v45 = vmul.f32 %v2308_v16, %v1756_v62  ;;  %v2162_v39 = vpop.permute.xlu0 %2161 }
 0x393   : > { %v2479_v55 = vadd.f32 %v2447_v40, %v2415_v25  ;;  %v2480_v32 = vadd.f32 %v2448_v45, %v2416_v57  ;;  %v1792_v12 = vpop.permute.xlu1 %1791 }
 0x395   : > { %v3788_v49 = vpack.c.bf16 %v2479_v55, %v2477_v4  ;;  %v3908_v22 = vpack.c.bf16 %v2480_v32, %v2478_v36  ;;  %v2258_v29 = vpop.permute.xlu0 %2257 }
 0x397   : > { %3971 = vst [vmem:[%s5777_s10 + $0x28] sm:$0xff] %v3788_v49   ;;  %3994 = vst [vmem:[%s5777_s10 + $0x68] sm:$0xff] %v3908_v22   ;;  %v1891_v9 = vpop.permute.xlu1 %1890 }
 0x399   : > { %v1822_v20 = vpop.permute.xlu0 %1821 }
 0x39a   : > { %v1844_v28 = vsel %vm1831_vm0, %v1790_v7, %v1822_v20  ;;  %v1860_v30 = vsel %vm1831_vm0, %v1822_v20, %v1790_v7  ;;  %v1696_v7 = vld [vmem:[%s5091_s25 + $0xd8] sm:$0xff] }
 0x39b   : > { %v2164_v62 = vpop.permute.xlu1 %2163  ;;  %v2017_v37 = vmul.f32 %v1844_v28, %v1725_v17  ;;  %v2018_v5 = vmul.f32 %v1860_v30, %v1726_v48  ;;  %v1988_v2 = vmul.f32 %v1696_v7, %v6630_v42  ;;  %v2353_v30 = vmul.f32 %v1693_v21, %v6617_v63 }
 0x39d   : > { %v1921_v24 = vpop.permute.xlu0 %1920  ;;  %v2049_v41 = vadd.f32 %v2017_v37, %v1985_v51  ;;  %v2050_v6 = vadd.f32 %v2018_v5, %v1986_v50  ;;  %v6651_v5 = vld [vmem:[#allocation61_spill] sm:$0xff] }
 0x39e   : > { %v1941_v35 = vsel %vm1928_vm1, %v1889_v3, %v1921_v24  ;;  %v1957_v27 = vsel %vm1928_vm1, %v1921_v24, %v1889_v3  ;;  %v1760_v3 = vld [vmem:[%s5709_s22 + $0xd8] sm:$0xff] }
 0x39f   : > { %v6225_v56 = vpop.permute.xlu1 %2259  ;;  %v2081_v61 = vmul.f32 %v1957_v27, %v1757_v46  ;;  %v2082_v43 = vmul.f32 %v1941_v35, %v1758_v53  ;;  %v2355_v35 = vmul.f32 %v1695_v14, %v6651_v5  ;;  %v6652_v27 = vld [vmem:[#allocation62_spill] sm:$0xff] }
 0x3a1   : > { %v2194_v19 = vpop.permute.xlu0 %2193  ;;  %v2113_v40 = vadd.f32 %v2081_v61, %v2049_v41  ;;  %v2114_v45 = vadd.f32 %v2082_v43, %v2050_v6  ;;  %v1729_v41 = vld [vmem:[%s5687_s18 + $0xe0] sm:$0xff]  ;;  %v1730_v6 = vld [vmem:[%s5687_s18 + $0xe8] sm:$0xff] }
 0x3a2   : > { %v2213_v44 = vsel %vm1831_vm0, %v2162_v39, %v2194_v19  ;;  %v2229_v54 = vsel %vm1831_vm0, %v2194_v19, %v2162_v39  ;;  %v6650_v19 = vld [vmem:[#allocation60_spill] sm:$0xff] }
 0x3a3   : > { %v1824_v34 = vpop.permute.xlu1 %1823  ;;  %v2385_v4 = vmul.f32 %v2213_v44, %v1725_v17  ;;  %v2386_v36 = vmul.f32 %v2229_v54, %v1726_v48  ;;  %v2354_v37 = vmul.f32 %v1694_v13, %v6650_v19  ;;  %v1697_v54 = vld [vmem:[%s5091_s25 + $0xe0] sm:$0xff]  ;;  %v6654_v19 = vld [vmem:[#allocation65_spill] sm:$0xff] }
 0x3a4   : > { %v1845_v0 = vsel %vm1831_vm0, %v1792_v12, %v1824_v34  ;;  %v1861_v1 = vsel %vm1831_vm0, %v1824_v34, %v1792_v12  ;;  %v2356_v34 = vmul.f32 %v1696_v7, %v6652_v27 }
 0x3a5   : > { %v2019_v15 = vmul.f32 %v1845_v0, %v1727_v23  ;;  %v2020_v10 = vmul.f32 %v1861_v1, %v1728_v60  ;;  %v2290_v38 = vpop.permute.xlu0 %2289  ;;  %v2417_v51 = vadd.f32 %v2385_v4, %v2353_v30  ;;  %v1763_v30 = vld [vmem:[%s5709_s22 + $0xf0] sm:$0xff] }
 0x3a6   : > { %v2309_v39 = vsel %vm1928_vm1, %v2258_v29, %v2290_v38  ;;  %v2325_v49 = vsel %vm1928_vm1, %v2290_v38, %v2258_v29 }
 0x3a7   : > { %v1923_v11 = vpop.permute.xlu1 %1922  ;;  %v2051_v18 = vadd.f32 %v2019_v15, %v1987_v8  ;;  %v2052_v25 = vadd.f32 %v2020_v10, %v1988_v2  ;;  %v2449_v29 = vmul.f32 %v2325_v49, %v1757_v46  ;;  %v2450_v0 = vmul.f32 %v2309_v39, %v1758_v53  ;;  %v6653_v49 = vld [vmem:[#allocation63_spill] sm:$0xff] }
 0x3a8   : > { %v1942_v52 = vsel %vm1928_vm1, %v1891_v9, %v1923_v11  ;;  %v1958_v16 = vsel %vm1928_vm1, %v1923_v11, %v1891_v9 }
 0x3a9   : > { %v2083_v58 = vmul.f32 %v1958_v16, %v1759_v59  ;;  %v2084_v57 = vmul.f32 %v1942_v52, %v1760_v3  ;;  %v1794_v42 = vpop.permute.xlu0 %1793  ;;  %v2481_v14 = vadd.f32 %v2449_v29, %v2417_v51  ;;  %v1698_v52 = vld [vmem:[%s5091_s25 + $0xe8] sm:$0xff]  ;;  %v1731_v16 = vld [vmem:[%s5687_s18 + $0xf0] sm:$0xff] }
 0x3ab   : > { %v2115_v55 = vadd.f32 %v2083_v58, %v2051_v18  ;;  %v2116_v32 = vadd.f32 %v2084_v57, %v2052_v25  ;;  %v2196_v12 = vpop.permute.xlu1 %2195  ;;  %v1732_v18 = vld [vmem:[%s5687_s18 + $0xf8] sm:$0xff]  ;;  %v1761_v57 = vld [vmem:[%s5709_s22 + $0xe0] sm:$0xff] }
 0x3ac   : > { %v2214_v22 = vsel %vm1831_vm0, %v2164_v62, %v2196_v12  ;;  %v2230_v9 = vsel %vm1831_vm0, %v2196_v12, %v2164_v62  ;;  %v2418_v62 = vadd.f32 %v2386_v36, %v2354_v37 }
 0x3ad   : > { %v3753_v20 = vpack.c.bf16 %v2115_v55, %v2113_v40  ;;  %v3873_v24 = vpack.c.bf16 %v2116_v32, %v2114_v45  ;;  %v2387_v17 = vmul.f32 %v2214_v22, %v1727_v23  ;;  %v2388_v48 = vmul.f32 %v2230_v9, %v1728_v60  ;;  %v1893_v28 = vpop.permute.xlu0 %1892  ;;  %v1762_v40 = vld [vmem:[%s5709_s22 + $0xe8] sm:$0xff]  ;;  %v1699_v32 = vld [vmem:[%s5091_s25 + $0xf0] sm:$0xff] }
 0x3ae   : > { %v2482_v7 = vadd.f32 %v2450_v0, %v2418_v62  ;;  %v1989_v22 = vmul.f32 %v1697_v54, %v6653_v49  ;;  %v1990_v9 = vmul.f32 %v1698_v52, %v6639_v26  ;;  %v1991_v37 = vmul.f32 %v1699_v32, %v6654_v19 }
 0x3af   : > { %3965 = vst [vmem:[%s5758_s0 + $0x30] sm:$0xff] %v3753_v20   ;;  %3987 = vst [vmem:[%s5758_s0 + $0x70] sm:$0xff] %v3873_v24   ;;  %v2292_v1 = vpop.permute.xlu1 %2291  ;;  %v2419_v21 = vadd.f32 %v2387_v17, %v2355_v35  ;;  %v2420_v13 = vadd.f32 %v2388_v48, %v2356_v34 }
 0x3b0   : > { %v2310_v23 = vsel %vm1928_vm1, %v6225_v56, %v2292_v1  ;;  %v2326_v63 = vsel %vm1928_vm1, %v2292_v1, %v6225_v56 }
 0x3b1   : > { %v2451_v60 = vmul.f32 %v2326_v63, %v1759_v59  ;;  %v2452_v46 = vmul.f32 %v2310_v23, %v1760_v3  ;;  %v2166_v53 = vpop.permute.xlu0 %2165 }
 0x3b3   : > { %v2483_v50 = vadd.f32 %v2451_v60, %v2419_v21  ;;  %v2484_v15 = vadd.f32 %v2452_v46, %v2420_v13  ;;  %v1796_v10 = vpop.permute.xlu1 %1795 }
 0x3b5   : > { %v3793_v38 = vpack.c.bf16 %v2483_v50, %v2481_v14  ;;  %v3913_v61 = vpack.c.bf16 %v2484_v15, %v2482_v7  ;;  %v2262_v43 = vpop.permute.xlu0 %2261 }
 0x3b7   : > { %3972 = vst [vmem:[%s5777_s10 + $0x30] sm:$0xff] %v3793_v38   ;;  %3995 = vst [vmem:[%s5777_s10 + $0x70] sm:$0xff] %v3913_v61   ;;  %v1895_v56 = vpop.permute.xlu1 %1894 }
 0x3b9   : > { %v1826_v59 = vpop.permute.xlu0 %1825 }
 0x3ba   : > { %v1846_v11 = vsel %vm1831_vm0, %v1794_v42, %v1826_v59  ;;  %v1862_v44 = vsel %vm1831_vm0, %v1826_v59, %v1794_v42  ;;  %v1700_v42 = vld [vmem:[%s5091_s25 + $0xf8] sm:$0xff] }
 0x3bb   : > { %v2168_v3 = vpop.permute.xlu1 %2167  ;;  %v2021_v25 = vmul.f32 %v1846_v11, %v1729_v41  ;;  %v2022_v58 = vmul.f32 %v1862_v44, %v1730_v6  ;;  %v1992_v5 = vmul.f32 %v1700_v42, %v6646_v33  ;;  %v2358_v11 = vmul.f32 %v1698_v52, %v6645_v31  ;;  %v6656_v44 = vld [vmem:[#allocation69_spill] sm:$0xff] }
 0x3bd   : > { %v1925_v8 = vpop.permute.xlu0 %1924  ;;  %v2053_v35 = vadd.f32 %v2021_v25, %v1989_v22  ;;  %v2054_v27 = vadd.f32 %v2022_v58, %v1990_v9  ;;  %v2359_v25 = vmul.f32 %v1699_v32, %v6656_v44  ;;  %v6657_v58 = vld [vmem:[#allocation70_spill] sm:$0xff] }
 0x3be   : > { %v1943_v45 = vsel %vm1928_vm1, %v1893_v28, %v1925_v8  ;;  %v1959_v4 = vsel %vm1928_vm1, %v1925_v8, %v1893_v28  ;;  %v1764_v28 = vld [vmem:[%s5709_s22 + $0xf8] sm:$0xff] }
 0x3bf   : > { %v6285_v2 = vpop.permute.xlu1 %2263  ;;  %v2085_v17 = vmul.f32 %v1959_v4, %v1761_v57  ;;  %v2086_v48 = vmul.f32 %v1943_v45, %v1762_v40  ;;  %v2360_v45 = vmul.f32 %v1700_v42, %v6657_v58 }
 0x3c1   : > { %v2198_v36 = vpop.permute.xlu0 %2197  ;;  %v2117_v21 = vadd.f32 %v2085_v17, %v2053_v35  ;;  %v2118_v13 = vadd.f32 %v2086_v48, %v2054_v27 }
 0x3c2   : > { %v2215_v29 = vsel %vm1831_vm0, %v2166_v53, %v2198_v36  ;;  %v2231_v0 = vsel %vm1831_vm0, %v2198_v36, %v2166_v53 }
 0x3c3   : > { %v1828_v55 = vpop.permute.xlu1 %1827  ;;  %v2389_v60 = vmul.f32 %v2215_v29, %v1729_v41  ;;  %v2390_v46 = vmul.f32 %v2231_v0, %v1730_v6  ;;  %v6655_v41 = vld [vmem:[#allocation66_spill] sm:$0xff] }
 0x3c4   : > { %v1847_v12 = vsel %vm1831_vm0, %v1796_v10, %v1828_v55  ;;  %v1863_v39 = vsel %vm1831_vm0, %v1828_v55, %v1796_v10  ;;  %v2357_v6 = vmul.f32 %v1697_v54, %v6655_v41 }
 0x3c5   : > { %v2023_v20 = vmul.f32 %v1847_v12, %v1731_v16  ;;  %v2024_v24 = vmul.f32 %v1863_v39, %v1732_v18  ;;  %v2294_v23 = vpop.permute.xlu0 %2293  ;;  %v2422_v55 = vadd.f32 %v2390_v46, %v2358_v11 }
 0x3c6   : > { %v2311_v53 = vsel %vm1928_vm1, %v2262_v43, %v2294_v23  ;;  %v2327_v15 = vsel %vm1928_vm1, %v2294_v23, %v2262_v43 }
 0x3c7   : > { %v1927_v34 = vpop.permute.xlu1 %1926  ;;  %v2055_v51 = vadd.f32 %v2023_v20, %v1991_v37  ;;  %v2056_v62 = vadd.f32 %v2024_v24, %v1992_v5  ;;  %v2453_v4 = vmul.f32 %v2327_v15, %v1761_v57  ;;  %v2454_v43 = vmul.f32 %v2311_v53, %v1762_v40 }
 0x3c8   : > { %v1944_v26 = vsel %vm1928_vm1, %v1895_v56, %v1927_v34  ;;  %v1960_v1 = vsel %vm1928_vm1, %v1927_v34, %v1895_v56 }
 0x3c9   : > { %v2087_v63 = vmul.f32 %v1960_v1, %v1763_v30  ;;  %v2088_v33 = vmul.f32 %v1944_v26, %v1764_v28  ;;  %v2486_v32 = vadd.f32 %v2454_v43, %v2422_v55 }
 0x3cb   : > { %v2119_v14 = vadd.f32 %v2087_v63, %v2055_v51  ;;  %v2120_v7 = vadd.f32 %v2088_v33, %v2056_v62  ;;  %v2200_v50 = vpop.permute.xlu1 %2199 }
 0x3cc   : > { %v2216_v10 = vsel %vm1831_vm0, %v2168_v3, %v2200_v50  ;;  %v2232_v38 = vsel %vm1831_vm0, %v2200_v50, %v2168_v3  ;;  %v2421_v3 = vadd.f32 %v2389_v60, %v2357_v6 }
 0x3cd   : > { %v3758_v61 = vpack.c.bf16 %v2119_v14, %v2117_v21  ;;  %v3878_v56 = vpack.c.bf16 %v2120_v7, %v2118_v13  ;;  %v2391_v59 = vmul.f32 %v2216_v10, %v1731_v16  ;;  %v2392_v8 = vmul.f32 %v2232_v38, %v1732_v18 }
 0x3ce   : > { %v2485_v40 = vadd.f32 %v2453_v4, %v2421_v3 }
 0x3cf   : > { %3966 = vst [vmem:[%s5758_s0 + $0x38] sm:$0xff] %v3758_v61   ;;  %3988 = vst [vmem:[%s5758_s0 + $0x78] sm:$0xff] %v3878_v56   ;;  %v2296_v36 = vpop.permute.xlu1 %2295  ;;  %v2423_v52 = vadd.f32 %v2391_v59, %v2359_v25  ;;  %v2424_v16 = vadd.f32 %v2392_v8, %v2360_v45 }
 0x3d0   : > { %v2312_v54 = vsel %vm1928_vm1, %v6285_v2, %v2296_v36  ;;  %v2328_v31 = vsel %vm1928_vm1, %v2296_v36, %v6285_v2 }
 0x3d1   : > { %v2455_v18 = vmul.f32 %v2328_v31, %v1763_v30  ;;  %v2456_v57 = vmul.f32 %v2312_v54, %v1764_v28 }
 0x3d3   : > { %v2487_v42 = vadd.f32 %v2455_v18, %v2423_v52  ;;  %v2488_v12 = vadd.f32 %v2456_v57, %v2424_v16 }
 0x3d5   : > { %v3798_v39 = vpack.c.bf16 %v2487_v42, %v2485_v40  ;;  %v3918_v49 = vpack.c.bf16 %v2488_v12, %v2486_v32 }
 0x3d7   : > { %3973 = vst [vmem:[%s5777_s10 + $0x38] sm:$0xff] %v3798_v39   ;;  %3996 = vst [vmem:[%s5777_s10 + $0x78] sm:$0xff] %v3918_v49  }
 0x3d8   : > { %s6658_s26 = sld [smem:[#allocation26_spill]]  ;;  %s6659_s5 = sld [smem:[#allocation27_spill]] }
 0x3d9   : > { %s2998_s25 = sshll.u32 %s5758_s0, 4  ;;  %s6660_s17 = sld [smem:[#allocation77_spill]]  ;;  %s2999_s25 = int_to_ptr.vmem [resolvable:$true] %s2998_s25 }
 0x3da   : > { %s4663_s12 = smov 1024   ;;  %p6661_p11 = scmp.ne.s32.totalorder %s6558_s24, 0 }
 0x3db   : > { %s4664_s2 = smov 2048   ;;  %s4665_s20 = smov 16  }
 0x3dc   : > { %4049 = sst [smem:[#allocation15]] (%p6661_p11), %s4663_s12  ;;  %s4666_s16 = smov 64  }
 0x3dd   : > { %4050 = sst [smem:[#allocation15 + $0x1]] (%p6661_p11), %s4664_s2  ;;  %s4667_s18 = smov 4  }
 0x3de   : > { %s3606_s7 = sshll.u32 %s6658_s26, 4  ;;  %s3607_s4 = sshll.u32 %s6659_s5, 6 }
 0x3df   : > { %s2979_s6 = sadd.s32 %s3607_s4, %s3606_s7  ;;  %4051 = sst [smem:[#allocation15 + $0x2]] (%p6661_p11), %s4665_s20 }
 0x3e0   : > { %s6353_s11 = sshll.u32 %s2979_s6, 6  ;;  %4052 = sst [smem:[#allocation15 + $0x3]] (%p6661_p11), %s4666_s16 }
 0x3e1   : > { %s2981_s21 = scalar_lea.hbm %s6660_s17, %s6353_s11  ;;  %4053 = sst [smem:[#allocation15 + $0x4]] (%p6661_p11), %s4666_s16 }
 0x3e2   : > { %4054 = sst [smem:[#allocation15 + $0x5]] (%p6661_p11), %s4667_s18  ;;  %s4668_s22 = smov [#allocation14]  }
 0x3e3   : > { %s4669_s0 = smov 0  }
 0x3e4   : > { %4055 = dma.general (%p6661_p11), %s2999_s25, 2048, %s2981_s21, %s2957_s13, %s4668_s22, [#allocation15], %s4669_s0, 0  }
 0x3e5   : > { %s6662_s7 = sld [smem:[#allocation78_spill]]  ;;  %s3045_s6 = sshll.u32 %s5777_s10, 4  ;;  %s3046_s6 = int_to_ptr.vmem [resolvable:$true] %s3045_s6 }
 0x3e6   : > { %s4670_s1 = smov 1024   ;;  %s4671_s13 = smov 2048  }
 0x3e7   : > { %4056 = sst [smem:[#allocation17]] (%p6661_p11), %s4670_s1  ;;  %s4672_s25 = smov 16  }
 0x3e8   : > { %4057 = sst [smem:[#allocation17 + $0x1]] (%p6661_p11), %s4671_s13  ;;  %s4673_s23 = smov 64  }
 0x3e9   : > { %4058 = sst [smem:[#allocation17 + $0x2]] (%p6661_p11), %s4672_s25  ;;  %s4674_s17 = smov 4  }
 0x3ea   : > { %4059 = sst [smem:[#allocation17 + $0x3]] (%p6661_p11), %s4673_s23  ;;  %s4675_s21 = smov [#allocation16]  }
 0x3eb   : > { %s3028_s4 = scalar_lea.hbm %s6662_s7, %s6353_s11  ;;  %4060 = sst [smem:[#allocation17 + $0x4]] (%p6661_p11), %s4673_s23 }
 0x3ec   : > { %4061 = sst [smem:[#allocation17 + $0x5]] (%p6661_p11), %s4674_s17  ;;  %s4676_s10 = smov 0  }
 0x3ed   : > { %4062 = dma.general (%p6661_p11), %s3046_s6, 2048, %s3028_s4, %s6348_s14, %s4675_s21, [#allocation17], %s4676_s10, 0  }
 0x3ee   : > { %s6663_s20 = sld [smem:[#allocation79_spill]]  ;;  %s3092_s18 = sshll.u32 %s5594_s19, 4  ;;  %s3093_s18 = int_to_ptr.vmem [resolvable:$true] %s3092_s18 }
 0x3ef   : > { %s4677_s22 = smov 1024   ;;  %s4678_s0 = smov 2048  }
 0x3f0   : > { %4063 = sst [smem:[#allocation19]] (%p6661_p11), %s4677_s22  ;;  %s4679_s26 = smov 16  }
 0x3f1   : > { %4064 = sst [smem:[#allocation19 + $0x1]] (%p6661_p11), %s4678_s0  ;;  %s4680_s5 = smov 64  }
 0x3f2   : > { %4065 = sst [smem:[#allocation19 + $0x2]] (%p6661_p11), %s4679_s26  ;;  %s4681_s7 = smov 4  }
 0x3f3   : > { %4066 = sst [smem:[#allocation19 + $0x3]] (%p6661_p11), %s4680_s5  ;;  %s4683_s19 = smov 0  }
 0x3f4   : > { %s3075_s16 = scalar_lea.hbm %s6663_s20, %s6353_s11  ;;  %4067 = sst [smem:[#allocation19 + $0x4]] (%p6661_p11), %s4680_s5 }
 0x3f5   : > { %4068 = sst [smem:[#allocation19 + $0x5]] (%p6661_p11), %s4681_s7  ;;  %s4682_s11 = smov [#allocation18]  }
 0x3f6   : > { %4069 = dma.general (%p6661_p11), %s3093_s18, 2048, %s3075_s16, %s6348_s14, %s4682_s11, [#allocation19], %s4683_s19, 0  }
 0x3f7 PF: > { %p4103_p8 = scmp.ge.s32.totalorder %s4650_s15, 2  ;;  %s3120_s4 = sand.u32 1, %s4622_s30  }
 0x3f8   : > { %p6664_p3 = scmp.ne.s32.totalorder %s6559_s27, 0  ;;  %s3121_s6 = scalar_lea.sflag [#allocation4], %s3120_s4 }
 0x3fa   : > { %p4091_p1 = pnand %p4103_p8, %p6664_p3 }
 0x3fc   : > { %4601 = dma.done.wait (!%p4091_p1), %s3121_s6, 2048  }
 0x3fd   : > { %4603 = vsyncadd (!%p4091_p1), %s3121_s6, 4294965248  ;;  %s6665_s1 = sadd.s32 4294967294, %s4650_s15  }
 0x3fe   : > { %s3129_s13 = sand.u32 1, %s6665_s1  }
 0x3ff   : > { %s3130_s25 = scalar_lea.sflag [#allocation12], %s3129_s13 }
 0x400   : > { %4605 = dma.done.wait (!%p4091_p1), %s3130_s25, 4096  }
 0x401   : > { %4607 = vsyncadd (!%p4091_p1), %s3130_s25, 4294963200  ;;  %s29_s15 = sadd.s32 1, %s4650_s15   ;;  %s6666_s24 = sld [smem:[#allocation33_spill]] }
 0x402   : > { %p26_p6 = scmp.ge.s32.totalorder %s29_s15, 6   ;;  %s6667_s14 = sld [smem:[#allocation25_spill]] }
 0x403   : > { %s6668_s10 = sld [smem:[#allocation32_spill]]  ;;  %s6669_s11 = sld [smem:[#allocation28_spill]] }
 0x404   : > { %s6670_s12 = sld [smem:[#allocation29_spill]]  ;;  %s6671_s13 = sld [smem:[#allocation30_spill]] }
 0x405   : > { %s6672_s23 = sld [smem:[#allocation31_spill]]  ;;  %s6673_s27 = smov %s4614_s28 }
 0x406   : > { %s6674_s28 = smov %s4618_s29  ;;  %s6676_s30 = smov %s4626_s9 }
 0x407   : > { %s6675_s29 = smov %s6666_s24  ;;  %28 = sbr.rel (!%p26_p6) target bundleno = 22 (0x16), region = 176 }
 0x408   : > { %s6677_s9 = smov %s6667_s14 }
 0x40b   : > { %s6678_s14 = smov %s6672_s23 }
 0x40e   :  { %3144 = vsyncpa [#allocation3], 1 }
 0x40f   :  { %3146 = vsyncpa [#allocation3 + $0x1], 1 }
 0x410   :  { %3147 = vsyncpa [#allocation6], 1 }
 0x411   :  { %3148 = vsyncpa [#allocation4], 1 }
 0x412   :  { %3150 = vsyncpa [#allocation4 + $0x1], 1 }
 0x413   :  { %3151 = vsyncpa [#allocation12], 1 }
 0x414   :  { %3153 = vsyncpa [#allocation12 + $0x1], 1 }

</bundles_post_ra>
